<compile_context>
chip_gen: v5e
topology: v5e:2x2
jax: 0.10.0
libtpu: 0.0.40
codegen_flags: <defaults>
</compile_context>

<pallas_src>
import functools
import math

import jax
import jax.numpy as jnp
from jax.experimental import pallas as pl
from jax.experimental.pallas import tpu as pltpu


# ----------------------------------------------------------------------------
# small helpers (generation-aware budgets, tile / pad selection)
# ----------------------------------------------------------------------------
def _round_up(x, m):
    return ((x + m - 1) // m) * m


@functools.lru_cache(maxsize=None)
def _vmem_limit_bytes():
    """Scoped-VMEM budget: ~75% of physical VMEM, capped at 100 MiB.
    => ~96 MiB on v5e/v6e (128 MiB physical), ~48 MiB on v7x (64 MiB physical)."""
    cap = 128 * 1024 * 1024
    try:
        info = pltpu.get_tpu_info()
        cap = int(getattr(info, "vmem_capacity_bytes", cap))
    except Exception:
        pass
    return min((cap * 3) // 4, 100 * 1024 * 1024)


def _choose_tile(dim, preferred, align):
    """Return (tile, padded_dim): tile divides padded_dim, tile % align == 0."""
    if dim >= preferred:
        return preferred, _round_up(dim, preferred)
    padded = _round_up(dim, align)
    return padded, padded


def _maybe_halve(tile, padded, align, floor):
    half = tile // 2
    if half >= floor and half % align == 0 and padded % half == 0:
        return half
    return tile


def _choose_mm_tiles(M, K, N):
    big_vmem = _vmem_limit_bytes() > 64 * 1024 * 1024  # v5e / v6e
    tm, Mp = _choose_tile(M, 512, 16)    # bf16 packs 2 rows/sublane -> 16-row align
    tk, Kp = _choose_tile(K, 512, 128)
    tn, Np = _choose_tile(N, 1024 if big_vmem else 512, 128)
    # Keep >= 4 independent (i, j) output tiles so the "parallel" grid axes can
    # feed both v7x TensorCores (and megacore sharding in general) on small-M
    # weight-heavy late layers.
    for _ in range(4):
        if (Mp // tm) * (Np // tn) >= 4:
            break
        new_tn = _maybe_halve(tn, Np, 128, 256)
        if new_tn != tn:
            tn = new_tn
            continue
        new_tm = _maybe_halve(tm, Mp, 16, 128)
        if new_tm != tm:
            tm = new_tm
            continue
        break
    return tm, Mp, tk, Kp, tn, Np


def _pad2(a, rows, cols):
    pr, pc = rows - a.shape[0], cols - a.shape[1]
    if pr or pc:
        a = jnp.pad(a, ((0, pr), (0, pc)))
    return a


# ----------------------------------------------------------------------------
# Pallas kernels
# ----------------------------------------------------------------------------
def _epilogue(acc_f32, b_ref, res_ref, relu, out_dtype):
    r = acc_f32 + b_ref[...]
    if res_ref is not None:
        r = r + res_ref[...].astype(jnp.float32)
    if relu:
        r = jnp.maximum(r, 0.0)
    return r.astype(out_dtype)


def _mm_multi_k_kernel(*refs, relu, has_res):
    if has_res:
        x_ref, w_ref, b_ref, res_ref, o_ref, acc_ref = refs
    else:
        x_ref, w_ref, b_ref, o_ref, acc_ref = refs
        res_ref = None

    k = pl.program_id(2)
    prod = jnp.dot(x_ref[...], w_ref[...], preferred_element_type=jnp.float32)

    @pl.when(k == 0)
    def _():
        acc_ref[...] = prod          # no zero-fill pass

    @pl.when(k > 0)
    def _():
        acc_ref[...] += prod

    @pl.when(k == pl.num_programs(2) - 1)
    def _():
        o_ref[...] = _epilogue(acc_ref[...], b_ref, res_ref, relu, o_ref.dtype)


def _mm_single_k_kernel(*refs, relu, has_res):
    # Whole K in one tile (most 1x1 convs): no f32 accumulator scratch at all.
    if has_res:
        x_ref, w_ref, b_ref, res_ref, o_ref = refs
    else:
        x_ref, w_ref, b_ref, o_ref = refs
        res_ref = None
    prod = jnp.dot(x_ref[...], w_ref[...], preferred_element_type=jnp.float32)
    o_ref[...] = _epilogue(prod, b_ref, res_ref, relu, o_ref.dtype)


def _maxpool_taps_kernel(*refs):
    # refs = (tap_0, ..., tap_{T-1}, out); element-wise max in bf16 (exact).
    o_ref = refs[-1]
    acc = refs[0][...]
    for r in refs[1:-1]:
        acc = jnp.maximum(acc, r[...])
    o_ref[...] = acc


def _gap_kernel(x_ref, o_ref):
    # x_ref: (N, HW, tc) -> mean over spatial axis (f32 accumulation).
    o_ref[...] = jnp.mean(x_ref[...].astype(jnp.float32), axis=1).astype(o_ref.dtype)


# ----------------------------------------------------------------------------
# cached pallas_call builders
# ----------------------------------------------------------------------------
@functools.lru_cache(maxsize=None)
def _build_matmul(Mp, Kp, Np, tm, tk, tn, relu, has_res, out_dtype_name):
    out_dtype = jnp.dtype(out_dtype_name)
    num_k = Kp // tk
    vmem = _vmem_limit_bytes()

    if num_k == 1:
        kernel = functools.partial(_mm_single_k_kernel, relu=relu, has_res=has_res)
        in_specs = [
            pl.BlockSpec((tm, tk), lambda i, j: (i, 0)),   # activations
            pl.BlockSpec((tk, tn), lambda i, j: (0, j)),   # weights
            pl.BlockSpec((1, tn), lambda i, j: (0, j)),    # bias
        ]
        if has_res:
            in_specs.append(pl.BlockSpec((tm, tn), lambda i, j: (i, j)))
        return pl.pallas_call(
            kernel,
            out_shape=jax.ShapeDtypeStruct((Mp, Np), out_dtype),
            grid=(Mp // tm, Np // tn),
            in_specs=in_specs,
            out_specs=pl.BlockSpec((tm, tn), lambda i, j: (i, j)),
            compiler_params=pltpu.CompilerParams(
                dimension_semantics=("parallel", "parallel"),
                vmem_limit_bytes=vmem),
        )

    kernel = functools.partial(_mm_multi_k_kernel, relu=relu, has_res=has_res)
    in_specs = [
        pl.BlockSpec((tm, tk), lambda i, j, k: (i, k)),    # activations
        pl.BlockSpec((tk, tn), lambda i, j, k: (k, j)),    # weights
        pl.BlockSpec((1, tn), lambda i, j, k: (0, j)),     # bias
    ]
    if has_res:
        # residual block index is constant along k -> fetched once per output tile
        in_specs.append(pl.BlockSpec((tm, tn), lambda i, j, k: (i, j)))
    return pl.pallas_call(
        kernel,
        out_shape=jax.ShapeDtypeStruct((Mp, Np), out_dtype),
        grid=(Mp // tm, Np // tn, num_k),
        in_specs=in_specs,
        out_specs=pl.BlockSpec((tm, tn), lambda i, j, k: (i, j)),
        scratch_shapes=[pltpu.VMEM((tm, tn), jnp.float32)],
        compiler_params=pltpu.CompilerParams(
            dimension_semantics=("parallel", "parallel", "arbitrary"),
            vmem_limit_bytes=vmem),
    )


@functools.lru_cache(maxsize=None)
def _build_maxpool(T, Mp, C, tm):
    return pl.pallas_call(
        _maxpool_taps_kernel,
        out_shape=jax.ShapeDtypeStruct((Mp, C), jnp.bfloat16),
        grid=(Mp // tm,),
        in_specs=[pl.BlockSpec((tm, C), lambda i: (i, 0)) for _ in range(T)],
        out_specs=pl.BlockSpec((tm, C), lambda i: (i, 0)),
        compiler_params=pltpu.CompilerParams(
            dimension_semantics=("parallel",),
            vmem_limit_bytes=_vmem_limit_bytes()),
    )


@functools.lru_cache(maxsize=None)
def _build_gap(N, HW, Cp, tc):
    return pl.pallas_call(
        _gap_kernel,
        out_shape=jax.ShapeDtypeStruct((N, Cp), jnp.bfloat16),
        grid=(Cp // tc,),
        in_specs=[pl.BlockSpec((N, HW, tc), lambda i: (0, 0, i))],
        out_specs=pl.BlockSpec((N, tc), lambda i: (0, i)),
        compiler_params=pltpu.CompilerParams(
            dimension_semantics=("parallel",),
            vmem_limit_bytes=_vmem_limit_bytes()),
    )


# ----------------------------------------------------------------------------
# op wrappers (im2col glue + Pallas hot paths); all called under one jax.jit
# ----------------------------------------------------------------------------
def matmul_bias_act(x, w, b, relu, residual=None, out_dtype=jnp.bfloat16):
    """(M,K) @ (K,N) + b [+ residual] [ReLU]; bf16 MXU inputs, f32 accumulate."""
    M, K = x.shape
    N = w.shape[1]
    tm, Mp, tk, Kp, tn, Np = _choose_mm_tiles(M, K, N)

    xq = _pad2(x.astype(jnp.bfloat16), Mp, Kp)
    wq = _pad2(w.astype(jnp.bfloat16), Kp, Np)
    bq = _pad2(b.reshape(1, N).astype(jnp.float32), 1, Np)
    args = [xq, wq, bq]
    if residual is not None:
        args.append(_pad2(residual.astype(jnp.bfloat16), Mp, Np))

    call = _build_matmul(Mp, Kp, Np, tm, tk, tn, bool(relu),
                         residual is not None, jnp.dtype(out_dtype).name)
    out = call(*args)
    if (Mp, Np) != (M, N):
        out = out[:M, :N]
    return out


def conv_bn_act(x, w, b, stride, relu, residual=None):
    """x: (N,H,W,Cin); w: (kh,kw,Cin,Cout) with BN folded in; b: (Cout,).
    Optional `residual` (N,Ho,Wo,Cout) is fused into the matmul epilogue."""
    N, H, W, Cin = x.shape
    kh, kw, _, Cout = w.shape
    pad = (kh - 1) // 2  # resnet 'same'-style padding: 7->3, 3->1, 1->0
    Ho = (H + 2 * pad - kh) // stride + 1
    Wo = (W + 2 * pad - kw) // stride + 1

    if kh == 1 and kw == 1 and stride == 1:
        patches = x.reshape(N * H * W, Cin)
    else:
        # TODO(synk): fold the kh*kw taps into the matmul K grid axis (direct conv
        # via manual DMA) to avoid the kh*kw x HBM materialization of the patches.
        xp = jnp.pad(x, ((0, 0), (pad, pad), (pad, pad), (0, 0)))
        cols = []
        for i in range(kh):
            for j in range(kw):
                cols.append(xp[:, i:i + stride * Ho:stride,
                               j:j + stride * Wo:stride, :])
        patches = jnp.concatenate(cols, axis=-1).reshape(N * Ho * Wo, kh * kw * Cin)

    wm = w.reshape(kh * kw * Cin, Cout)
    res = None if residual is None else residual.reshape(N * Ho * Wo, Cout)
    out = matmul_bias_act(patches, wm, b, relu, residual=res,
                          out_dtype=jnp.bfloat16)
    return out.reshape(N, Ho, Wo, Cout)


def maxpool3x3_s2(x):
    N, H, W, C = x.shape
    k, stride, pad = 3, 2, 1
    Ho = (H + 2 * pad - k) // stride + 1
    Wo = (W + 2 * pad - k) // stride + 1
    xp = jnp.pad(x, ((0, 0), (pad, pad), (pad, pad), (0, 0)),
                 constant_values=-jnp.inf)

    M = N * Ho * Wo
    tm, Mp = _choose_tile(M, 1024, 16)
    taps = []
    for i in range(k):
        for j in range(k):
            t = xp[:, i:i + stride * Ho:stride,
                   j:j + stride * Wo:stride, :].reshape(M, C)
            if Mp != M:
                t = jnp.pad(t, ((0, Mp - M), (0, 0)))
            taps.append(t)

    out = _build_maxpool(k * k, Mp, C, tm)(*taps)
    if Mp != M:
        out = out[:M]
    return out.reshape(N, Ho, Wo, C)


def global_avg_pool(x):
    N, H, W, C = x.shape
    HW = H * W
    tc, Cp = _choose_tile(C, 512, 128)
    xr = x.reshape(N, HW, C)
    if Cp != C:
        xr = jnp.pad(xr, ((0, 0), (0, 0), (0, Cp - C)))
    out = _build_gap(N, HW, Cp, tc)(xr)
    if Cp != C:
        out = out[:, :C]
    return out


# ----------------------------------------------------------------------------
# Parameter construction (deterministic, BN folded into conv scale/bias)
# ----------------------------------------------------------------------------
class KeyGen:
    def __init__(self, key):
        self.key = key
        self.i = 0

    def __call__(self):
        k = jax.random.fold_in(self.key, self.i)
        self.i += 1
        return k


def _conv_params(kg, kh, kw, cin, cout):
    scale = 1.0 / math.sqrt(kh * kw * cin)
    w = jax.random.normal(kg(), (kh, kw, cin, cout), jnp.float32) * scale
    b = jax.random.normal(kg(), (cout,), jnp.float32) * 0.01
    # Weights stored in bf16 (MXU input dtype); biases stay f32 for the epilogue.
    return w.astype(jnp.bfloat16), b


def init_backbone_params(key, in_ch=3, width_scale=1.0 / 32.0, outdim=1000):
    # resnet50x4: stem=256, stage base widths [256,512,1024,2048], expansion 4,
    # blocks [3,4,6,3], latent_dim = 2048*4 = 8192.  Scaled down by width_scale.
    kg = KeyGen(key)
    stem = max(8, int(256 * width_scale))
    bases = [max(8, int(c * width_scale)) for c in (256, 512, 1024, 2048)]
    blocks = [3, 4, 6, 3]
    expansion = 4

    params = {}
    params["conv1_w"], params["conv1_b"] = _conv_params(kg, 7, 7, in_ch, stem)

    in_c = stem
    stages = []
    for si, (base, nblk) in enumerate(zip(bases, blocks)):
        stage = []
        for bi in range(nblk):
            stride = 2 if (si > 0 and bi == 0) else 1
            out_c = base * expansion
            blk = {}  # stride kept OUT of the pytree (static under jit)
            blk["w1"], blk["b1"] = _conv_params(kg, 1, 1, in_c, base)
            blk["w2"], blk["b2"] = _conv_params(kg, 3, 3, base, base)
            blk["w3"], blk["b3"] = _conv_params(kg, 1, 1, base, out_c)
            if stride != 1 or in_c != out_c:
                blk["wd"], blk["bd"] = _conv_params(kg, 1, 1, in_c, out_c)
            stage.append(blk)
            in_c = out_c
        stages.append(stage)
    params["stages"] = stages

    fc_in = in_c  # scaled latent dim (8192 at full width)
    params["fc_w"] = (jax.random.normal(kg(), (fc_in, outdim), jnp.float32)
                      * (1.0 / math.sqrt(fc_in))).astype(jnp.bfloat16)
    params["fc_b"] = jnp.zeros((outdim,), jnp.float32)
    return params


# ----------------------------------------------------------------------------
# Forward pass (== BackboneOnly.forward: returns only `out`), one jax.jit
# ----------------------------------------------------------------------------
def bottleneck(x, blk, stride):
    out = conv_bn_act(x, blk["w1"], blk["b1"], 1, relu=True)
    out = conv_bn_act(out, blk["w2"], blk["b2"], stride, relu=True)
    if "wd" in blk:
        identity = conv_bn_act(x, blk["wd"], blk["bd"], stride, relu=False)
    else:
        identity = x
    # conv3 with the residual add + ReLU fused into the matmul epilogue.
    out = conv_bn_act(out, blk["w3"], blk["b3"], 1, relu=True, residual=identity)
    return out


def _forward_impl(params, x_nchw):
    # NCHW -> NHWC, bf16 activations (f32 accumulate inside every kernel).
    x = jnp.transpose(x_nchw, (0, 2, 3, 1)).astype(jnp.bfloat16)
    x = conv_bn_act(x, params["conv1_w"], params["conv1_b"], stride=2, relu=True)
    x = maxpool3x3_s2(x)
    for si, stage in enumerate(params["stages"]):
        for bi, blk in enumerate(stage):
            stride = 2 if (si > 0 and bi == 0) else 1
            x = bottleneck(x, blk, stride)
    fea = global_avg_pool(x)                                   # (N, latent) bf16
    out = matmul_bias_act(fea, params["fc_w"], params["fc_b"], relu=False,
                          out_dtype=jnp.float32)               # FC, f32 logits
    return out                                                 # BackboneOnly returns `out`


backbone_only_forward = jax.jit(_forward_impl)


# ----------------------------------------------------------------------------
if __name__ == "__main__":
    key = jax.random.PRNGKey(0)
    k_params, k_x = jax.random.split(key)

    params = init_backbone_params(k_params, in_ch=3, width_scale=1.0 / 32.0,
                                  outdim=1000)
    x = jax.random.normal(k_x, (2, 3, 16, 16), jnp.float32)  # NCHW, like PyTorch

    out = backbone_only_forward(params, x)
    out = jax.block_until_ready(out)

    assert out.shape == (2, 1000), out.shape
    assert out.dtype == jnp.float32
    assert bool(jnp.all(jnp.isfinite(out)))
    print("KERNEL_OK")
</pallas_src>

<mosaic_0001>
module attributes {stable_mosaic.version = 11 : i64} {
  func.func @_mm_single_k_kernel(%arg0: i32, %arg1: i32, %arg2: memref<128x256xbf16, #tpu.memory_space<vmem>>, %arg3: memref<256x128xbf16, #tpu.memory_space<vmem>>, %arg4: memref<1x128xf32, #tpu.memory_space<vmem>>, %arg5: memref<128x128xbf16, #tpu.memory_space<vmem>>) attributes {dimension_semantics = [#tpu.dimension_semantics<parallel>, #tpu.dimension_semantics<parallel>], iteration_bounds = array<i64: 1, 1>, scalar_prefetch = 0 : i64, scratch_operands = 0 : i64, tpu.core_type = #tpu.core_type<tc>, window_params = [{transform_indices = @transform_0, window_bounds = array<i64: 128, 256>}, {transform_indices = @transform_1, window_bounds = array<i64: 256, 128>}, {transform_indices = @transform_2, window_bounds = array<i64: 1, 128>}, {transform_indices = @transform_3, window_bounds = array<i64: 128, 128>}]} {
    %c0 = arith.constant 0 : index
    %c0_0 = arith.constant 0 : index
    %0 = vector.load %arg2[%c0, %c0_0] : memref<128x256xbf16, #tpu.memory_space<vmem>>, vector<128x256xbf16>
    %c0_1 = arith.constant 0 : index
    %c0_2 = arith.constant 0 : index
    %1 = vector.load %arg3[%c0_1, %c0_2] : memref<256x128xbf16, #tpu.memory_space<vmem>>, vector<256x128xbf16>
    %cst = arith.constant dense<0.000000e+00> : vector<128x128xf32>
    %2 = tpu.matmul %0, %1, %cst {dimension_numbers = #tpu.dot_dimension_numbers<[1], [0], [0], [1], [0, 0, 1, 1], [], []>} : vector<128x256xbf16>, vector<256x128xbf16>, vector<128x128xf32> -> vector<128x128xf32>
    %c0_3 = arith.constant 0 : index
    %c0_4 = arith.constant 0 : index
    %3 = vector.load %arg4[%c0_3, %c0_4] : memref<1x128xf32, #tpu.memory_space<vmem>>, vector<1x128xf32>
    %4 = vector.broadcast %3 : vector<1x128xf32> to vector<128x128xf32>
    %5 = arith.addf %2, %4 : vector<128x128xf32>
    %cst_5 = arith.constant 0.000000e+00 : f32
    %6 = vector.broadcast %cst_5 : f32 to vector<128x128xf32>
    %7 = arith.maximumf %5, %6 : vector<128x128xf32>
    %8 = arith.truncf %7 : vector<128x128xf32> to vector<128x128xbf16>
    %c0_6 = arith.constant 0 : index
    %c0_7 = arith.constant 0 : index
    %9 = vector.load %arg5[%c0_6, %c0_7] : memref<128x128xbf16, #tpu.memory_space<vmem>>, vector<128x128xbf16>
    tpu.vector_store %arg5[%c0_6, %c0_7], %8 {strides = array<i32>} : memref<128x128xbf16, #tpu.memory_space<vmem>>, vector<128x128xbf16>,
    return
  }
  func.func @transform_0(%arg0: i32, %arg1: i32) -> (i32, i32) {
    %c0_i32 = arith.constant 0 : i32
    %c0_i32_0 = arith.constant 0 : i32
    return %arg0, %c0_i32 : i32, i32
  }
  func.func @transform_1(%arg0: i32, %arg1: i32) -> (i32, i32) {
    %c0_i32 = arith.constant 0 : i32
    %c0_i32_0 = arith.constant 0 : i32
    return %c0_i32, %arg1 : i32, i32
  }
  func.func @transform_2(%arg0: i32, %arg1: i32) -> (i32, i32) {
    %c0_i32 = arith.constant 0 : i32
    %c0_i32_0 = arith.constant 0 : i32
    return %c0_i32, %arg1 : i32, i32
  }
  func.func @transform_3(%arg0: i32, %arg1: i32) -> (i32, i32) {
    %c0_i32 = arith.constant 0 : i32
    return %arg0, %arg1 : i32, i32
  }
}

module attributes {stable_mosaic.version = 11 : i64} {
  func.func @_maxpool_taps_kernel(%arg0: i32, %arg1: memref<32x8xbf16, #tpu.memory_space<vmem>>, %arg2: memref<32x8xbf16, #tpu.memory_space<vmem>>, %arg3: memref<32x8xbf16, #tpu.memory_space<vmem>>, %arg4: memref<32x8xbf16, #tpu.memory_space<vmem>>, %arg5: memref<32x8xbf16, #tpu.memory_space<vmem>>, %arg6: memref<32x8xbf16, #tpu.memory_space<vmem>>, %arg7: memref<32x8xbf16, #tpu.memory_space<vmem>>, %arg8: memref<32x8xbf16, #tpu.memory_space<vmem>>, %arg9: memref<32x8xbf16, #tpu.memory_space<vmem>>, %arg10: memref<32x8xbf16, #tpu.memory_space<vmem>>) attributes {dimension_semantics = [#tpu.dimension_semantics<parallel>], iteration_bounds = array<i64: 1>, scalar_prefetch = 0 : i64, scratch_operands = 0 : i64, tpu.core_type = #tpu.core_type<tc>, window_params = [{transform_indices = @transform_0, window_bounds = array<i64: 32, 8>}, {transform_indices = @transform_1, window_bounds = array<i64: 32, 8>}, {transform_indices = @transform_2, window_bounds = array<i64: 32, 8>}, {transform_indices = @transform_3, window_bounds = array<i64: 32, 8>}, {transform_indices = @transform_4, window_bounds = array<i64: 32, 8>}, {transform_indices = @transform_5, window_bounds = array<i64: 32, 8>}, {transform_indices = @transform_6, window_bounds = array<i64: 32, 8>}, {transform_indices = @transform_7, window_bounds = array<i64: 32, 8>}, {transform_indices = @transform_8, window_bounds = array<i64: 32, 8>}, {transform_indices = @transform_9, window_bounds = array<i64: 32, 8>}]} {
    %c0 = arith.constant 0 : index
    %c0_0 = arith.constant 0 : index
    %0 = vector.load %arg1[%c0, %c0_0] : memref<32x8xbf16, #tpu.memory_space<vmem>>, vector<32x8xbf16>
    %c0_1 = arith.constant 0 : index
    %c0_2 = arith.constant 0 : index
    %1 = vector.load %arg2[%c0_1, %c0_2] : memref<32x8xbf16, #tpu.memory_space<vmem>>, vector<32x8xbf16>
    %2 = arith.maximumf %0, %1 : vector<32x8xbf16>
    %c0_3 = arith.constant 0 : index
    %c0_4 = arith.constant 0 : index
    %3 = vector.load %arg3[%c0_3, %c0_4] : memref<32x8xbf16, #tpu.memory_space<vmem>>, vector<32x8xbf16>
    %4 = arith.maximumf %2, %3 : vector<32x8xbf16>
    %c0_5 = arith.constant 0 : index
    %c0_6 = arith.constant 0 : index
    %5 = vector.load %arg4[%c0_5, %c0_6] : memref<32x8xbf16, #tpu.memory_space<vmem>>, vector<32x8xbf16>
    %6 = arith.maximumf %4, %5 : vector<32x8xbf16>
    %c0_7 = arith.constant 0 : index
    %c0_8 = arith.constant 0 : index
    %7 = vector.load %arg5[%c0_7, %c0_8] : memref<32x8xbf16, #tpu.memory_space<vmem>>, vector<32x8xbf16>
    %8 = arith.maximumf %6, %7 : vector<32x8xbf16>
    %c0_9 = arith.constant 0 : index
    %c0_10 = arith.constant 0 : index
    %9 = vector.load %arg6[%c0_9, %c0_10] : memref<32x8xbf16, #tpu.memory_space<vmem>>, vector<32x8xbf16>
    %10 = arith.maximumf %8, %9 : vector<32x8xbf16>
    %c0_11 = arith.constant 0 : index
    %c0_12 = arith.constant 0 : index
    %11 = vector.load %arg7[%c0_11, %c0_12] : memref<32x8xbf16, #tpu.memory_space<vmem>>, vector<32x8xbf16>
    %12 = arith.maximumf %10, %11 : vector<32x8xbf16>
    %c0_13 = arith.constant 0 : index
    %c0_14 = arith.constant 0 : index
    %13 = vector.load %arg8[%c0_13, %c0_14] : memref<32x8xbf16, #tpu.memory_space<vmem>>, vector<32x8xbf16>
    %14 = arith.maximumf %12, %13 : vector<32x8xbf16>
    %c0_15 = arith.constant 0 : index
    %c0_16 = arith.constant 0 : index
    %15 = vector.load %arg9[%c0_15, %c0_16] : memref<32x8xbf16, #tpu.memory_space<vmem>>, vector<32x8xbf16>
    %16 = arith.maximumf %14, %15 : vector<32x8xbf16>
    %c0_17 = arith.constant 0 : index
    %c0_18 = arith.constant 0 : index
    %17 = vector.load %arg10[%c0_17, %c0_18] : memref<32x8xbf16, #tpu.memory_space<vmem>>, vector<32x8xbf16>
    tpu.vector_store %arg10[%c0_17, %c0_18], %16 {strides = array<i32>} : memref<32x8xbf16, #tpu.memory_space<vmem>>, vector<32x8xbf16>,
    return
  }
  func.func @transform_0(%arg0: i32) -> (i32, i32) {
    %c0_i32 = arith.constant 0 : i32
    %c0_i32_0 = arith.constant 0 : i32
    return %arg0, %c0_i32 : i32, i32
  }
  func.func @transform_1(%arg0: i32) -> (i32, i32) {
    %c0_i32 = arith.constant 0 : i32
    %c0_i32_0 = arith.constant 0 : i32
    return %arg0, %c0_i32 : i32, i32
  }
  func.func @transform_2(%arg0: i32) -> (i32, i32) {
    %c0_i32 = arith.constant 0 : i32
    %c0_i32_0 = arith.constant 0 : i32
    return %arg0, %c0_i32 : i32, i32
  }
  func.func @transform_3(%arg0: i32) -> (i32, i32) {
    %c0_i32 = arith.constant 0 : i32
    %c0_i32_0 = arith.constant 0 : i32
    return %arg0, %c0_i32 : i32, i32
  }
  func.func @transform_4(%arg0: i32) -> (i32, i32) {
    %c0_i32 = arith.constant 0 : i32
    %c0_i32_0 = arith.constant 0 : i32
    return %arg0, %c0_i32 : i32, i32
  }
  func.func @transform_5(%arg0: i32) -> (i32, i32) {
    %c0_i32 = arith.constant 0 : i32
    %c0_i32_0 = arith.constant 0 : i32
    return %arg0, %c0_i32 : i32, i32
  }
  func.func @transform_6(%arg0: i32) -> (i32, i32) {
    %c0_i32 = arith.constant 0 : i32
    %c0_i32_0 = arith.constant 0 : i32
    return %arg0, %c0_i32 : i32, i32
  }
  func.func @transform_7(%arg0: i32) -> (i32, i32) {
    %c0_i32 = arith.constant 0 : i32
    %c0_i32_0 = arith.constant 0 : i32
    return %arg0, %c0_i32 : i32, i32
  }
  func.func @transform_8(%arg0: i32) -> (i32, i32) {
    %c0_i32 = arith.constant 0 : i32
    %c0_i32_0 = arith.constant 0 : i32
    return %arg0, %c0_i32 : i32, i32
  }
  func.func @transform_9(%arg0: i32) -> (i32, i32) {
    %c0_i32 = arith.constant 0 : i32
    %c0_i32_0 = arith.constant 0 : i32
    return %arg0, %c0_i32 : i32, i32
  }
}

module attributes {stable_mosaic.version = 11 : i64} {
  func.func @_mm_single_k_kernel(%arg0: i32, %arg1: i32, %arg2: memref<32x128xbf16, #tpu.memory_space<vmem>>, %arg3: memref<128x128xbf16, #tpu.memory_space<vmem>>, %arg4: memref<1x128xf32, #tpu.memory_space<vmem>>, %arg5: memref<32x128xbf16, #tpu.memory_space<vmem>>) attributes {dimension_semantics = [#tpu.dimension_semantics<parallel>, #tpu.dimension_semantics<parallel>], iteration_bounds = array<i64: 1, 1>, scalar_prefetch = 0 : i64, scratch_operands = 0 : i64, tpu.core_type = #tpu.core_type<tc>, window_params = [{transform_indices = @transform_0, window_bounds = array<i64: 32, 128>}, {transform_indices = @transform_1, window_bounds = array<i64: 128, 128>}, {transform_indices = @transform_2, window_bounds = array<i64: 1, 128>}, {transform_indices = @transform_3, window_bounds = array<i64: 32, 128>}]} {
    %c0 = arith.constant 0 : index
    %c0_0 = arith.constant 0 : index
    %0 = vector.load %arg2[%c0, %c0_0] : memref<32x128xbf16, #tpu.memory_space<vmem>>, vector<32x128xbf16>
    %c0_1 = arith.constant 0 : index
    %c0_2 = arith.constant 0 : index
    %1 = vector.load %arg3[%c0_1, %c0_2] : memref<128x128xbf16, #tpu.memory_space<vmem>>, vector<128x128xbf16>
    %cst = arith.constant dense<0.000000e+00> : vector<32x128xf32>
    %2 = tpu.matmul %0, %1, %cst {dimension_numbers = #tpu.dot_dimension_numbers<[1], [0], [0], [1], [0, 0, 1, 1], [], []>} : vector<32x128xbf16>, vector<128x128xbf16>, vector<32x128xf32> -> vector<32x128xf32>
    %c0_3 = arith.constant 0 : index
    %c0_4 = arith.constant 0 : index
    %3 = vector.load %arg4[%c0_3, %c0_4] : memref<1x128xf32, #tpu.memory_space<vmem>>, vector<1x128xf32>
    %4 = vector.broadcast %3 : vector<1x128xf32> to vector<32x128xf32>
    %5 = arith.addf %2, %4 : vector<32x128xf32>
    %cst_5 = arith.constant 0.000000e+00 : f32
    %6 = vector.broadcast %cst_5 : f32 to vector<32x128xf32>
    %7 = arith.maximumf %5, %6 : vector<32x128xf32>
    %8 = arith.truncf %7 : vector<32x128xf32> to vector<32x128xbf16>
    %c0_6 = arith.constant 0 : index
    %c0_7 = arith.constant 0 : index
    %9 = vector.load %arg5[%c0_6, %c0_7] : memref<32x128xbf16, #tpu.memory_space<vmem>>, vector<32x128xbf16>
    tpu.vector_store %arg5[%c0_6, %c0_7], %8 {strides = array<i32>} : memref<32x128xbf16, #tpu.memory_space<vmem>>, vector<32x128xbf16>,
    return
  }
  func.func @transform_0(%arg0: i32, %arg1: i32) -> (i32, i32) {
    %c0_i32 = arith.constant 0 : i32
    %c0_i32_0 = arith.constant 0 : i32
    return %arg0, %c0_i32 : i32, i32
  }
  func.func @transform_1(%arg0: i32, %arg1: i32) -> (i32, i32) {
    %c0_i32 = arith.constant 0 : i32
    %c0_i32_0 = arith.constant 0 : i32
    return %c0_i32, %arg1 : i32, i32
  }
  func.func @transform_2(%arg0: i32, %arg1: i32) -> (i32, i32) {
    %c0_i32 = arith.constant 0 : i32
    %c0_i32_0 = arith.constant 0 : i32
    return %c0_i32, %arg1 : i32, i32
  }
  func.func @transform_3(%arg0: i32, %arg1: i32) -> (i32, i32) {
    %c0_i32 = arith.constant 0 : i32
    return %arg0, %arg1 : i32, i32
  }
}

module attributes {stable_mosaic.version = 11 : i64} {
  func.func @_mm_single_k_kernel(%arg0: i32, %arg1: i32, %arg2: memref<32x128xbf16, #tpu.memory_space<vmem>>, %arg3: memref<128x128xbf16, #tpu.memory_space<vmem>>, %arg4: memref<1x128xf32, #tpu.memory_space<vmem>>, %arg5: memref<32x128xbf16, #tpu.memory_space<vmem>>) attributes {dimension_semantics = [#tpu.dimension_semantics<parallel>, #tpu.dimension_semantics<parallel>], iteration_bounds = array<i64: 1, 1>, scalar_prefetch = 0 : i64, scratch_operands = 0 : i64, tpu.core_type = #tpu.core_type<tc>, window_params = [{transform_indices = @transform_0, window_bounds = array<i64: 32, 128>}, {transform_indices = @transform_1, window_bounds = array<i64: 128, 128>}, {transform_indices = @transform_2, window_bounds = array<i64: 1, 128>}, {transform_indices = @transform_3, window_bounds = array<i64: 32, 128>}]} {
    %c0 = arith.constant 0 : index
    %c0_0 = arith.constant 0 : index
    %0 = vector.load %arg2[%c0, %c0_0] : memref<32x128xbf16, #tpu.memory_space<vmem>>, vector<32x128xbf16>
    %c0_1 = arith.constant 0 : index
    %c0_2 = arith.constant 0 : index
    %1 = vector.load %arg3[%c0_1, %c0_2] : memref<128x128xbf16, #tpu.memory_space<vmem>>, vector<128x128xbf16>
    %cst = arith.constant dense<0.000000e+00> : vector<32x128xf32>
    %2 = tpu.matmul %0, %1, %cst {dimension_numbers = #tpu.dot_dimension_numbers<[1], [0], [0], [1], [0, 0, 1, 1], [], []>} : vector<32x128xbf16>, vector<128x128xbf16>, vector<32x128xf32> -> vector<32x128xf32>
    %c0_3 = arith.constant 0 : index
    %c0_4 = arith.constant 0 : index
    %3 = vector.load %arg4[%c0_3, %c0_4] : memref<1x128xf32, #tpu.memory_space<vmem>>, vector<1x128xf32>
    %4 = vector.broadcast %3 : vector<1x128xf32> to vector<32x128xf32>
    %5 = arith.addf %2, %4 : vector<32x128xf32>
    %6 = arith.truncf %5 : vector<32x128xf32> to vector<32x128xbf16>
    %c0_5 = arith.constant 0 : index
    %c0_6 = arith.constant 0 : index
    %7 = vector.load %arg5[%c0_5, %c0_6] : memref<32x128xbf16, #tpu.memory_space<vmem>>, vector<32x128xbf16>
    tpu.vector_store %arg5[%c0_5, %c0_6], %6 {strides = array<i32>} : memref<32x128xbf16, #tpu.memory_space<vmem>>, vector<32x128xbf16>,
    return
  }
  func.func @transform_0(%arg0: i32, %arg1: i32) -> (i32, i32) {
    %c0_i32 = arith.constant 0 : i32
    %c0_i32_0 = arith.constant 0 : i32
    return %arg0, %c0_i32 : i32, i32
  }
  func.func @transform_1(%arg0: i32, %arg1: i32) -> (i32, i32) {
    %c0_i32 = arith.constant 0 : i32
    %c0_i32_0 = arith.constant 0 : i32
    return %c0_i32, %arg1 : i32, i32
  }
  func.func @transform_2(%arg0: i32, %arg1: i32) -> (i32, i32) {
    %c0_i32 = arith.constant 0 : i32
    %c0_i32_0 = arith.constant 0 : i32
    return %c0_i32, %arg1 : i32, i32
  }
  func.func @transform_3(%arg0: i32, %arg1: i32) -> (i32, i32) {
    %c0_i32 = arith.constant 0 : i32
    return %arg0, %arg1 : i32, i32
  }
}

module attributes {stable_mosaic.version = 11 : i64} {
  func.func @_mm_single_k_kernel(%arg0: i32, %arg1: i32, %arg2: memref<32x128xbf16, #tpu.memory_space<vmem>>, %arg3: memref<128x128xbf16, #tpu.memory_space<vmem>>, %arg4: memref<1x128xf32, #tpu.memory_space<vmem>>, %arg5: memref<32x128xbf16, #tpu.memory_space<vmem>>, %arg6: memref<32x128xbf16, #tpu.memory_space<vmem>>) attributes {dimension_semantics = [#tpu.dimension_semantics<parallel>, #tpu.dimension_semantics<parallel>], iteration_bounds = array<i64: 1, 1>, scalar_prefetch = 0 : i64, scratch_operands = 0 : i64, tpu.core_type = #tpu.core_type<tc>, window_params = [{transform_indices = @transform_0, window_bounds = array<i64: 32, 128>}, {transform_indices = @transform_1, window_bounds = array<i64: 128, 128>}, {transform_indices = @transform_2, window_bounds = array<i64: 1, 128>}, {transform_indices = @transform_3, window_bounds = array<i64: 32, 128>}, {transform_indices = @transform_4, window_bounds = array<i64: 32, 128>}]} {
    %c0 = arith.constant 0 : index
    %c0_0 = arith.constant 0 : index
    %0 = vector.load %arg2[%c0, %c0_0] : memref<32x128xbf16, #tpu.memory_space<vmem>>, vector<32x128xbf16>
    %c0_1 = arith.constant 0 : index
    %c0_2 = arith.constant 0 : index
    %1 = vector.load %arg3[%c0_1, %c0_2] : memref<128x128xbf16, #tpu.memory_space<vmem>>, vector<128x128xbf16>
    %cst = arith.constant dense<0.000000e+00> : vector<32x128xf32>
    %2 = tpu.matmul %0, %1, %cst {dimension_numbers = #tpu.dot_dimension_numbers<[1], [0], [0], [1], [0, 0, 1, 1], [], []>} : vector<32x128xbf16>, vector<128x128xbf16>, vector<32x128xf32> -> vector<32x128xf32>
    %c0_3 = arith.constant 0 : index
    %c0_4 = arith.constant 0 : index
    %3 = vector.load %arg4[%c0_3, %c0_4] : memref<1x128xf32, #tpu.memory_space<vmem>>, vector<1x128xf32>
    %4 = vector.broadcast %3 : vector<1x128xf32> to vector<32x128xf32>
    %5 = arith.addf %2, %4 : vector<32x128xf32>
    %c0_5 = arith.constant 0 : index
    %c0_6 = arith.constant 0 : index
    %6 = vector.load %arg5[%c0_5, %c0_6] : memref<32x128xbf16, #tpu.memory_space<vmem>>, vector<32x128xbf16>
    %7 = arith.extf %6 : vector<32x128xbf16> to vector<32x128xf32>
    %8 = arith.addf %5, %7 : vector<32x128xf32>
    %cst_7 = arith.constant 0.000000e+00 : f32
    %9 = vector.broadcast %cst_7 : f32 to vector<32x128xf32>
    %10 = arith.maximumf %8, %9 : vector<32x128xf32>
    %11 = arith.truncf %10 : vector<32x128xf32> to vector<32x128xbf16>
    %c0_8 = arith.constant 0 : index
    %c0_9 = arith.constant 0 : index
    %12 = vector.load %arg6[%c0_8, %c0_9] : memref<32x128xbf16, #tpu.memory_space<vmem>>, vector<32x128xbf16>
    tpu.vector_store %arg6[%c0_8, %c0_9], %11 {strides = array<i32>} : memref<32x128xbf16, #tpu.memory_space<vmem>>, vector<32x128xbf16>,
    return
  }
  func.func @transform_0(%arg0: i32, %arg1: i32) -> (i32, i32) {
    %c0_i32 = arith.constant 0 : i32
    %c0_i32_0 = arith.constant 0 : i32
    return %arg0, %c0_i32 : i32, i32
  }
  func.func @transform_1(%arg0: i32, %arg1: i32) -> (i32, i32) {
    %c0_i32 = arith.constant 0 : i32
    %c0_i32_0 = arith.constant 0 : i32
    return %c0_i32, %arg1 : i32, i32
  }
  func.func @transform_2(%arg0: i32, %arg1: i32) -> (i32, i32) {
    %c0_i32 = arith.constant 0 : i32
    %c0_i32_0 = arith.constant 0 : i32
    return %c0_i32, %arg1 : i32, i32
  }
  func.func @transform_3(%arg0: i32, %arg1: i32) -> (i32, i32) {
    %c0_i32 = arith.constant 0 : i32
    return %arg0, %arg1 : i32, i32
  }
  func.func @transform_4(%arg0: i32, %arg1: i32) -> (i32, i32) {
    %c0_i32 = arith.constant 0 : i32
    return %arg0, %arg1 : i32, i32
  }
}

module attributes {stable_mosaic.version = 11 : i64} {
  func.func @_mm_single_k_kernel(%arg0: i32, %arg1: i32, %arg2: memref<16x256xbf16, #tpu.memory_space<vmem>>, %arg3: memref<256x128xbf16, #tpu.memory_space<vmem>>, %arg4: memref<1x128xf32, #tpu.memory_space<vmem>>, %arg5: memref<16x128xbf16, #tpu.memory_space<vmem>>) attributes {dimension_semantics = [#tpu.dimension_semantics<parallel>, #tpu.dimension_semantics<parallel>], iteration_bounds = array<i64: 1, 1>, scalar_prefetch = 0 : i64, scratch_operands = 0 : i64, tpu.core_type = #tpu.core_type<tc>, window_params = [{transform_indices = @transform_0, window_bounds = array<i64: 16, 256>}, {transform_indices = @transform_1, window_bounds = array<i64: 256, 128>}, {transform_indices = @transform_2, window_bounds = array<i64: 1, 128>}, {transform_indices = @transform_3, window_bounds = array<i64: 16, 128>}]} {
    %c0 = arith.constant 0 : index
    %c0_0 = arith.constant 0 : index
    %0 = vector.load %arg2[%c0, %c0_0] : memref<16x256xbf16, #tpu.memory_space<vmem>>, vector<16x256xbf16>
    %c0_1 = arith.constant 0 : index
    %c0_2 = arith.constant 0 : index
    %1 = vector.load %arg3[%c0_1, %c0_2] : memref<256x128xbf16, #tpu.memory_space<vmem>>, vector<256x128xbf16>
    %cst = arith.constant dense<0.000000e+00> : vector<16x128xf32>
    %2 = tpu.matmul %0, %1, %cst {dimension_numbers = #tpu.dot_dimension_numbers<[1], [0], [0], [1], [0, 0, 1, 1], [], []>} : vector<16x256xbf16>, vector<256x128xbf16>, vector<16x128xf32> -> vector<16x128xf32>
    %c0_3 = arith.constant 0 : index
    %c0_4 = arith.constant 0 : index
    %3 = vector.load %arg4[%c0_3, %c0_4] : memref<1x128xf32, #tpu.memory_space<vmem>>, vector<1x128xf32>
    %4 = vector.broadcast %3 : vector<1x128xf32> to vector<16x128xf32>
    %5 = arith.addf %2, %4 : vector<16x128xf32>
    %cst_5 = arith.constant 0.000000e+00 : f32
    %6 = vector.broadcast %cst_5 : f32 to vector<16x128xf32>
    %7 = arith.maximumf %5, %6 : vector<16x128xf32>
    %8 = arith.truncf %7 : vector<16x128xf32> to vector<16x128xbf16>
    %c0_6 = arith.constant 0 : index
    %c0_7 = arith.constant 0 : index
    %9 = vector.load %arg5[%c0_6, %c0_7] : memref<16x128xbf16, #tpu.memory_space<vmem>>, vector<16x128xbf16>
    tpu.vector_store %arg5[%c0_6, %c0_7], %8 {strides = array<i32>} : memref<16x128xbf16, #tpu.memory_space<vmem>>, vector<16x128xbf16>,
    return
  }
  func.func @transform_0(%arg0: i32, %arg1: i32) -> (i32, i32) {
    %c0_i32 = arith.constant 0 : i32
    %c0_i32_0 = arith.constant 0 : i32
    return %arg0, %c0_i32 : i32, i32
  }
  func.func @transform_1(%arg0: i32, %arg1: i32) -> (i32, i32) {
    %c0_i32 = arith.constant 0 : i32
    %c0_i32_0 = arith.constant 0 : i32
    return %c0_i32, %arg1 : i32, i32
  }
  func.func @transform_2(%arg0: i32, %arg1: i32) -> (i32, i32) {
    %c0_i32 = arith.constant 0 : i32
    %c0_i32_0 = arith.constant 0 : i32
    return %c0_i32, %arg1 : i32, i32
  }
  func.func @transform_3(%arg0: i32, %arg1: i32) -> (i32, i32) {
    %c0_i32 = arith.constant 0 : i32
    return %arg0, %arg1 : i32, i32
  }
}

module attributes {stable_mosaic.version = 11 : i64} {
  func.func @_mm_single_k_kernel(%arg0: i32, %arg1: i32, %arg2: memref<16x128xbf16, #tpu.memory_space<vmem>>, %arg3: memref<128x128xbf16, #tpu.memory_space<vmem>>, %arg4: memref<1x128xf32, #tpu.memory_space<vmem>>, %arg5: memref<16x128xbf16, #tpu.memory_space<vmem>>) attributes {dimension_semantics = [#tpu.dimension_semantics<parallel>, #tpu.dimension_semantics<parallel>], iteration_bounds = array<i64: 1, 1>, scalar_prefetch = 0 : i64, scratch_operands = 0 : i64, tpu.core_type = #tpu.core_type<tc>, window_params = [{transform_indices = @transform_0, window_bounds = array<i64: 16, 128>}, {transform_indices = @transform_1, window_bounds = array<i64: 128, 128>}, {transform_indices = @transform_2, window_bounds = array<i64: 1, 128>}, {transform_indices = @transform_3, window_bounds = array<i64: 16, 128>}]} {
    %c0 = arith.constant 0 : index
    %c0_0 = arith.constant 0 : index
    %0 = vector.load %arg2[%c0, %c0_0] : memref<16x128xbf16, #tpu.memory_space<vmem>>, vector<16x128xbf16>
    %c0_1 = arith.constant 0 : index
    %c0_2 = arith.constant 0 : index
    %1 = vector.load %arg3[%c0_1, %c0_2] : memref<128x128xbf16, #tpu.memory_space<vmem>>, vector<128x128xbf16>
    %cst = arith.constant dense<0.000000e+00> : vector<16x128xf32>
    %2 = tpu.matmul %0, %1, %cst {dimension_numbers = #tpu.dot_dimension_numbers<[1], [0], [0], [1], [0, 0, 1, 1], [], []>} : vector<16x128xbf16>, vector<128x128xbf16>, vector<16x128xf32> -> vector<16x128xf32>
    %c0_3 = arith.constant 0 : index
    %c0_4 = arith.constant 0 : index
    %3 = vector.load %arg4[%c0_3, %c0_4] : memref<1x128xf32, #tpu.memory_space<vmem>>, vector<1x128xf32>
    %4 = vector.broadcast %3 : vector<1x128xf32> to vector<16x128xf32>
    %5 = arith.addf %2, %4 : vector<16x128xf32>
    %6 = arith.truncf %5 : vector<16x128xf32> to vector<16x128xbf16>
    %c0_5 = arith.constant 0 : index
    %c0_6 = arith.constant 0 : index
    %7 = vector.load %arg5[%c0_5, %c0_6] : memref<16x128xbf16, #tpu.memory_space<vmem>>, vector<16x128xbf16>
    tpu.vector_store %arg5[%c0_5, %c0_6], %6 {strides = array<i32>} : memref<16x128xbf16, #tpu.memory_space<vmem>>, vector<16x128xbf16>,
    return
  }
  func.func @transform_0(%arg0: i32, %arg1: i32) -> (i32, i32) {
    %c0_i32 = arith.constant 0 : i32
    %c0_i32_0 = arith.constant 0 : i32
    return %arg0, %c0_i32 : i32, i32
  }
  func.func @transform_1(%arg0: i32, %arg1: i32) -> (i32, i32) {
    %c0_i32 = arith.constant 0 : i32
    %c0_i32_0 = arith.constant 0 : i32
    return %c0_i32, %arg1 : i32, i32
  }
  func.func @transform_2(%arg0: i32, %arg1: i32) -> (i32, i32) {
    %c0_i32 = arith.constant 0 : i32
    %c0_i32_0 = arith.constant 0 : i32
    return %c0_i32, %arg1 : i32, i32
  }
  func.func @transform_3(%arg0: i32, %arg1: i32) -> (i32, i32) {
    %c0_i32 = arith.constant 0 : i32
    return %arg0, %arg1 : i32, i32
  }
}

module attributes {stable_mosaic.version = 11 : i64} {
  func.func @_mm_single_k_kernel(%arg0: i32, %arg1: i32, %arg2: memref<16x128xbf16, #tpu.memory_space<vmem>>, %arg3: memref<128x128xbf16, #tpu.memory_space<vmem>>, %arg4: memref<1x128xf32, #tpu.memory_space<vmem>>, %arg5: memref<16x128xbf16, #tpu.memory_space<vmem>>, %arg6: memref<16x128xbf16, #tpu.memory_space<vmem>>) attributes {dimension_semantics = [#tpu.dimension_semantics<parallel>, #tpu.dimension_semantics<parallel>], iteration_bounds = array<i64: 1, 1>, scalar_prefetch = 0 : i64, scratch_operands = 0 : i64, tpu.core_type = #tpu.core_type<tc>, window_params = [{transform_indices = @transform_0, window_bounds = array<i64: 16, 128>}, {transform_indices = @transform_1, window_bounds = array<i64: 128, 128>}, {transform_indices = @transform_2, window_bounds = array<i64: 1, 128>}, {transform_indices = @transform_3, window_bounds = array<i64: 16, 128>}, {transform_indices = @transform_4, window_bounds = array<i64: 16, 128>}]} {
    %c0 = arith.constant 0 : index
    %c0_0 = arith.constant 0 : index
    %0 = vector.load %arg2[%c0, %c0_0] : memref<16x128xbf16, #tpu.memory_space<vmem>>, vector<16x128xbf16>
    %c0_1 = arith.constant 0 : index
    %c0_2 = arith.constant 0 : index
    %1 = vector.load %arg3[%c0_1, %c0_2] : memref<128x128xbf16, #tpu.memory_space<vmem>>, vector<128x128xbf16>
    %cst = arith.constant dense<0.000000e+00> : vector<16x128xf32>
    %2 = tpu.matmul %0, %1, %cst {dimension_numbers = #tpu.dot_dimension_numbers<[1], [0], [0], [1], [0, 0, 1, 1], [], []>} : vector<16x128xbf16>, vector<128x128xbf16>, vector<16x128xf32> -> vector<16x128xf32>
    %c0_3 = arith.constant 0 : index
    %c0_4 = arith.constant 0 : index
    %3 = vector.load %arg4[%c0_3, %c0_4] : memref<1x128xf32, #tpu.memory_space<vmem>>, vector<1x128xf32>
    %4 = vector.broadcast %3 : vector<1x128xf32> to vector<16x128xf32>
    %5 = arith.addf %2, %4 : vector<16x128xf32>
    %c0_5 = arith.constant 0 : index
    %c0_6 = arith.constant 0 : index
    %6 = vector.load %arg5[%c0_5, %c0_6] : memref<16x128xbf16, #tpu.memory_space<vmem>>, vector<16x128xbf16>
    %7 = arith.extf %6 : vector<16x128xbf16> to vector<16x128xf32>
    %8 = arith.addf %5, %7 : vector<16x128xf32>
    %cst_7 = arith.constant 0.000000e+00 : f32
    %9 = vector.broadcast %cst_7 : f32 to vector<16x128xf32>
    %10 = arith.maximumf %8, %9 : vector<16x128xf32>
    %11 = arith.truncf %10 : vector<16x128xf32> to vector<16x128xbf16>
    %c0_8 = arith.constant 0 : index
    %c0_9 = arith.constant 0 : index
    %12 = vector.load %arg6[%c0_8, %c0_9] : memref<16x128xbf16, #tpu.memory_space<vmem>>, vector<16x128xbf16>
    tpu.vector_store %arg6[%c0_8, %c0_9], %11 {strides = array<i32>} : memref<16x128xbf16, #tpu.memory_space<vmem>>, vector<16x128xbf16>,
    return
  }
  func.func @transform_0(%arg0: i32, %arg1: i32) -> (i32, i32) {
    %c0_i32 = arith.constant 0 : i32
    %c0_i32_0 = arith.constant 0 : i32
    return %arg0, %c0_i32 : i32, i32
  }
  func.func @transform_1(%arg0: i32, %arg1: i32) -> (i32, i32) {
    %c0_i32 = arith.constant 0 : i32
    %c0_i32_0 = arith.constant 0 : i32
    return %c0_i32, %arg1 : i32, i32
  }
  func.func @transform_2(%arg0: i32, %arg1: i32) -> (i32, i32) {
    %c0_i32 = arith.constant 0 : i32
    %c0_i32_0 = arith.constant 0 : i32
    return %c0_i32, %arg1 : i32, i32
  }
  func.func @transform_3(%arg0: i32, %arg1: i32) -> (i32, i32) {
    %c0_i32 = arith.constant 0 : i32
    return %arg0, %arg1 : i32, i32
  }
  func.func @transform_4(%arg0: i32, %arg1: i32) -> (i32, i32) {
    %c0_i32 = arith.constant 0 : i32
    return %arg0, %arg1 : i32, i32
  }
}

module attributes {stable_mosaic.version = 11 : i64} {
  func.func @_mm_single_k_kernel(%arg0: i32, %arg1: i32, %arg2: memref<16x128xbf16, #tpu.memory_space<vmem>>, %arg3: memref<128x128xbf16, #tpu.memory_space<vmem>>, %arg4: memref<1x128xf32, #tpu.memory_space<vmem>>, %arg5: memref<16x128xbf16, #tpu.memory_space<vmem>>) attributes {dimension_semantics = [#tpu.dimension_semantics<parallel>, #tpu.dimension_semantics<parallel>], iteration_bounds = array<i64: 1, 1>, scalar_prefetch = 0 : i64, scratch_operands = 0 : i64, tpu.core_type = #tpu.core_type<tc>, window_params = [{transform_indices = @transform_0, window_bounds = array<i64: 16, 128>}, {transform_indices = @transform_1, window_bounds = array<i64: 128, 128>}, {transform_indices = @transform_2, window_bounds = array<i64: 1, 128>}, {transform_indices = @transform_3, window_bounds = array<i64: 16, 128>}]} {
    %c0 = arith.constant 0 : index
    %c0_0 = arith.constant 0 : index
    %0 = vector.load %arg2[%c0, %c0_0] : memref<16x128xbf16, #tpu.memory_space<vmem>>, vector<16x128xbf16>
    %c0_1 = arith.constant 0 : index
    %c0_2 = arith.constant 0 : index
    %1 = vector.load %arg3[%c0_1, %c0_2] : memref<128x128xbf16, #tpu.memory_space<vmem>>, vector<128x128xbf16>
    %cst = arith.constant dense<0.000000e+00> : vector<16x128xf32>
    %2 = tpu.matmul %0, %1, %cst {dimension_numbers = #tpu.dot_dimension_numbers<[1], [0], [0], [1], [0, 0, 1, 1], [], []>} : vector<16x128xbf16>, vector<128x128xbf16>, vector<16x128xf32> -> vector<16x128xf32>
    %c0_3 = arith.constant 0 : index
    %c0_4 = arith.constant 0 : index
    %3 = vector.load %arg4[%c0_3, %c0_4] : memref<1x128xf32, #tpu.memory_space<vmem>>, vector<1x128xf32>
    %4 = vector.broadcast %3 : vector<1x128xf32> to vector<16x128xf32>
    %5 = arith.addf %2, %4 : vector<16x128xf32>
    %cst_5 = arith.constant 0.000000e+00 : f32
    %6 = vector.broadcast %cst_5 : f32 to vector<16x128xf32>
    %7 = arith.maximumf %5, %6 : vector<16x128xf32>
    %8 = arith.truncf %7 : vector<16x128xf32> to vector<16x128xbf16>
    %c0_6 = arith.constant 0 : index
    %c0_7 = arith.constant 0 : index
    %9 = vector.load %arg5[%c0_6, %c0_7] : memref<16x128xbf16, #tpu.memory_space<vmem>>, vector<16x128xbf16>
    tpu.vector_store %arg5[%c0_6, %c0_7], %8 {strides = array<i32>} : memref<16x128xbf16, #tpu.memory_space<vmem>>, vector<16x128xbf16>,
    return
  }
  func.func @transform_0(%arg0: i32, %arg1: i32) -> (i32, i32) {
    %c0_i32 = arith.constant 0 : i32
    %c0_i32_0 = arith.constant 0 : i32
    return %arg0, %c0_i32 : i32, i32
  }
  func.func @transform_1(%arg0: i32, %arg1: i32) -> (i32, i32) {
    %c0_i32 = arith.constant 0 : i32
    %c0_i32_0 = arith.constant 0 : i32
    return %c0_i32, %arg1 : i32, i32
  }
  func.func @transform_2(%arg0: i32, %arg1: i32) -> (i32, i32) {
    %c0_i32 = arith.constant 0 : i32
    %c0_i32_0 = arith.constant 0 : i32
    return %c0_i32, %arg1 : i32, i32
  }
  func.func @transform_3(%arg0: i32, %arg1: i32) -> (i32, i32) {
    %c0_i32 = arith.constant 0 : i32
    return %arg0, %arg1 : i32, i32
  }
}

module attributes {stable_mosaic.version = 11 : i64} {
  func.func @_mm_single_k_kernel(%arg0: i32, %arg1: i32, %arg2: memref<16x384xbf16, #tpu.memory_space<vmem>>, %arg3: memref<384x128xbf16, #tpu.memory_space<vmem>>, %arg4: memref<1x128xf32, #tpu.memory_space<vmem>>, %arg5: memref<16x128xbf16, #tpu.memory_space<vmem>>) attributes {dimension_semantics = [#tpu.dimension_semantics<parallel>, #tpu.dimension_semantics<parallel>], iteration_bounds = array<i64: 1, 1>, scalar_prefetch = 0 : i64, scratch_operands = 0 : i64, tpu.core_type = #tpu.core_type<tc>, window_params = [{transform_indices = @transform_0, window_bounds = array<i64: 16, 384>}, {transform_indices = @transform_1, window_bounds = array<i64: 384, 128>}, {transform_indices = @transform_2, window_bounds = array<i64: 1, 128>}, {transform_indices = @transform_3, window_bounds = array<i64: 16, 128>}]} {
    %c0 = arith.constant 0 : index
    %c0_0 = arith.constant 0 : index
    %0 = vector.load %arg2[%c0, %c0_0] : memref<16x384xbf16, #tpu.memory_space<vmem>>, vector<16x384xbf16>
    %c0_1 = arith.constant 0 : index
    %c0_2 = arith.constant 0 : index
    %1 = vector.load %arg3[%c0_1, %c0_2] : memref<384x128xbf16, #tpu.memory_space<vmem>>, vector<384x128xbf16>
    %cst = arith.constant dense<0.000000e+00> : vector<16x128xf32>
    %2 = tpu.matmul %0, %1, %cst {dimension_numbers = #tpu.dot_dimension_numbers<[1], [0], [0], [1], [0, 0, 1, 1], [], []>} : vector<16x384xbf16>, vector<384x128xbf16>, vector<16x128xf32> -> vector<16x128xf32>
    %c0_3 = arith.constant 0 : index
    %c0_4 = arith.constant 0 : index
    %3 = vector.load %arg4[%c0_3, %c0_4] : memref<1x128xf32, #tpu.memory_space<vmem>>, vector<1x128xf32>
    %4 = vector.broadcast %3 : vector<1x128xf32> to vector<16x128xf32>
    %5 = arith.addf %2, %4 : vector<16x128xf32>
    %cst_5 = arith.constant 0.000000e+00 : f32
    %6 = vector.broadcast %cst_5 : f32 to vector<16x128xf32>
    %7 = arith.maximumf %5, %6 : vector<16x128xf32>
    %8 = arith.truncf %7 : vector<16x128xf32> to vector<16x128xbf16>
    %c0_6 = arith.constant 0 : index
    %c0_7 = arith.constant 0 : index
    %9 = vector.load %arg5[%c0_6, %c0_7] : memref<16x128xbf16, #tpu.memory_space<vmem>>, vector<16x128xbf16>
    tpu.vector_store %arg5[%c0_6, %c0_7], %8 {strides = array<i32>} : memref<16x128xbf16, #tpu.memory_space<vmem>>, vector<16x128xbf16>,
    return
  }
  func.func @transform_0(%arg0: i32, %arg1: i32) -> (i32, i32) {
    %c0_i32 = arith.constant 0 : i32
    %c0_i32_0 = arith.constant 0 : i32
    return %arg0, %c0_i32 : i32, i32
  }
  func.func @transform_1(%arg0: i32, %arg1: i32) -> (i32, i32) {
    %c0_i32 = arith.constant 0 : i32
    %c0_i32_0 = arith.constant 0 : i32
    return %c0_i32, %arg1 : i32, i32
  }
  func.func @transform_2(%arg0: i32, %arg1: i32) -> (i32, i32) {
    %c0_i32 = arith.constant 0 : i32
    %c0_i32_0 = arith.constant 0 : i32
    return %c0_i32, %arg1 : i32, i32
  }
  func.func @transform_3(%arg0: i32, %arg1: i32) -> (i32, i32) {
    %c0_i32 = arith.constant 0 : i32
    return %arg0, %arg1 : i32, i32
  }
}

module attributes {stable_mosaic.version = 11 : i64} {
  func.func @_mm_multi_k_kernel(%arg0: i32, %arg1: i32, %arg2: i32, %arg3: memref<16x512xbf16, #tpu.memory_space<vmem>>, %arg4: memref<512x128xbf16, #tpu.memory_space<vmem>>, %arg5: memref<1x128xf32, #tpu.memory_space<vmem>>, %arg6: memref<16x128xbf16, #tpu.memory_space<vmem>>, %arg7: memref<16x128xf32, #tpu.memory_space<vmem>>) attributes {dimension_semantics = [#tpu.dimension_semantics<parallel>, #tpu.dimension_semantics<parallel>, #tpu.dimension_semantics<arbitrary>], iteration_bounds = array<i64: 1, 1, 2>, scalar_prefetch = 0 : i64, scratch_operands = 1 : i64, tpu.core_type = #tpu.core_type<tc>, window_params = [{transform_indices = @transform_0, window_bounds = array<i64: 16, 512>}, {transform_indices = @transform_1, window_bounds = array<i64: 512, 128>}, {transform_indices = @transform_2, window_bounds = array<i64: 1, 128>}, {transform_indices = @transform_3, window_bounds = array<i64: 16, 128>}]} {
    %c0 = arith.constant 0 : index
    %c0_0 = arith.constant 0 : index
    %0 = vector.load %arg3[%c0, %c0_0] : memref<16x512xbf16, #tpu.memory_space<vmem>>, vector<16x512xbf16>
    %c0_1 = arith.constant 0 : index
    %c0_2 = arith.constant 0 : index
    %1 = vector.load %arg4[%c0_1, %c0_2] : memref<512x128xbf16, #tpu.memory_space<vmem>>, vector<512x128xbf16>
    %cst = arith.constant dense<0.000000e+00> : vector<16x128xf32>
    %2 = tpu.matmul %0, %1, %cst {dimension_numbers = #tpu.dot_dimension_numbers<[1], [0], [0], [1], [0, 0, 1, 1], [], []>} : vector<16x512xbf16>, vector<512x128xbf16>, vector<16x128xf32> -> vector<16x128xf32>
    %c0_i32 = arith.constant 0 : i32
    %3 = arith.cmpi eq, %arg2, %c0_i32 : i32
    %4 = arith.extui %3 : i1 to i32
    %c0_i32_3 = arith.constant 0 : i32
    %5 = arith.cmpi ne, %4, %c0_i32_3 : i32
    scf.if %5 {
      %c0_7 = arith.constant 0 : index
      %c0_8 = arith.constant 0 : index
      %12 = vector.load %arg7[%c0_7, %c0_8] : memref<16x128xf32, #tpu.memory_space<vmem>>, vector<16x128xf32>
      tpu.vector_store %arg7[%c0_7, %c0_8], %2 {strides = array<i32>} : memref<16x128xf32, #tpu.memory_space<vmem>>, vector<16x128xf32>,
    } else {
    }
    %c0_i32_4 = arith.constant 0 : i32
    %6 = arith.cmpi sgt, %arg2, %c0_i32_4 : i32
    %7 = arith.extui %6 : i1 to i32
    %c0_i32_5 = arith.constant 0 : i32
    %8 = arith.cmpi ne, %7, %c0_i32_5 : i32
    scf.if %8 {
      %c0_7 = arith.constant 0 : index
      %c0_8 = arith.constant 0 : index
      %12 = vector.load %arg7[%c0_7, %c0_8] : memref<16x128xf32, #tpu.memory_space<vmem>>, vector<16x128xf32>
      %13 = arith.addf %12, %2 : vector<16x128xf32>
      %c0_9 = arith.constant 0 : index
      %c0_10 = arith.constant 0 : index
      %14 = vector.load %arg7[%c0_9, %c0_10] : memref<16x128xf32, #tpu.memory_space<vmem>>, vector<16x128xf32>
      tpu.vector_store %arg7[%c0_9, %c0_10], %13 {strides = array<i32>} : memref<16x128xf32, #tpu.memory_space<vmem>>, vector<16x128xf32>,
    } else {
    }
    %c1_i32 = arith.constant 1 : i32
    %9 = arith.cmpi eq, %arg2, %c1_i32 : i32
    %10 = arith.extui %9 : i1 to i32
    %c0_i32_6 = arith.constant 0 : i32
    %11 = arith.cmpi ne, %10, %c0_i32_6 : i32
    scf.if %11 {
      %c0_7 = arith.constant 0 : index
      %c0_8 = arith.constant 0 : index
      %12 = vector.load %arg7[%c0_7, %c0_8] : memref<16x128xf32, #tpu.memory_space<vmem>>, vector<16x128xf32>
      %c0_9 = arith.constant 0 : index
      %c0_10 = arith.constant 0 : index
      %13 = vector.load %arg5[%c0_9, %c0_10] : memref<1x128xf32, #tpu.memory_space<vmem>>, vector<1x128xf32>
      %14 = vector.broadcast %13 : vector<1x128xf32> to vector<16x128xf32>
      %15 = arith.addf %12, %14 : vector<16x128xf32>
      %cst_11 = arith.constant 0.000000e+00 : f32
      %16 = vector.broadcast %cst_11 : f32 to vector<16x128xf32>
      %17 = arith.maximumf %15, %16 : vector<16x128xf32>
      %18 = arith.truncf %17 : vector<16x128xf32> to vector<16x128xbf16>
      %c0_12 = arith.constant 0 : index
      %c0_13 = arith.constant 0 : index
      %19 = vector.load %arg6[%c0_12, %c0_13] : memref<16x128xbf16, #tpu.memory_space<vmem>>, vector<16x128xbf16>
      tpu.vector_store %arg6[%c0_12, %c0_13], %18 {strides = array<i32>} : memref<16x128xbf16, #tpu.memory_space<vmem>>, vector<16x128xbf16>,
    } else {
    }
    return
  }
  func.func @transform_0(%arg0: i32, %arg1: i32, %arg2: i32) -> (i32, i32) {
    %c0_i32 = arith.constant 0 : i32
    return %arg0, %arg2 : i32, i32
  }
  func.func @transform_1(%arg0: i32, %arg1: i32, %arg2: i32) -> (i32, i32) {
    %c0_i32 = arith.constant 0 : i32
    return %arg2, %arg1 : i32, i32
  }
  func.func @transform_2(%arg0: i32, %arg1: i32, %arg2: i32) -> (i32, i32) {
    %c0_i32 = arith.constant 0 : i32
    %c0_i32_0 = arith.constant 0 : i32
    return %c0_i32, %arg1 : i32, i32
  }
  func.func @transform_3(%arg0: i32, %arg1: i32, %arg2: i32) -> (i32, i32) {
    %c0_i32 = arith.constant 0 : i32
    return %arg0, %arg1 : i32, i32
  }
}

module attributes {stable_mosaic.version = 11 : i64} {
  func.func @_mm_single_k_kernel(%arg0: i32, %arg1: i32, %arg2: memref<16x128xbf16, #tpu.memory_space<vmem>>, %arg3: memref<128x256xbf16, #tpu.memory_space<vmem>>, %arg4: memref<1x256xf32, #tpu.memory_space<vmem>>, %arg5: memref<16x256xbf16, #tpu.memory_space<vmem>>) attributes {dimension_semantics = [#tpu.dimension_semantics<parallel>, #tpu.dimension_semantics<parallel>], iteration_bounds = array<i64: 1, 1>, scalar_prefetch = 0 : i64, scratch_operands = 0 : i64, tpu.core_type = #tpu.core_type<tc>, window_params = [{transform_indices = @transform_0, window_bounds = array<i64: 16, 128>}, {transform_indices = @transform_1, window_bounds = array<i64: 128, 256>}, {transform_indices = @transform_2, window_bounds = array<i64: 1, 256>}, {transform_indices = @transform_3, window_bounds = array<i64: 16, 256>}]} {
    %c0 = arith.constant 0 : index
    %c0_0 = arith.constant 0 : index
    %0 = vector.load %arg2[%c0, %c0_0] : memref<16x128xbf16, #tpu.memory_space<vmem>>, vector<16x128xbf16>
    %c0_1 = arith.constant 0 : index
    %c0_2 = arith.constant 0 : index
    %1 = vector.load %arg3[%c0_1, %c0_2] : memref<128x256xbf16, #tpu.memory_space<vmem>>, vector<128x256xbf16>
    %cst = arith.constant dense<0.000000e+00> : vector<16x256xf32>
    %2 = tpu.matmul %0, %1, %cst {dimension_numbers = #tpu.dot_dimension_numbers<[1], [0], [0], [1], [0, 0, 1, 1], [], []>} : vector<16x128xbf16>, vector<128x256xbf16>, vector<16x256xf32> -> vector<16x256xf32>
    %c0_3 = arith.constant 0 : index
    %c0_4 = arith.constant 0 : index
    %3 = vector.load %arg4[%c0_3, %c0_4] : memref<1x256xf32, #tpu.memory_space<vmem>>, vector<1x256xf32>
    %4 = vector.broadcast %3 : vector<1x256xf32> to vector<16x256xf32>
    %5 = arith.addf %2, %4 : vector<16x256xf32>
    %6 = arith.truncf %5 : vector<16x256xf32> to vector<16x256xbf16>
    %c0_5 = arith.constant 0 : index
    %c0_6 = arith.constant 0 : index
    %7 = vector.load %arg5[%c0_5, %c0_6] : memref<16x256xbf16, #tpu.memory_space<vmem>>, vector<16x256xbf16>
    tpu.vector_store %arg5[%c0_5, %c0_6], %6 {strides = array<i32>} : memref<16x256xbf16, #tpu.memory_space<vmem>>, vector<16x256xbf16>,
    return
  }
  func.func @transform_0(%arg0: i32, %arg1: i32) -> (i32, i32) {
    %c0_i32 = arith.constant 0 : i32
    %c0_i32_0 = arith.constant 0 : i32
    return %arg0, %c0_i32 : i32, i32
  }
  func.func @transform_1(%arg0: i32, %arg1: i32) -> (i32, i32) {
    %c0_i32 = arith.constant 0 : i32
    %c0_i32_0 = arith.constant 0 : i32
    return %c0_i32, %arg1 : i32, i32
  }
  func.func @transform_2(%arg0: i32, %arg1: i32) -> (i32, i32) {
    %c0_i32 = arith.constant 0 : i32
    %c0_i32_0 = arith.constant 0 : i32
    return %c0_i32, %arg1 : i32, i32
  }
  func.func @transform_3(%arg0: i32, %arg1: i32) -> (i32, i32) {
    %c0_i32 = arith.constant 0 : i32
    return %arg0, %arg1 : i32, i32
  }
}

module attributes {stable_mosaic.version = 11 : i64} {
  func.func @_mm_single_k_kernel(%arg0: i32, %arg1: i32, %arg2: memref<16x128xbf16, #tpu.memory_space<vmem>>, %arg3: memref<128x256xbf16, #tpu.memory_space<vmem>>, %arg4: memref<1x256xf32, #tpu.memory_space<vmem>>, %arg5: memref<16x256xbf16, #tpu.memory_space<vmem>>, %arg6: memref<16x256xbf16, #tpu.memory_space<vmem>>) attributes {dimension_semantics = [#tpu.dimension_semantics<parallel>, #tpu.dimension_semantics<parallel>], iteration_bounds = array<i64: 1, 1>, scalar_prefetch = 0 : i64, scratch_operands = 0 : i64, tpu.core_type = #tpu.core_type<tc>, window_params = [{transform_indices = @transform_0, window_bounds = array<i64: 16, 128>}, {transform_indices = @transform_1, window_bounds = array<i64: 128, 256>}, {transform_indices = @transform_2, window_bounds = array<i64: 1, 256>}, {transform_indices = @transform_3, window_bounds = array<i64: 16, 256>}, {transform_indices = @transform_4, window_bounds = array<i64: 16, 256>}]} {
    %c0 = arith.constant 0 : index
    %c0_0 = arith.constant 0 : index
    %0 = vector.load %arg2[%c0, %c0_0] : memref<16x128xbf16, #tpu.memory_space<vmem>>, vector<16x128xbf16>
    %c0_1 = arith.constant 0 : index
    %c0_2 = arith.constant 0 : index
    %1 = vector.load %arg3[%c0_1, %c0_2] : memref<128x256xbf16, #tpu.memory_space<vmem>>, vector<128x256xbf16>
    %cst = arith.constant dense<0.000000e+00> : vector<16x256xf32>
    %2 = tpu.matmul %0, %1, %cst {dimension_numbers = #tpu.dot_dimension_numbers<[1], [0], [0], [1], [0, 0, 1, 1], [], []>} : vector<16x128xbf16>, vector<128x256xbf16>, vector<16x256xf32> -> vector<16x256xf32>
    %c0_3 = arith.constant 0 : index
    %c0_4 = arith.constant 0 : index
    %3 = vector.load %arg4[%c0_3, %c0_4] : memref<1x256xf32, #tpu.memory_space<vmem>>, vector<1x256xf32>
    %4 = vector.broadcast %3 : vector<1x256xf32> to vector<16x256xf32>
    %5 = arith.addf %2, %4 : vector<16x256xf32>
    %c0_5 = arith.constant 0 : index
    %c0_6 = arith.constant 0 : index
    %6 = vector.load %arg5[%c0_5, %c0_6] : memref<16x256xbf16, #tpu.memory_space<vmem>>, vector<16x256xbf16>
    %7 = arith.extf %6 : vector<16x256xbf16> to vector<16x256xf32>
    %8 = arith.addf %5, %7 : vector<16x256xf32>
    %cst_7 = arith.constant 0.000000e+00 : f32
    %9 = vector.broadcast %cst_7 : f32 to vector<16x256xf32>
    %10 = arith.maximumf %8, %9 : vector<16x256xf32>
    %11 = arith.truncf %10 : vector<16x256xf32> to vector<16x256xbf16>
    %c0_8 = arith.constant 0 : index
    %c0_9 = arith.constant 0 : index
    %12 = vector.load %arg6[%c0_8, %c0_9] : memref<16x256xbf16, #tpu.memory_space<vmem>>, vector<16x256xbf16>
    tpu.vector_store %arg6[%c0_8, %c0_9], %11 {strides = array<i32>} : memref<16x256xbf16, #tpu.memory_space<vmem>>, vector<16x256xbf16>,
    return
  }
  func.func @transform_0(%arg0: i32, %arg1: i32) -> (i32, i32) {
    %c0_i32 = arith.constant 0 : i32
    %c0_i32_0 = arith.constant 0 : i32
    return %arg0, %c0_i32 : i32, i32
  }
  func.func @transform_1(%arg0: i32, %arg1: i32) -> (i32, i32) {
    %c0_i32 = arith.constant 0 : i32
    %c0_i32_0 = arith.constant 0 : i32
    return %c0_i32, %arg1 : i32, i32
  }
  func.func @transform_2(%arg0: i32, %arg1: i32) -> (i32, i32) {
    %c0_i32 = arith.constant 0 : i32
    %c0_i32_0 = arith.constant 0 : i32
    return %c0_i32, %arg1 : i32, i32
  }
  func.func @transform_3(%arg0: i32, %arg1: i32) -> (i32, i32) {
    %c0_i32 = arith.constant 0 : i32
    return %arg0, %arg1 : i32, i32
  }
  func.func @transform_4(%arg0: i32, %arg1: i32) -> (i32, i32) {
    %c0_i32 = arith.constant 0 : i32
    return %arg0, %arg1 : i32, i32
  }
}

module attributes {stable_mosaic.version = 11 : i64} {
  func.func @_gap_kernel(%arg0: i32, %arg1: memref<2x1x256xbf16, #tpu.memory_space<vmem>>, %arg2: memref<2x256xbf16, #tpu.memory_space<vmem>>) attributes {dimension_semantics = [#tpu.dimension_semantics<parallel>], iteration_bounds = array<i64: 1>, scalar_prefetch = 0 : i64, scratch_operands = 0 : i64, tpu.core_type = #tpu.core_type<tc>, window_params = [{transform_indices = @transform_0, window_bounds = array<i64: 2, 1, 256>}, {transform_indices = @transform_1, window_bounds = array<i64: 2, 256>}]} {
    %c0 = arith.constant 0 : index
    %c0_0 = arith.constant 0 : index
    %c0_1 = arith.constant 0 : index
    %0 = vector.load %arg1[%c0, %c0_0, %c0_1] : memref<2x1x256xbf16, #tpu.memory_space<vmem>>, vector<2x1x256xbf16>
    %1 = arith.extf %0 : vector<2x1x256xbf16> to vector<2x1x256xf32>
    %cst = arith.constant dense<0.000000e+00> : vector<2x256xf32>
    %2 = vector.multi_reduction <add>, %1, %cst [1] : vector<2x1x256xf32> to vector<2x256xf32>
    %cst_2 = arith.constant 1.000000e+00 : f32
    %3 = vector.broadcast %cst_2 : f32 to vector<2x256xf32>
    %4 = arith.divf %2, %3 : vector<2x256xf32>
    %5 = arith.truncf %4 : vector<2x256xf32> to vector<2x256xbf16>
    %c0_3 = arith.constant 0 : index
    %c0_4 = arith.constant 0 : index
    %6 = vector.load %arg2[%c0_3, %c0_4] : memref<2x256xbf16, #tpu.memory_space<vmem>>, vector<2x256xbf16>
    tpu.vector_store %arg2[%c0_3, %c0_4], %5 {strides = array<i32>} : memref<2x256xbf16, #tpu.memory_space<vmem>>, vector<2x256xbf16>,
    return
  }
  func.func @transform_0(%arg0: i32) -> (i32, i32, i32) {
    %c0_i32 = arith.constant 0 : i32
    %c0_i32_0 = arith.constant 0 : i32
    %c0_i32_1 = arith.constant 0 : i32
    return %c0_i32, %c0_i32_0, %arg0 : i32, i32, i32
  }
  func.func @transform_1(%arg0: i32) -> (i32, i32) {
    %c0_i32 = arith.constant 0 : i32
    %c0_i32_0 = arith.constant 0 : i32
    return %c0_i32, %arg0 : i32, i32
  }
}

module attributes {stable_mosaic.version = 11 : i64} {
  func.func @_mm_single_k_kernel(%arg0: i32, %arg1: i32, %arg2: memref<16x256xbf16, #tpu.memory_space<vmem>>, %arg3: memref<256x256xbf16, #tpu.memory_space<vmem>>, %arg4: memref<1x256xf32, #tpu.memory_space<vmem>>, %arg5: memref<16x256xf32, #tpu.memory_space<vmem>>) attributes {dimension_semantics = [#tpu.dimension_semantics<parallel>, #tpu.dimension_semantics<parallel>], iteration_bounds = array<i64: 1, 4>, scalar_prefetch = 0 : i64, scratch_operands = 0 : i64, tpu.core_type = #tpu.core_type<tc>, window_params = [{transform_indices = @transform_0, window_bounds = array<i64: 16, 256>}, {transform_indices = @transform_1, window_bounds = array<i64: 256, 256>}, {transform_indices = @transform_2, window_bounds = array<i64: 1, 256>}, {transform_indices = @transform_3, window_bounds = array<i64: 16, 256>}]} {
    %c0 = arith.constant 0 : index
    %c0_0 = arith.constant 0 : index
    %0 = vector.load %arg2[%c0, %c0_0] : memref<16x256xbf16, #tpu.memory_space<vmem>>, vector<16x256xbf16>
    %c0_1 = arith.constant 0 : index
    %c0_2 = arith.constant 0 : index
    %1 = vector.load %arg3[%c0_1, %c0_2] : memref<256x256xbf16, #tpu.memory_space<vmem>>, vector<256x256xbf16>
    %cst = arith.constant dense<0.000000e+00> : vector<16x256xf32>
    %2 = tpu.matmul %0, %1, %cst {dimension_numbers = #tpu.dot_dimension_numbers<[1], [0], [0], [1], [0, 0, 1, 1], [], []>} : vector<16x256xbf16>, vector<256x256xbf16>, vector<16x256xf32> -> vector<16x256xf32>
    %c0_3 = arith.constant 0 : index
    %c0_4 = arith.constant 0 : index
    %3 = vector.load %arg4[%c0_3, %c0_4] : memref<1x256xf32, #tpu.memory_space<vmem>>, vector<1x256xf32>
    %4 = vector.broadcast %3 : vector<1x256xf32> to vector<16x256xf32>
    %5 = arith.addf %2, %4 : vector<16x256xf32>
    %c0_5 = arith.constant 0 : index
    %c0_6 = arith.constant 0 : index
    %6 = vector.load %arg5[%c0_5, %c0_6] : memref<16x256xf32, #tpu.memory_space<vmem>>, vector<16x256xf32>
    tpu.vector_store %arg5[%c0_5, %c0_6], %5 {strides = array<i32>} : memref<16x256xf32, #tpu.memory_space<vmem>>, vector<16x256xf32>,
    return
  }
  func.func @transform_0(%arg0: i32, %arg1: i32) -> (i32, i32) {
    %c0_i32 = arith.constant 0 : i32
    %c0_i32_0 = arith.constant 0 : i32
    return %arg0, %c0_i32 : i32, i32
  }
  func.func @transform_1(%arg0: i32, %arg1: i32) -> (i32, i32) {
    %c0_i32 = arith.constant 0 : i32
    %c0_i32_0 = arith.constant 0 : i32
    return %c0_i32, %arg1 : i32, i32
  }
  func.func @transform_2(%arg0: i32, %arg1: i32) -> (i32, i32) {
    %c0_i32 = arith.constant 0 : i32
    %c0_i32_0 = arith.constant 0 : i32
    return %c0_i32, %arg1 : i32, i32
  }
  func.func @transform_3(%arg0: i32, %arg1: i32) -> (i32, i32) {
    %c0_i32 = arith.constant 0 : i32
    return %arg0, %arg1 : i32, i32
  }
}

</mosaic_0001>

<bundles_post_ra>
// kernel: _forward_impl.56
= control target key start
LH: loop header
LB: loop body
LE: loop exit
PB: predicated region body
PF: predicated region fallthrough
CT: control target
= control target key end

     0   :  { %s825_s1 = inlined_call_operand.vmem [shape: bf16[256,128], index: 1, kind: input, shape index: {}]   ;;  %s826_s2 = inlined_call_operand.vmem [shape: f32[1,128], index: 2, kind: input, shape index: {}]   ;;  %s827_s0 = inlined_call_operand.vmem [shape: bf16[128,256], index: 0, kind: input, shape index: {}]   ;;  %s828_s3 = inlined_call_operand.vmem [shape: bf16[128,128], index: 3, kind: output, shape index: {}]  }
   0x1   :  { %v543_v0 = vld [vmem:[%s825_s1 + $0x38] sm:$0xff]  ;;  %v542_v2 = vld [vmem:[%s825_s1 + $0x30] sm:$0xff]  ;;  %v541_v4 = vld [vmem:[%s825_s1 + $0x28] sm:$0xff] }
   0x2   :  { %v551_v1 = vld [vmem:[%s825_s1 + $0x78] sm:$0xff]  ;;  %242 = vmatpush.bf16.msra.mxu0 %v543_v0  ;;  %599 = vmatpush.bf16.msra.mxu2 %v543_v0  ;;  %v550_v3 = vld [vmem:[%s825_s1 + $0x70] sm:$0xff]  ;;  %v549_v5 = vld [vmem:[%s825_s1 + $0x68] sm:$0xff] }
   0x3   :  { %291 = vmatpush.bf16.msra.mxu1 %v551_v1  ;;  %607 = vmatpush.bf16.msra.mxu3 %v551_v1  ;;  %v540_v6 = vld [vmem:[%s825_s1 + $0x20] sm:$0xff]  ;;  %v539_v8 = vld [vmem:[%s825_s1 + $0x18] sm:$0xff]  ;;  %v538_v10 = vld [vmem:[%s825_s1 + $0x10] sm:$0xff] }
   0x4   :  { %v548_v7 = vld [vmem:[%s825_s1 + $0x60] sm:$0xff]  ;;  %v547_v9 = vld [vmem:[%s825_s1 + $0x58] sm:$0xff]  ;;  %v546_v11 = vld [vmem:[%s825_s1 + $0x50] sm:$0xff] }
   0x5   :  { %v537_v12 = vld [vmem:[%s825_s1 + $0x8] sm:$0xff]  ;;  %v536_v14 = vld [vmem:[%s825_s1] sm:$0xff]  ;;  %v402_v28 = vld [vmem:[%s827_s0 + $0x10] sm:$0xf] }
   0x6   :  { %243 = vmatpush.bf16.msra.mxu0 %v542_v2  ;;  %600 = vmatpush.bf16.msra.mxu2 %v542_v2  ;;  %v545_v13 = vld [vmem:[%s825_s1 + $0x48] sm:$0xff]  ;;  %v544_v15 = vld [vmem:[%s825_s1 + $0x40] sm:$0xff]  ;;  %v523_v29 = vld [vmem:[%s827_s0 + $0x14] sm:$0xf0] }
   0x7   :  { %292 = vmatpush.bf16.msra.mxu1 %v550_v3  ;;  %608 = vmatpush.bf16.msra.mxu3 %v550_v3  ;;  %v394_v16 = vld [vmem:[%s827_s0] sm:$0xf]  ;;  %v521_v17 = vld [vmem:[%s827_s0 + $0x4] sm:$0xf0]  ;;  %v520_v20 = vld [vmem:[%s827_s0 + $0x4] sm:$0xf]  ;;  %v403_v36 = vor.u32 %v523_v29, %v402_v28 }
   0x8   :  { %v426_v18 = vld [vmem:[%s827_s0 + $0x40] sm:$0xf]  ;;  %v529_v19 = vld [vmem:[%s827_s0 + $0x44] sm:$0xf0]  ;;  %v396_v21 = vld [vmem:[%s827_s0 + $0x8] sm:$0xf0]  ;;  %v395_v24 = vor.u32 %v521_v17, %v394_v16 }
   0x9   :  { %v528_v22 = vld [vmem:[%s827_s0 + $0x44] sm:$0xf]  ;;  %v428_v23 = vld [vmem:[%s827_s0 + $0x48] sm:$0xf0]  ;;  %v427_v25 = vor.u32 %v529_v19, %v426_v18  ;;  %v399_v26 = vor.u32 %v520_v20, %v396_v21  ;;  %v434_v30 = vld [vmem:[%s827_s0 + $0x50] sm:$0xf] }
   0xa   :  { %244 = vmatpush.bf16.msra.mxu0 %v541_v4  ;;  %601 = vmatpush.bf16.msra.mxu2 %v541_v4  ;;  %v431_v27 = vor.u32 %v528_v22, %v428_v23  ;;  %v531_v31 = vld [vmem:[%s827_s0 + $0x54] sm:$0xf0]  ;;  %v522_v32 = vld [vmem:[%s827_s0 + $0x14] sm:$0xf]  ;;  %v404_v33 = vld [vmem:[%s827_s0 + $0x18] sm:$0xf0] }
   0xb   :  { %293 = vmatpush.bf16.msra.mxu1 %v549_v5  ;;  %609 = vmatpush.bf16.msra.mxu3 %v549_v5  ;;  %v530_v34 = vld [vmem:[%s827_s0 + $0x54] sm:$0xf]  ;;  %v436_v35 = vld [vmem:[%s827_s0 + $0x58] sm:$0xf0]  ;;  %v435_v37 = vor.u32 %v531_v31, %v434_v30  ;;  %v407_v38 = vor.u32 %v522_v32, %v404_v33  ;;  %v410_v40 = vld [vmem:[%s827_s0 + $0x20] sm:$0xf] }
   0xc   :  { %v439_v39 = vor.u32 %v530_v34, %v436_v35  ;;  %v525_v41 = vld [vmem:[%s827_s0 + $0x24] sm:$0xf0]  ;;  %v442_v42 = vld [vmem:[%s827_s0 + $0x60] sm:$0xf]  ;;  %v524_v44 = vld [vmem:[%s827_s0 + $0x24] sm:$0xf] }
   0xd   :  { %v533_v43 = vld [vmem:[%s827_s0 + $0x64] sm:$0xf0]  ;;  %v412_v45 = vld [vmem:[%s827_s0 + $0x28] sm:$0xf0]  ;;  %v532_v46 = vld [vmem:[%s827_s0 + $0x64] sm:$0xf]  ;;  %v411_v48 = vor.u32 %v525_v41, %v410_v40 }
   0xe   :  { %245 = vmatpush.bf16.msra.mxu0 %v540_v6  ;;  %602 = vmatpush.bf16.msra.mxu2 %v540_v6  ;;  %v444_v47 = vld [vmem:[%s827_s0 + $0x68] sm:$0xf0]  ;;  %v443_v49 = vor.u32 %v533_v43, %v442_v42  ;;  %v415_v50 = vor.u32 %v524_v44, %v412_v45  ;;  %v418_v52 = vld [vmem:[%s827_s0 + $0x30] sm:$0xf]  ;;  %v527_v53 = vld [vmem:[%s827_s0 + $0x34] sm:$0xf0] }
   0xf   :  { %294 = vmatpush.bf16.msra.mxu1 %v548_v7  ;;  %610 = vmatpush.bf16.msra.mxu3 %v548_v7  ;;  %v447_v51 = vor.u32 %v532_v46, %v444_v47  ;;  %v450_v54 = vld [vmem:[%s827_s0 + $0x70] sm:$0xf]  ;;  %v535_v55 = vld [vmem:[%s827_s0 + $0x74] sm:$0xf0]  ;;  %v526_v56 = vld [vmem:[%s827_s0 + $0x34] sm:$0xf]  ;;  %v419_v60 = vor.u32 %v527_v53, %v418_v52 }
  0x10   :  { %v420_v57 = vld [vmem:[%s827_s0 + $0x38] sm:$0xf0]  ;;  %v534_v58 = vld [vmem:[%s827_s0 + $0x74] sm:$0xf]  ;;  %v451_v61 = vor.u32 %v535_v55, %v450_v54  ;;  %v783_v1 = vld [vmem:[%s826_s2] ss:$0 sm:$0xff] }
  0x11   :  { %v452_v59 = vld [vmem:[%s827_s0 + $0x78] sm:$0xf0]  ;;  %v423_v62 = vor.u32 %v526_v56, %v420_v57 }
  0x12   :  { %246 = vmatpush.bf16.msra.mxu0 %v539_v8  ;;  %603 = vmatpush.bf16.msra.mxu2 %v539_v8  ;;  %v455_v63 = vor.u32 %v534_v58, %v452_v59 }
  0x13   :  { %295 = vmatpush.bf16.msra.mxu1 %v547_v9  ;;  %611 = vmatpush.bf16.msra.mxu3 %v547_v9 }
  0x16   :  { %247 = vmatpush.bf16.msra.mxu0 %v538_v10  ;;  %604 = vmatpush.bf16.msra.mxu2 %v538_v10 }
  0x17   :  { %296 = vmatpush.bf16.msra.mxu1 %v546_v11  ;;  %612 = vmatpush.bf16.msra.mxu3 %v546_v11 }
  0x1a   :  { %248 = vmatpush.bf16.msra.mxu0 %v537_v12  ;;  %605 = vmatpush.bf16.msra.mxu2 %v537_v12 }
  0x1b   :  { %297 = vmatpush.bf16.msra.mxu1 %v545_v13  ;;  %613 = vmatpush.bf16.msra.mxu3 %v545_v13 }
  0x1e   :  { %249 = vmatpush.bf16.msra.mxu0 %v536_v14  ;;  %606 = vmatpush.bf16.msra.mxu2 %v536_v14 }
  0x1f   :  { %298 = vmatpush.bf16.msra.mxu1 %v544_v15  ;;  %614 = vmatpush.bf16.msra.mxu3 %v544_v15 }
  0x21   :  { %250 = vmatmul.bf16.vlgmr.msra.gmra.mxu0 %v395_v24  ;;  %270 = vmatmul.bf16.vlgmr.msra.gmra.mxu2 %v427_v25 }
  0x22   :  { %299 = vmatmul.bf16.vlgmr.msra.gmra.mxu1 %v399_v26  ;;  %319 = vmatmul.bf16.vlgmr.msra.gmra.mxu3 %v431_v27 }
  0x31   :  { %255 = vmatmul.bf16.gmra.mxu0 %v403_v36  ;;  %275 = vmatmul.bf16.gmra.mxu2 %v435_v37 }
  0x32   :  { %304 = vmatmul.bf16.gmra.mxu1 %v407_v38  ;;  %324 = vmatmul.bf16.gmra.mxu3 %v439_v39 }
  0x41   :  { %260 = vmatmul.bf16.gmra.mxu0 %v411_v48  ;;  %280 = vmatmul.bf16.gmra.mxu2 %v443_v49 }
  0x42   :  { %309 = vmatmul.bf16.gmra.mxu1 %v415_v50  ;;  %329 = vmatmul.bf16.gmra.mxu3 %v447_v51 }
  0x51   :  { %265 = vmatmul.bf16.gmra.mxu0 %v419_v60  ;;  %285 = vmatmul.bf16.gmra.mxu2 %v451_v61 }
  0x52   :  { %314 = vmatmul.bf16.gmra.mxu1 %v423_v62  ;;  %334 = vmatmul.bf16.gmra.mxu3 %v455_v63 }
  0x9e   :  { %v251_v0 = vpop.f32.mrf.mxu0 }
  0x9f   :  { %v300_v2 = vpop.f32.mrf.mxu1  ;;  %v252_v3 = vadd.f32 %v783_v1, %v251_v0 }
  0xa1   :  { %v301_v7 = vadd.f32 %v300_v2, %v252_v3 }
  0xa3   :  { %v340_v12 = vmax.f32 %v301_v7, 0.0 }
  0xa4   :  { %v271_v4 = vpop.f32.mrf.mxu2 }
  0xa5   :  { %v320_v5 = vpop.f32.mrf.mxu3  ;;  %v272_v10 = vadd.f32 %v783_v1, %v271_v4 }
  0xa6   :  { %v253_v6 = vpop.f32.mrf.mxu0 }
  0xa7   :  { %v254_v8 = vadd.f32 %v783_v1, %v253_v6  ;;  %v302_v9 = vpop.f32.mrf.mxu1  ;;  %v321_v15 = vadd.f32 %v320_v5, %v272_v10 }
  0xa9   :  { %v303_v11 = vadd.f32 %v302_v9, %v254_v8  ;;  %v348_v22 = vmax.f32 %v321_v15, 0.0 }
  0xab   :  { %v341_v13 = vmax.f32 %v303_v11, 0.0 }
  0xac   :  { %v273_v14 = vpop.f32.mrf.mxu2 }
  0xad   :  { %v555_v16 = vpack.c.bf16 %v341_v13, %v340_v12  ;;  %v274_v17 = vadd.f32 %v783_v1, %v273_v14  ;;  %v322_v18 = vpop.f32.mrf.mxu3 }
  0xae   :  { %v256_v19 = vpop.f32.mrf.mxu0 }
  0xaf   :  { %556 = vst [vmem:[%s828_s3] sm:$0xff] %v555_v16   ;;  %v323_v20 = vadd.f32 %v322_v18, %v274_v17  ;;  %v305_v21 = vpop.f32.mrf.mxu1  ;;  %v257_v25 = vadd.f32 %v783_v1, %v256_v19 }
  0xb1   :  { %v349_v23 = vmax.f32 %v323_v20, 0.0  ;;  %v306_v29 = vadd.f32 %v305_v21, %v257_v25 }
  0xb3   :  { %v575_v24 = vpack.c.bf16 %v349_v23, %v348_v22  ;;  %v342_v34 = vmax.f32 %v306_v29, 0.0 }
  0xb4   :  { %v276_v26 = vpop.f32.mrf.mxu2 }
  0xb5   :  { %595 = vst [vmem:[%s828_s3 + $0x20] sm:$0xff] %v575_v24   ;;  %v325_v27 = vpop.f32.mrf.mxu3  ;;  %v277_v32 = vadd.f32 %v783_v1, %v276_v26 }
  0xb6   :  { %v258_v28 = vpop.f32.mrf.mxu0 }
  0xb7   :  { %v259_v30 = vadd.f32 %v783_v1, %v258_v28  ;;  %v307_v31 = vpop.f32.mrf.mxu1  ;;  %v326_v37 = vadd.f32 %v325_v27, %v277_v32 }
  0xb9   :  { %v308_v33 = vadd.f32 %v307_v31, %v259_v30  ;;  %v350_v44 = vmax.f32 %v326_v37, 0.0 }
  0xbb   :  { %v343_v35 = vmax.f32 %v308_v33, 0.0 }
  0xbc   :  { %v278_v36 = vpop.f32.mrf.mxu2 }
  0xbd   :  { %v560_v38 = vpack.c.bf16 %v343_v35, %v342_v34  ;;  %v279_v39 = vadd.f32 %v783_v1, %v278_v36  ;;  %v327_v40 = vpop.f32.mrf.mxu3 }
  0xbe   :  { %v261_v41 = vpop.f32.mrf.mxu0 }
  0xbf   :  { %592 = vst [vmem:[%s828_s3 + $0x8] sm:$0xff] %v560_v38   ;;  %v328_v42 = vadd.f32 %v327_v40, %v279_v39  ;;  %v310_v43 = vpop.f32.mrf.mxu1  ;;  %v262_v47 = vadd.f32 %v783_v1, %v261_v41 }
  0xc1   :  { %v351_v45 = vmax.f32 %v328_v42, 0.0  ;;  %v311_v51 = vadd.f32 %v310_v43, %v262_v47 }
  0xc3   :  { %v580_v46 = vpack.c.bf16 %v351_v45, %v350_v44  ;;  %v344_v56 = vmax.f32 %v311_v51, 0.0 }
  0xc4   :  { %v281_v48 = vpop.f32.mrf.mxu2 }
  0xc5   :  { %596 = vst [vmem:[%s828_s3 + $0x28] sm:$0xff] %v580_v46   ;;  %v330_v49 = vpop.f32.mrf.mxu3  ;;  %v282_v54 = vadd.f32 %v783_v1, %v281_v48 }
  0xc6   :  { %v263_v50 = vpop.f32.mrf.mxu0 }
  0xc7   :  { %v264_v52 = vadd.f32 %v783_v1, %v263_v50  ;;  %v312_v53 = vpop.f32.mrf.mxu1  ;;  %v331_v59 = vadd.f32 %v330_v49, %v282_v54 }
  0xc9   :  { %v313_v55 = vadd.f32 %v312_v53, %v264_v52  ;;  %v352_v3 = vmax.f32 %v331_v59, 0.0 }
  0xcb   :  { %v345_v57 = vmax.f32 %v313_v55, 0.0 }
  0xcc   :  { %v283_v58 = vpop.f32.mrf.mxu2 }
  0xcd   :  { %v565_v60 = vpack.c.bf16 %v345_v57, %v344_v56  ;;  %v284_v61 = vadd.f32 %v783_v1, %v283_v58  ;;  %v332_v62 = vpop.f32.mrf.mxu3 }
  0xce   :  { %v266_v63 = vpop.f32.mrf.mxu0 }
  0xcf   :  { %593 = vst [vmem:[%s828_s3 + $0x10] sm:$0xff] %v565_v60   ;;  %v333_v0 = vadd.f32 %v332_v62, %v284_v61  ;;  %v315_v2 = vpop.f32.mrf.mxu1  ;;  %v267_v6 = vadd.f32 %v783_v1, %v266_v63 }
  0xd1   :  { %v353_v4 = vmax.f32 %v333_v0, 0.0  ;;  %v316_v10 = vadd.f32 %v315_v2, %v267_v6 }
  0xd3   :  { %v585_v5 = vpack.c.bf16 %v353_v4, %v352_v3  ;;  %v346_v15 = vmax.f32 %v316_v10, 0.0 }
  0xd4   :  { %v286_v7 = vpop.f32.mrf.mxu2 }
  0xd5   :  { %597 = vst [vmem:[%s828_s3 + $0x30] sm:$0xff] %v585_v5   ;;  %v335_v8 = vpop.f32.mrf.mxu3  ;;  %v287_v13 = vadd.f32 %v783_v1, %v286_v7 }
  0xd6   :  { %v268_v9 = vpop.f32.mrf.mxu0 }
  0xd7   :  { %v269_v11 = vadd.f32 %v783_v1, %v268_v9  ;;  %v317_v12 = vpop.f32.mrf.mxu1  ;;  %v336_v18 = vadd.f32 %v335_v8, %v287_v13 }
  0xd9   :  { %v318_v14 = vadd.f32 %v317_v12, %v269_v11  ;;  %v354_v23 = vmax.f32 %v336_v18, 0.0 }
  0xdb   :  { %v347_v16 = vmax.f32 %v318_v14, 0.0 }
  0xdc   :  { %v288_v17 = vpop.f32.mrf.mxu2 }
  0xdd   :  { %v570_v19 = vpack.c.bf16 %v347_v16, %v346_v15  ;;  %v289_v20 = vadd.f32 %v783_v1, %v288_v17  ;;  %v337_v21 = vpop.f32.mrf.mxu3 }
  0xdf   :  { %594 = vst [vmem:[%s828_s3 + $0x18] sm:$0xff] %v570_v19   ;;  %v338_v22 = vadd.f32 %v337_v21, %v289_v20 }
  0xe1   :  { %v355_v24 = vmax.f32 %v338_v22, 0.0 }
  0xe3   :  { %v590_v25 = vpack.c.bf16 %v355_v24, %v354_v23 }
  0xe5   :  { %598 = vst [vmem:[%s828_s3 + $0x38] sm:$0xff] %v590_v25  }

// kernel: _forward_impl.57
= control target key start
LH: loop header
LB: loop body
LE: loop exit
PB: predicated region body
PF: predicated region fallthrough
CT: control target
= control target key end

     0   :  { %vm196_vm0 = vcmask 60416   ;;  %s406_s0 = inlined_call_operand.vmem [shape: bf16[32,8], index: 0, kind: input, shape index: {}]   ;;  %s407_s1 = inlined_call_operand.vmem [shape: bf16[32,8], index: 1, kind: input, shape index: {}]   ;;  %s408_s2 = inlined_call_operand.vmem [shape: bf16[32,8], index: 2, kind: input, shape index: {}]   ;;  %s409_s3 = inlined_call_operand.vmem [shape: bf16[32,8], index: 3, kind: input, shape index: {}]   ;;  %s410_s4 = inlined_call_operand.vmem [shape: bf16[32,8], index: 4, kind: input, shape index: {}]   ;;  %s411_s5 = inlined_call_operand.vmem [shape: bf16[32,8], index: 5, kind: input, shape index: {}]   ;;  %s412_s6 = inlined_call_operand.vmem [shape: bf16[32,8], index: 6, kind: input, shape index: {}]   ;;  %s413_s7 = inlined_call_operand.vmem [shape: bf16[32,8], index: 7, kind: input, shape index: {}]   ;;  %s414_s8 = inlined_call_operand.vmem [shape: bf16[32,8], index: 8, kind: input, shape index: {}]   ;;  %s415_s9 = inlined_call_operand.vmem [shape: bf16[32,8], index: 9, kind: output, shape index: {}]  }
   0x1   :  { %v206_v0 = vld [vmem:[%s406_s0] sm:$0xff]   ;;  %v277_v12 = vld [vmem:[%s406_s0 + $0x8] sm:$0xff]  }
   0x2   :  { %v214_v1 = vld [vmem:[%s407_s1] sm:$0xff]   ;;  %v207_v3 = vunpack.c.l.bf16 %v206_v0  ;;  %v208_v7 = vunpack.c.h.bf16 %v206_v0  ;;  %v278_v13 = vld [vmem:[%s407_s1 + $0x8] sm:$0xff]   ;;  %v211_v25 = vunpack.c.l.bf16 %v277_v12  ;;  %v212_v41 = vunpack.c.h.bf16 %v277_v12 }
   0x3   :  { %v222_v2 = vld [vmem:[%s408_s2] sm:$0xff]   ;;  %v215_v4 = vunpack.c.l.bf16 %v214_v1  ;;  %v216_v9 = vunpack.c.h.bf16 %v214_v1  ;;  %v279_v19 = vld [vmem:[%s408_s2 + $0x8] sm:$0xff]   ;;  %v219_v26 = vunpack.c.l.bf16 %v278_v13  ;;  %v220_v46 = vunpack.c.h.bf16 %v278_v13 }
   0x4   :  { %v223_v5 = vunpack.c.l.bf16 %v222_v2  ;;  %v230_v6 = vld [vmem:[%s409_s3] sm:$0xff]   ;;  %v224_v17 = vunpack.c.h.bf16 %v222_v2  ;;  %v280_v22 = vld [vmem:[%s409_s3 + $0x8] sm:$0xff]   ;;  %v227_v31 = vunpack.c.l.bf16 %v279_v19  ;;  %v228_v47 = vunpack.c.h.bf16 %v279_v19 }
   0x5   :  { %v238_v8 = vld [vmem:[%s410_s4] sm:$0xff]   ;;  %v48_v10 = vmax.f32 %v207_v3, %v215_v4  ;;  %v231_v11 = vunpack.c.l.bf16 %v230_v6  ;;  %v49_v16 = vmax.f32 %v208_v7, %v216_v9  ;;  %v232_v18 = vunpack.c.h.bf16 %v230_v6  ;;  %v281_v27 = vld [vmem:[%s410_s4 + $0x8] sm:$0xff]  }
   0x6   :  { %v246_v14 = vld [vmem:[%s411_s5] sm:$0xff]   ;;  %v239_v21 = vunpack.c.l.bf16 %v238_v8  ;;  %v240_v24 = vunpack.c.h.bf16 %v238_v8  ;;  %v50_v35 = vmax.f32 %v211_v25, %v219_v26  ;;  %v235_v36 = vunpack.c.l.bf16 %v280_v22  ;;  %v282_v37 = vld [vmem:[%s411_s5 + $0x8] sm:$0xff]  }
   0x7   :  { %v254_v15 = vld [vmem:[%s412_s6] sm:$0xff]   ;;  %v68_v20 = vmax.f32 %v48_v10, %v223_v5  ;;  %v69_v23 = vmax.f32 %v49_v16, %v224_v17  ;;  %v247_v29 = vunpack.c.l.bf16 %v246_v14  ;;  %v248_v34 = vunpack.c.h.bf16 %v246_v14  ;;  %v283_v45 = vld [vmem:[%s412_s6 + $0x8] sm:$0xff]  }
   0x8   :  { %v255_v30 = vunpack.c.l.bf16 %v254_v15  ;;  %v262_v32 = vld [vmem:[%s413_s7] sm:$0xff]   ;;  %v256_v39 = vunpack.c.h.bf16 %v254_v15  ;;  %v243_v40 = vunpack.c.l.bf16 %v281_v27  ;;  %v70_v44 = vmax.f32 %v50_v35, %v227_v31  ;;  %v284_v54 = vld [vmem:[%s413_s7 + $0x8] sm:$0xff]  }
   0x9   :  { %v88_v28 = vmax.f32 %v68_v20, %v231_v11  ;;  %v89_v33 = vmax.f32 %v69_v23, %v232_v18  ;;  %v270_v42 = vld [vmem:[%s414_s8] sm:$0xff]   ;;  %v263_v49 = vunpack.c.l.bf16 %v262_v32  ;;  %v264_v50 = vunpack.c.h.bf16 %v262_v32  ;;  %v285_v63 = vld [vmem:[%s414_s8 + $0x8] sm:$0xff]  }
   0xa   :  { %v251_v51 = vunpack.c.l.bf16 %v282_v37  ;;  %v90_v53 = vmax.f32 %v70_v44, %v235_v36  ;;  %v51_v55 = vmax.f32 %v212_v41, %v220_v46  ;;  %v236_v56 = vunpack.c.h.bf16 %v280_v22 }
   0xb   :  { %v108_v38 = vmax.f32 %v88_v28, %v239_v21  ;;  %v109_v43 = vmax.f32 %v89_v33, %v240_v24  ;;  %v271_v58 = vunpack.c.l.bf16 %v270_v42  ;;  %v272_v59 = vunpack.c.h.bf16 %v270_v42 }
   0xc   :  { %v259_v60 = vunpack.c.l.bf16 %v283_v45  ;;  %v110_v62 = vmax.f32 %v90_v53, %v243_v40  ;;  %v71_v0 = vmax.f32 %v51_v55, %v228_v47  ;;  %v244_v1 = vunpack.c.h.bf16 %v281_v27 }
   0xd   :  { %v128_v48 = vmax.f32 %v108_v38, %v247_v29  ;;  %v129_v52 = vmax.f32 %v109_v43, %v248_v34  ;;  %v267_v3 = vunpack.c.l.bf16 %v284_v54  ;;  %v252_v7 = vunpack.c.h.bf16 %v282_v37 }
   0xe   :  { %v130_v5 = vmax.f32 %v110_v62, %v251_v51  ;;  %v91_v6 = vmax.f32 %v71_v0, %v236_v56  ;;  %v275_v9 = vunpack.c.l.bf16 %v285_v63  ;;  %v260_v13 = vunpack.c.h.bf16 %v283_v45 }
   0xf   :  { %v148_v57 = vmax.f32 %v128_v48, %v255_v30  ;;  %v149_v61 = vmax.f32 %v129_v52, %v256_v39  ;;  %v268_v18 = vunpack.c.h.bf16 %v284_v54  ;;  %v276_v21 = vunpack.c.h.bf16 %v285_v63 }
  0x10   :  { %v150_v11 = vmax.f32 %v130_v5, %v259_v60  ;;  %v111_v12 = vmax.f32 %v91_v6, %v244_v1 }
  0x11   :  { %v168_v2 = vmax.f32 %v148_v57, %v263_v49  ;;  %v169_v4 = vmax.f32 %v149_v61, %v264_v50 }
  0x12   :  { %v170_v16 = vmax.f32 %v150_v11, %v267_v3  ;;  %v131_v17 = vmax.f32 %v111_v12, %v252_v7 }
  0x13   :  { %v188_v8 = vmax.f32 %v168_v2, %v271_v58  ;;  %v189_v10 = vmax.f32 %v169_v4, %v272_v59 }
  0x14   :  { %v190_v19 = vmax.f32 %v170_v16, %v275_v9  ;;  %v151_v20 = vmax.f32 %v131_v17, %v260_v13 }
  0x15   :  { %v192_v14 = vpack.c.bf16 %v188_v8, %v188_v8  ;;  %v193_v15 = vpack.c.bf16 %v189_v10, %v189_v10 }
  0x16   :  { %v194_v22 = vpack.c.bf16 %v190_v19, %v190_v19  ;;  %v171_v23 = vmax.f32 %v151_v20, %v268_v18 }
  0x17   :  { %197 = vst.msk [vmem:[%s415_s9] sm:$0xf] %vm196_vm0, %v192_v14 }
  0x18   :  { %198 = vst.msk [vmem:[%s415_s9 + $0x4] sm:$0xf] %vm196_vm0, %v193_v15  ;;  %v191_v24 = vmax.f32 %v171_v23, %v276_v21 }
  0x19   :  { %199 = vst.msk [vmem:[%s415_s9 + $0x8] sm:$0xf] %vm196_vm0, %v194_v22 }
  0x1a   :  { %v195_v25 = vpack.c.bf16 %v191_v24, %v191_v24 }
  0x1c   :  { %200 = vst.msk [vmem:[%s415_s9 + $0xc] sm:$0xf] %vm196_vm0, %v195_v25 }

// kernel: _forward_impl.58
= control target key start
LH: loop header
LB: loop body
LE: loop exit
PB: predicated region body
PF: predicated region fallthrough
CT: control target
= control target key end

     0   :  { %s262_s1 = inlined_call_operand.vmem [shape: bf16[128,128], index: 1, kind: input, shape index: {}]   ;;  %s263_s2 = inlined_call_operand.vmem [shape: f32[1,128], index: 2, kind: input, shape index: {}]   ;;  %s264_s0 = inlined_call_operand.vmem [shape: bf16[32,128], index: 0, kind: input, shape index: {}]   ;;  %s265_s3 = inlined_call_operand.vmem [shape: bf16[32,128], index: 3, kind: output, shape index: {}]  }
   0x1   :  { %v182_v0 = vld [vmem:[%s262_s1 + $0x38] sm:$0xff]  ;;  %v181_v1 = vld [vmem:[%s262_s1 + $0x30] sm:$0xff]  ;;  %v180_v2 = vld [vmem:[%s262_s1 + $0x28] sm:$0xff] }
   0x2   :  { %98 = vmatpush.bf16.msra.mxu0 %v182_v0  ;;  %194 = vmatpush.bf16.msra.mxu1 %v182_v0  ;;  %v179_v3 = vld [vmem:[%s262_s1 + $0x20] sm:$0xff]  ;;  %v178_v4 = vld [vmem:[%s262_s1 + $0x18] sm:$0xff]  ;;  %v177_v5 = vld [vmem:[%s262_s1 + $0x10] sm:$0xff] }
   0x3   :  { %v176_v6 = vld [vmem:[%s262_s1 + $0x8] sm:$0xff]  ;;  %v175_v7 = vld [vmem:[%s262_s1] sm:$0xff] }
   0x4   :  { %v173_v8 = vld [vmem:[%s264_s0] sm:$0xff]  ;;  %v174_v9 = vld [vmem:[%s264_s0 + $0x8] sm:$0xff] }
   0x5   :  { %v202_v12 = vld [vmem:[%s263_s2] ss:$0 sm:$0xff] }
   0x6   :  { %99 = vmatpush.bf16.msra.mxu0 %v181_v1  ;;  %195 = vmatpush.bf16.msra.mxu1 %v181_v1 }
   0xa   :  { %100 = vmatpush.bf16.msra.mxu0 %v180_v2  ;;  %196 = vmatpush.bf16.msra.mxu1 %v180_v2 }
   0xe   :  { %101 = vmatpush.bf16.msra.mxu0 %v179_v3  ;;  %197 = vmatpush.bf16.msra.mxu1 %v179_v3 }
  0x12   :  { %102 = vmatpush.bf16.msra.mxu0 %v178_v4  ;;  %198 = vmatpush.bf16.msra.mxu1 %v178_v4 }
  0x16   :  { %103 = vmatpush.bf16.msra.mxu0 %v177_v5  ;;  %199 = vmatpush.bf16.msra.mxu1 %v177_v5 }
  0x1a   :  { %104 = vmatpush.bf16.msra.mxu0 %v176_v6  ;;  %200 = vmatpush.bf16.msra.mxu1 %v176_v6 }
  0x1e   :  { %105 = vmatpush.bf16.msra.mxu0 %v175_v7  ;;  %201 = vmatpush.bf16.msra.mxu1 %v175_v7 }
  0x21   :  { %106 = vmatmul.bf16.vlgmr.msra.gmra.mxu0 %v173_v8  ;;  %111 = vmatmul.bf16.vlgmr.msra.gmra.mxu1 %v174_v9 }
  0x9e   :  { %v107_v10 = vpop.f32.mrf.mxu0  ;;  %v112_v11 = vpop.f32.mrf.mxu1 }
  0x9f   :  { %v108_v13 = vadd.f32 %v202_v12, %v107_v10  ;;  %v113_v14 = vadd.f32 %v202_v12, %v112_v11 }
  0xa1   :  { %v117_v19 = vmax.f32 %v108_v13, 0.0  ;;  %v119_v20 = vmax.f32 %v113_v14, 0.0 }
  0xa6   :  { %v109_v15 = vpop.f32.mrf.mxu0  ;;  %v114_v16 = vpop.f32.mrf.mxu1 }
  0xa7   :  { %v110_v17 = vadd.f32 %v202_v12, %v109_v15  ;;  %v115_v18 = vadd.f32 %v202_v12, %v114_v16 }
  0xa9   :  { %v118_v21 = vmax.f32 %v110_v17, 0.0  ;;  %v120_v22 = vmax.f32 %v115_v18, 0.0 }
  0xab   :  { %v186_v23 = vpack.c.bf16 %v118_v21, %v117_v19  ;;  %v191_v24 = vpack.c.bf16 %v120_v22, %v119_v20 }
  0xad   :  { %187 = vst [vmem:[%s265_s3] sm:$0xff] %v186_v23  }
  0xae   :  { %193 = vst [vmem:[%s265_s3 + $0x8] sm:$0xff] %v191_v24  }

// kernel: _forward_impl.60
= control target key start
LH: loop header
LB: loop body
LE: loop exit
PB: predicated region body
PF: predicated region fallthrough
CT: control target
= control target key end

     0   :  { %s258_s1 = inlined_call_operand.vmem [shape: bf16[128,128], index: 1, kind: input, shape index: {}]   ;;  %s259_s2 = inlined_call_operand.vmem [shape: f32[1,128], index: 2, kind: input, shape index: {}]   ;;  %s260_s0 = inlined_call_operand.vmem [shape: bf16[32,128], index: 0, kind: input, shape index: {}]   ;;  %s261_s3 = inlined_call_operand.vmem [shape: bf16[32,128], index: 3, kind: output, shape index: {}]  }
   0x1   :  { %v178_v0 = vld [vmem:[%s258_s1 + $0x38] sm:$0xff]  ;;  %v177_v1 = vld [vmem:[%s258_s1 + $0x30] sm:$0xff]  ;;  %v176_v2 = vld [vmem:[%s258_s1 + $0x28] sm:$0xff] }
   0x2   :  { %98 = vmatpush.bf16.msra.mxu0 %v178_v0  ;;  %190 = vmatpush.bf16.msra.mxu1 %v178_v0  ;;  %v175_v3 = vld [vmem:[%s258_s1 + $0x20] sm:$0xff]  ;;  %v174_v4 = vld [vmem:[%s258_s1 + $0x18] sm:$0xff]  ;;  %v173_v5 = vld [vmem:[%s258_s1 + $0x10] sm:$0xff] }
   0x3   :  { %v172_v6 = vld [vmem:[%s258_s1 + $0x8] sm:$0xff]  ;;  %v171_v7 = vld [vmem:[%s258_s1] sm:$0xff] }
   0x4   :  { %v169_v8 = vld [vmem:[%s260_s0] sm:$0xff]  ;;  %v170_v9 = vld [vmem:[%s260_s0 + $0x8] sm:$0xff] }
   0x5   :  { %v198_v12 = vld [vmem:[%s259_s2] ss:$0 sm:$0xff] }
   0x6   :  { %99 = vmatpush.bf16.msra.mxu0 %v177_v1  ;;  %191 = vmatpush.bf16.msra.mxu1 %v177_v1 }
   0xa   :  { %100 = vmatpush.bf16.msra.mxu0 %v176_v2  ;;  %192 = vmatpush.bf16.msra.mxu1 %v176_v2 }
   0xe   :  { %101 = vmatpush.bf16.msra.mxu0 %v175_v3  ;;  %193 = vmatpush.bf16.msra.mxu1 %v175_v3 }
  0x12   :  { %102 = vmatpush.bf16.msra.mxu0 %v174_v4  ;;  %194 = vmatpush.bf16.msra.mxu1 %v174_v4 }
  0x16   :  { %103 = vmatpush.bf16.msra.mxu0 %v173_v5  ;;  %195 = vmatpush.bf16.msra.mxu1 %v173_v5 }
  0x1a   :  { %104 = vmatpush.bf16.msra.mxu0 %v172_v6  ;;  %196 = vmatpush.bf16.msra.mxu1 %v172_v6 }
  0x1e   :  { %105 = vmatpush.bf16.msra.mxu0 %v171_v7  ;;  %197 = vmatpush.bf16.msra.mxu1 %v171_v7 }
  0x21   :  { %106 = vmatmul.bf16.vlgmr.msra.gmra.mxu0 %v169_v8  ;;  %111 = vmatmul.bf16.vlgmr.msra.gmra.mxu1 %v170_v9 }
  0x9e   :  { %v107_v10 = vpop.f32.mrf.mxu0  ;;  %v112_v11 = vpop.f32.mrf.mxu1 }
  0x9f   :  { %v108_v15 = vadd.f32 %v198_v12, %v107_v10  ;;  %v113_v16 = vadd.f32 %v198_v12, %v112_v11 }
  0xa6   :  { %v109_v13 = vpop.f32.mrf.mxu0  ;;  %v114_v14 = vpop.f32.mrf.mxu1 }
  0xa7   :  { %v110_v17 = vadd.f32 %v198_v12, %v109_v13  ;;  %v115_v18 = vadd.f32 %v198_v12, %v114_v14 }
  0xa9   :  { %v182_v19 = vpack.c.bf16 %v110_v17, %v108_v15  ;;  %v187_v20 = vpack.c.bf16 %v115_v18, %v113_v16 }
  0xab   :  { %183 = vst [vmem:[%s261_s3] sm:$0xff] %v182_v19  }
  0xac   :  { %189 = vst [vmem:[%s261_s3 + $0x8] sm:$0xff] %v187_v20  }

// kernel: _forward_impl.61
= control target key start
LH: loop header
LB: loop body
LE: loop exit
PB: predicated region body
PF: predicated region fallthrough
CT: control target
= control target key end

     0   :  { %s297_s1 = inlined_call_operand.vmem [shape: bf16[128,128], index: 1, kind: input, shape index: {}]   ;;  %s298_s2 = inlined_call_operand.vmem [shape: f32[1,128], index: 2, kind: input, shape index: {}]   ;;  %s299_s0 = inlined_call_operand.vmem [shape: bf16[32,128], index: 0, kind: input, shape index: {}]   ;;  %s300_s3 = inlined_call_operand.vmem [shape: bf16[32,128], index: 3, kind: input, shape index: {}]   ;;  %s301_s4 = inlined_call_operand.vmem [shape: bf16[32,128], index: 4, kind: output, shape index: {}]  }
   0x1   :  { %v197_v0 = vld [vmem:[%s297_s1 + $0x38] sm:$0xff]  ;;  %v196_v1 = vld [vmem:[%s297_s1 + $0x30] sm:$0xff]  ;;  %v195_v2 = vld [vmem:[%s297_s1 + $0x28] sm:$0xff] }
   0x2   :  { %101 = vmatpush.bf16.msra.mxu0 %v197_v0  ;;  %218 = vmatpush.bf16.msra.mxu1 %v197_v0  ;;  %v194_v3 = vld [vmem:[%s297_s1 + $0x20] sm:$0xff]  ;;  %v193_v4 = vld [vmem:[%s297_s1 + $0x18] sm:$0xff]  ;;  %v192_v5 = vld [vmem:[%s297_s1 + $0x10] sm:$0xff] }
   0x3   :  { %v191_v6 = vld [vmem:[%s297_s1 + $0x8] sm:$0xff]  ;;  %v190_v7 = vld [vmem:[%s297_s1] sm:$0xff] }
   0x4   :  { %v188_v8 = vld [vmem:[%s299_s0] sm:$0xff]  ;;  %v189_v9 = vld [vmem:[%s299_s0 + $0x8] sm:$0xff] }
   0x5   :  { %v226_v12 = vld [vmem:[%s298_s2] ss:$0 sm:$0xff]  ;;  %v216_v14 = vld [vmem:[%s300_s3 + $0x8] sm:$0xff]  }
   0x6   :  { %102 = vmatpush.bf16.msra.mxu0 %v196_v1  ;;  %219 = vmatpush.bf16.msra.mxu1 %v196_v1  ;;  %v199_v13 = vld [vmem:[%s300_s3] sm:$0xff]   ;;  %v204_v18 = vunpack.c.l.bf16 %v216_v14  ;;  %v205_v20 = vunpack.c.h.bf16 %v216_v14 }
   0x7   :  { %v200_v16 = vunpack.c.l.bf16 %v199_v13  ;;  %v201_v19 = vunpack.c.h.bf16 %v199_v13 }
   0xa   :  { %103 = vmatpush.bf16.msra.mxu0 %v195_v2  ;;  %220 = vmatpush.bf16.msra.mxu1 %v195_v2 }
   0xe   :  { %104 = vmatpush.bf16.msra.mxu0 %v194_v3  ;;  %221 = vmatpush.bf16.msra.mxu1 %v194_v3 }
  0x12   :  { %105 = vmatpush.bf16.msra.mxu0 %v193_v4  ;;  %222 = vmatpush.bf16.msra.mxu1 %v193_v4 }
  0x16   :  { %106 = vmatpush.bf16.msra.mxu0 %v192_v5  ;;  %223 = vmatpush.bf16.msra.mxu1 %v192_v5 }
  0x1a   :  { %107 = vmatpush.bf16.msra.mxu0 %v191_v6  ;;  %224 = vmatpush.bf16.msra.mxu1 %v191_v6 }
  0x1e   :  { %108 = vmatpush.bf16.msra.mxu0 %v190_v7  ;;  %225 = vmatpush.bf16.msra.mxu1 %v190_v7 }
  0x21   :  { %109 = vmatmul.bf16.vlgmr.msra.gmra.mxu0 %v188_v8  ;;  %114 = vmatmul.bf16.vlgmr.msra.gmra.mxu1 %v189_v9 }
  0x9e   :  { %v110_v10 = vpop.f32.mrf.mxu0  ;;  %v115_v11 = vpop.f32.mrf.mxu1 }
  0x9f   :  { %v111_v15 = vadd.f32 %v226_v12, %v110_v10  ;;  %v116_v17 = vadd.f32 %v226_v12, %v115_v11 }
  0xa1   :  { %v128_v23 = vadd.f32 %v200_v16, %v111_v15  ;;  %v130_v24 = vadd.f32 %v204_v18, %v116_v17 }
  0xa3   :  { %v132_v29 = vmax.f32 %v128_v23, 0.0  ;;  %v134_v30 = vmax.f32 %v130_v24, 0.0 }
  0xa6   :  { %v112_v21 = vpop.f32.mrf.mxu0  ;;  %v117_v22 = vpop.f32.mrf.mxu1 }
  0xa7   :  { %v113_v25 = vadd.f32 %v226_v12, %v112_v21  ;;  %v118_v26 = vadd.f32 %v226_v12, %v117_v22 }
  0xa9   :  { %v129_v27 = vadd.f32 %v201_v19, %v113_v25  ;;  %v131_v28 = vadd.f32 %v205_v20, %v118_v26 }
  0xab   :  { %v133_v31 = vmax.f32 %v129_v27, 0.0  ;;  %v135_v32 = vmax.f32 %v131_v28, 0.0 }
  0xad   :  { %v209_v33 = vpack.c.bf16 %v133_v31, %v132_v29  ;;  %v214_v34 = vpack.c.bf16 %v135_v32, %v134_v30 }
  0xaf   :  { %210 = vst [vmem:[%s301_s4] sm:$0xff] %v209_v33  }
  0xb0   :  { %217 = vst [vmem:[%s301_s4 + $0x8] sm:$0xff] %v214_v34  }

// kernel: _forward_impl.69
= control target key start
LH: loop header
LB: loop body
LE: loop exit
PB: predicated region body
PF: predicated region fallthrough
CT: control target
= control target key end

     0   :  { %s378_s1 = inlined_call_operand.vmem [shape: bf16[256,128], index: 1, kind: input, shape index: {}]   ;;  %s379_s2 = inlined_call_operand.vmem [shape: f32[1,128], index: 2, kind: input, shape index: {}]   ;;  %s380_s0 = inlined_call_operand.vmem [shape: bf16[16,256], index: 0, kind: input, shape index: {}]   ;;  %s381_s3 = inlined_call_operand.vmem [shape: bf16[16,128], index: 3, kind: output, shape index: {}]  }
   0x1   :  { %v277_v0 = vld [vmem:[%s378_s1 + $0x38] sm:$0xff]  ;;  %v276_v2 = vld [vmem:[%s378_s1 + $0x30] sm:$0xff]  ;;  %v275_v4 = vld [vmem:[%s378_s1 + $0x28] sm:$0xff] }
   0x2   :  { %v285_v1 = vld [vmem:[%s378_s1 + $0x78] sm:$0xff]  ;;  %158 = vmatpush.bf16.msra.mxu0 %v277_v0  ;;  %v284_v3 = vld [vmem:[%s378_s1 + $0x70] sm:$0xff]  ;;  %v283_v5 = vld [vmem:[%s378_s1 + $0x68] sm:$0xff] }
   0x3   :  { %172 = vmatpush.bf16.msra.mxu1 %v285_v1  ;;  %v274_v6 = vld [vmem:[%s378_s1 + $0x20] sm:$0xff]  ;;  %v273_v8 = vld [vmem:[%s378_s1 + $0x18] sm:$0xff]  ;;  %v272_v10 = vld [vmem:[%s378_s1 + $0x10] sm:$0xff] }
   0x4   :  { %v282_v7 = vld [vmem:[%s378_s1 + $0x60] sm:$0xff]  ;;  %v281_v9 = vld [vmem:[%s378_s1 + $0x58] sm:$0xff]  ;;  %v280_v11 = vld [vmem:[%s378_s1 + $0x50] sm:$0xff] }
   0x5   :  { %v271_v12 = vld [vmem:[%s378_s1 + $0x8] sm:$0xff]  ;;  %v270_v14 = vld [vmem:[%s378_s1] sm:$0xff] }
   0x6   :  { %159 = vmatpush.bf16.msra.mxu0 %v276_v2  ;;  %v279_v13 = vld [vmem:[%s378_s1 + $0x48] sm:$0xff]  ;;  %v278_v15 = vld [vmem:[%s378_s1 + $0x40] sm:$0xff] }
   0x7   :  { %173 = vmatpush.bf16.msra.mxu1 %v284_v3  ;;  %v198_v16 = vld [vmem:[%s380_s0] sm:$0xf]  ;;  %v269_v17 = vld [vmem:[%s380_s0 + $0x4] sm:$0xf0]  ;;  %v268_v18 = vld [vmem:[%s380_s0 + $0x4] sm:$0xf] }
   0x8   :  { %v200_v19 = vld [vmem:[%s380_s0 + $0x8] sm:$0xf0]  ;;  %v199_v20 = vor.u32 %v269_v17, %v198_v16  ;;  %v291_v24 = vld [vmem:[%s379_s2] ss:$0 sm:$0xff] }
   0x9   :  { %v203_v21 = vor.u32 %v268_v18, %v200_v19 }
   0xa   :  { %160 = vmatpush.bf16.msra.mxu0 %v275_v4 }
   0xb   :  { %174 = vmatpush.bf16.msra.mxu1 %v283_v5 }
   0xe   :  { %161 = vmatpush.bf16.msra.mxu0 %v274_v6 }
   0xf   :  { %175 = vmatpush.bf16.msra.mxu1 %v282_v7 }
  0x12   :  { %162 = vmatpush.bf16.msra.mxu0 %v273_v8 }
  0x13   :  { %176 = vmatpush.bf16.msra.mxu1 %v281_v9 }
  0x16   :  { %163 = vmatpush.bf16.msra.mxu0 %v272_v10 }
  0x17   :  { %177 = vmatpush.bf16.msra.mxu1 %v280_v11 }
  0x1a   :  { %164 = vmatpush.bf16.msra.mxu0 %v271_v12 }
  0x1b   :  { %178 = vmatpush.bf16.msra.mxu1 %v279_v13 }
  0x1e   :  { %165 = vmatpush.bf16.msra.mxu0 %v270_v14 }
  0x1f   :  { %179 = vmatpush.bf16.msra.mxu1 %v278_v15 }
  0x21   :  { %166 = vmatmul.bf16.vlgmr.msra.gmra.mxu0 %v199_v20 }
  0x22   :  { %180 = vmatmul.bf16.vlgmr.msra.gmra.mxu1 %v203_v21 }
  0x9e   :  { %v167_v22 = vpop.f32.mrf.mxu0 }
  0x9f   :  { %v181_v23 = vpop.f32.mrf.mxu1  ;;  %v168_v25 = vadd.f32 %v291_v24, %v167_v22 }
  0xa1   :  { %v182_v27 = vadd.f32 %v181_v23, %v168_v25 }
  0xa3   :  { %v186_v31 = vmax.f32 %v182_v27, 0.0 }
  0xa6   :  { %v169_v26 = vpop.f32.mrf.mxu0 }
  0xa7   :  { %v170_v28 = vadd.f32 %v291_v24, %v169_v26  ;;  %v183_v29 = vpop.f32.mrf.mxu1 }
  0xa9   :  { %v184_v30 = vadd.f32 %v183_v29, %v170_v28 }
  0xab   :  { %v187_v32 = vmax.f32 %v184_v30, 0.0 }
  0xad   :  { %v289_v33 = vpack.c.bf16 %v187_v32, %v186_v31 }
  0xaf   :  { %290 = vst [vmem:[%s381_s3] sm:$0xff] %v289_v33  }

// kernel: _forward_impl.70
= control target key start
LH: loop header
LB: loop body
LE: loop exit
PB: predicated region body
PF: predicated region fallthrough
CT: control target
= control target key end

     0   :  { %s216_s1 = inlined_call_operand.vmem [shape: bf16[128,128], index: 1, kind: input, shape index: {}]   ;;  %s217_s2 = inlined_call_operand.vmem [shape: f32[1,128], index: 2, kind: input, shape index: {}]   ;;  %s218_s0 = inlined_call_operand.vmem [shape: bf16[16,128], index: 0, kind: input, shape index: {}]   ;;  %s219_s3 = inlined_call_operand.vmem [shape: bf16[16,128], index: 3, kind: output, shape index: {}]  }
   0x1   :  { %v156_v0 = vld [vmem:[%s216_s1 + $0x38] sm:$0xff]  ;;  %v155_v1 = vld [vmem:[%s216_s1 + $0x30] sm:$0xff]  ;;  %v154_v2 = vld [vmem:[%s216_s1 + $0x28] sm:$0xff] }
   0x2   :  { %90 = vmatpush.bf16.msra.mxu0 %v156_v0  ;;  %v153_v3 = vld [vmem:[%s216_s1 + $0x20] sm:$0xff]  ;;  %v152_v4 = vld [vmem:[%s216_s1 + $0x18] sm:$0xff]  ;;  %v151_v5 = vld [vmem:[%s216_s1 + $0x10] sm:$0xff] }
   0x3   :  { %v150_v6 = vld [vmem:[%s216_s1 + $0x8] sm:$0xff]  ;;  %v149_v7 = vld [vmem:[%s216_s1] sm:$0xff] }
   0x4   :  { %v148_v8 = vld [vmem:[%s218_s0] sm:$0xff] }
   0x5   :  { %v162_v10 = vld [vmem:[%s217_s2] ss:$0 sm:$0xff] }
   0x6   :  { %91 = vmatpush.bf16.msra.mxu0 %v155_v1 }
   0xa   :  { %92 = vmatpush.bf16.msra.mxu0 %v154_v2 }
   0xe   :  { %93 = vmatpush.bf16.msra.mxu0 %v153_v3 }
  0x12   :  { %94 = vmatpush.bf16.msra.mxu0 %v152_v4 }
  0x16   :  { %95 = vmatpush.bf16.msra.mxu0 %v151_v5 }
  0x1a   :  { %96 = vmatpush.bf16.msra.mxu0 %v150_v6 }
  0x1e   :  { %97 = vmatpush.bf16.msra.mxu0 %v149_v7 }
  0x21   :  { %98 = vmatmul.bf16.vlgmr.msra.gmra.mxu0 %v148_v8 }
  0x9e   :  { %v99_v9 = vpop.f32.mrf.mxu0 }
  0x9f   :  { %v100_v12 = vadd.f32 %v162_v10, %v99_v9 }
  0xa6   :  { %v101_v11 = vpop.f32.mrf.mxu0 }
  0xa7   :  { %v102_v13 = vadd.f32 %v162_v10, %v101_v11 }
  0xa9   :  { %v160_v14 = vpack.c.bf16 %v102_v13, %v100_v12 }
  0xab   :  { %161 = vst [vmem:[%s219_s3] sm:$0xff] %v160_v14  }

// kernel: _forward_impl.71
= control target key start
LH: loop header
LB: loop body
LE: loop exit
PB: predicated region body
PF: predicated region fallthrough
CT: control target
= control target key end

     0   :  { %s239_s1 = inlined_call_operand.vmem [shape: bf16[128,128], index: 1, kind: input, shape index: {}]   ;;  %s240_s2 = inlined_call_operand.vmem [shape: f32[1,128], index: 2, kind: input, shape index: {}]   ;;  %s241_s0 = inlined_call_operand.vmem [shape: bf16[16,128], index: 0, kind: input, shape index: {}]   ;;  %s242_s3 = inlined_call_operand.vmem [shape: bf16[16,128], index: 3, kind: input, shape index: {}]   ;;  %s243_s4 = inlined_call_operand.vmem [shape: bf16[16,128], index: 4, kind: output, shape index: {}]  }
   0x1   :  { %v167_v0 = vld [vmem:[%s239_s1 + $0x38] sm:$0xff]  ;;  %v166_v1 = vld [vmem:[%s239_s1 + $0x30] sm:$0xff]  ;;  %v165_v2 = vld [vmem:[%s239_s1 + $0x28] sm:$0xff] }
   0x2   :  { %93 = vmatpush.bf16.msra.mxu0 %v167_v0  ;;  %v164_v3 = vld [vmem:[%s239_s1 + $0x20] sm:$0xff]  ;;  %v163_v4 = vld [vmem:[%s239_s1 + $0x18] sm:$0xff]  ;;  %v162_v5 = vld [vmem:[%s239_s1 + $0x10] sm:$0xff] }
   0x3   :  { %v161_v6 = vld [vmem:[%s239_s1 + $0x8] sm:$0xff]  ;;  %v160_v7 = vld [vmem:[%s239_s1] sm:$0xff] }
   0x4   :  { %v159_v8 = vld [vmem:[%s241_s0] sm:$0xff] }
   0x5   :  { %v177_v10 = vld [vmem:[%s240_s2] ss:$0 sm:$0xff] }
   0x6   :  { %94 = vmatpush.bf16.msra.mxu0 %v166_v1  ;;  %v169_v11 = vld [vmem:[%s242_s3] sm:$0xff]  }
   0x7   :  { %v170_v13 = vunpack.c.l.bf16 %v169_v11  ;;  %v171_v14 = vunpack.c.h.bf16 %v169_v11 }
   0xa   :  { %95 = vmatpush.bf16.msra.mxu0 %v165_v2 }
   0xe   :  { %96 = vmatpush.bf16.msra.mxu0 %v164_v3 }
  0x12   :  { %97 = vmatpush.bf16.msra.mxu0 %v163_v4 }
  0x16   :  { %98 = vmatpush.bf16.msra.mxu0 %v162_v5 }
  0x1a   :  { %99 = vmatpush.bf16.msra.mxu0 %v161_v6 }
  0x1e   :  { %100 = vmatpush.bf16.msra.mxu0 %v160_v7 }
  0x21   :  { %101 = vmatmul.bf16.vlgmr.msra.gmra.mxu0 %v159_v8 }
  0x9e   :  { %v102_v9 = vpop.f32.mrf.mxu0 }
  0x9f   :  { %v103_v12 = vadd.f32 %v177_v10, %v102_v9 }
  0xa1   :  { %v111_v16 = vadd.f32 %v170_v13, %v103_v12 }
  0xa3   :  { %v113_v19 = vmax.f32 %v111_v16, 0.0 }
  0xa6   :  { %v104_v15 = vpop.f32.mrf.mxu0 }
  0xa7   :  { %v105_v17 = vadd.f32 %v177_v10, %v104_v15 }
  0xa9   :  { %v112_v18 = vadd.f32 %v171_v14, %v105_v17 }
  0xab   :  { %v114_v20 = vmax.f32 %v112_v18, 0.0 }
  0xad   :  { %v175_v21 = vpack.c.bf16 %v114_v20, %v113_v19 }
  0xaf   :  { %176 = vst [vmem:[%s243_s4] sm:$0xff] %v175_v21  }

// kernel: _forward_impl.72
= control target key start
LH: loop header
LB: loop body
LE: loop exit
PB: predicated region body
PF: predicated region fallthrough
CT: control target
= control target key end

     0   :  { %s218_s1 = inlined_call_operand.vmem [shape: bf16[128,128], index: 1, kind: input, shape index: {}]   ;;  %s219_s2 = inlined_call_operand.vmem [shape: f32[1,128], index: 2, kind: input, shape index: {}]   ;;  %s220_s0 = inlined_call_operand.vmem [shape: bf16[16,128], index: 0, kind: input, shape index: {}]   ;;  %s221_s3 = inlined_call_operand.vmem [shape: bf16[16,128], index: 3, kind: output, shape index: {}]  }
   0x1   :  { %v158_v0 = vld [vmem:[%s218_s1 + $0x38] sm:$0xff]  ;;  %v157_v1 = vld [vmem:[%s218_s1 + $0x30] sm:$0xff]  ;;  %v156_v2 = vld [vmem:[%s218_s1 + $0x28] sm:$0xff] }
   0x2   :  { %90 = vmatpush.bf16.msra.mxu0 %v158_v0  ;;  %v155_v3 = vld [vmem:[%s218_s1 + $0x20] sm:$0xff]  ;;  %v154_v4 = vld [vmem:[%s218_s1 + $0x18] sm:$0xff]  ;;  %v153_v5 = vld [vmem:[%s218_s1 + $0x10] sm:$0xff] }
   0x3   :  { %v152_v6 = vld [vmem:[%s218_s1 + $0x8] sm:$0xff]  ;;  %v151_v7 = vld [vmem:[%s218_s1] sm:$0xff] }
   0x4   :  { %v150_v8 = vld [vmem:[%s220_s0] sm:$0xff] }
   0x5   :  { %v164_v10 = vld [vmem:[%s219_s2] ss:$0 sm:$0xff] }
   0x6   :  { %91 = vmatpush.bf16.msra.mxu0 %v157_v1 }
   0xa   :  { %92 = vmatpush.bf16.msra.mxu0 %v156_v2 }
   0xe   :  { %93 = vmatpush.bf16.msra.mxu0 %v155_v3 }
  0x12   :  { %94 = vmatpush.bf16.msra.mxu0 %v154_v4 }
  0x16   :  { %95 = vmatpush.bf16.msra.mxu0 %v153_v5 }
  0x1a   :  { %96 = vmatpush.bf16.msra.mxu0 %v152_v6 }
  0x1e   :  { %97 = vmatpush.bf16.msra.mxu0 %v151_v7 }
  0x21   :  { %98 = vmatmul.bf16.vlgmr.msra.gmra.mxu0 %v150_v8 }
  0x9e   :  { %v99_v9 = vpop.f32.mrf.mxu0 }
  0x9f   :  { %v100_v11 = vadd.f32 %v164_v10, %v99_v9 }
  0xa1   :  { %v104_v14 = vmax.f32 %v100_v11, 0.0 }
  0xa6   :  { %v101_v12 = vpop.f32.mrf.mxu0 }
  0xa7   :  { %v102_v13 = vadd.f32 %v164_v10, %v101_v12 }
  0xa9   :  { %v105_v15 = vmax.f32 %v102_v13, 0.0 }
  0xab   :  { %v162_v16 = vpack.c.bf16 %v105_v15, %v104_v14 }
  0xad   :  { %163 = vst [vmem:[%s221_s3] sm:$0xff] %v162_v16  }

// kernel: _forward_impl.82
= control target key start
LH: loop header
LB: loop body
LE: loop exit
PB: predicated region body
PF: predicated region fallthrough
CT: control target
= control target key end

     0   :  { %s539_s1 = inlined_call_operand.vmem [shape: bf16[384,128], index: 1, kind: input, shape index: {}]   ;;  %s540_s2 = inlined_call_operand.vmem [shape: f32[1,128], index: 2, kind: input, shape index: {}]   ;;  %s541_s0 = inlined_call_operand.vmem [shape: bf16[16,384], index: 0, kind: input, shape index: {}]   ;;  %s542_s3 = inlined_call_operand.vmem [shape: bf16[16,128], index: 3, kind: output, shape index: {}]  }
   0x1   :  { %v400_v0 = vld [vmem:[%s539_s1 + $0x38] sm:$0xff]  ;;  %v399_v3 = vld [vmem:[%s539_s1 + $0x30] sm:$0xff]  ;;  %v398_v6 = vld [vmem:[%s539_s1 + $0x28] sm:$0xff] }
   0x2   :  { %v408_v1 = vld [vmem:[%s539_s1 + $0x78] sm:$0xff]  ;;  %230 = vmatpush.bf16.msra.mxu0 %v400_v0  ;;  %v407_v4 = vld [vmem:[%s539_s1 + $0x70] sm:$0xff]  ;;  %v406_v7 = vld [vmem:[%s539_s1 + $0x68] sm:$0xff] }
   0x3   :  { %v416_v2 = vld [vmem:[%s539_s1 + $0xb8] sm:$0xff]  ;;  %244 = vmatpush.bf16.msra.mxu1 %v408_v1  ;;  %v415_v5 = vld [vmem:[%s539_s1 + $0xb0] sm:$0xff]  ;;  %v414_v8 = vld [vmem:[%s539_s1 + $0xa8] sm:$0xff] }
   0x4   :  { %258 = vmatpush.bf16.msra.mxu2 %v416_v2  ;;  %v397_v9 = vld [vmem:[%s539_s1 + $0x20] sm:$0xff]  ;;  %v396_v12 = vld [vmem:[%s539_s1 + $0x18] sm:$0xff]  ;;  %v395_v15 = vld [vmem:[%s539_s1 + $0x10] sm:$0xff] }
   0x5   :  { %v405_v10 = vld [vmem:[%s539_s1 + $0x60] sm:$0xff]  ;;  %v404_v13 = vld [vmem:[%s539_s1 + $0x58] sm:$0xff]  ;;  %v403_v16 = vld [vmem:[%s539_s1 + $0x50] sm:$0xff] }
   0x6   :  { %231 = vmatpush.bf16.msra.mxu0 %v399_v3  ;;  %v413_v11 = vld [vmem:[%s539_s1 + $0xa0] sm:$0xff]  ;;  %v412_v14 = vld [vmem:[%s539_s1 + $0x98] sm:$0xff]  ;;  %v411_v17 = vld [vmem:[%s539_s1 + $0x90] sm:$0xff] }
   0x7   :  { %245 = vmatpush.bf16.msra.mxu1 %v407_v4  ;;  %v394_v18 = vld [vmem:[%s539_s1 + $0x8] sm:$0xff]  ;;  %v393_v21 = vld [vmem:[%s539_s1] sm:$0xff]  ;;  %v286_v26 = vld [vmem:[%s541_s0 + $0xc] sm:$0xf0] }
   0x8   :  { %259 = vmatpush.bf16.msra.mxu2 %v415_v5  ;;  %v402_v19 = vld [vmem:[%s539_s1 + $0x48] sm:$0xff]  ;;  %v401_v22 = vld [vmem:[%s539_s1 + $0x40] sm:$0xff]  ;;  %v392_v29 = vld [vmem:[%s541_s0 + $0x10] sm:$0xf0] }
   0x9   :  { %v410_v20 = vld [vmem:[%s539_s1 + $0x88] sm:$0xff]  ;;  %v284_v23 = vld [vmem:[%s541_s0] sm:$0xf]  ;;  %v390_v25 = vld [vmem:[%s541_s0 + $0x4] sm:$0xf] }
   0xa   :  { %232 = vmatpush.bf16.msra.mxu0 %v398_v6  ;;  %v391_v24 = vld [vmem:[%s541_s0 + $0x8] sm:$0xf0]  ;;  %v409_v27 = vld [vmem:[%s539_s1 + $0x80] sm:$0xff]  ;;  %v292_v28 = vld [vmem:[%s541_s0 + $0x8] sm:$0xf]  ;;  %v289_v31 = vor.u32 %v390_v25, %v286_v26 }
   0xb   :  { %246 = vmatpush.bf16.msra.mxu1 %v406_v7  ;;  %v285_v30 = vor.u32 %v391_v24, %v284_v23  ;;  %v293_v32 = vor.u32 %v392_v29, %v292_v28  ;;  %v422_v34 = vld [vmem:[%s540_s2] ss:$0 sm:$0xff] }
   0xc   :  { %260 = vmatpush.bf16.msra.mxu2 %v414_v8 }
   0xe   :  { %233 = vmatpush.bf16.msra.mxu0 %v397_v9 }
   0xf   :  { %247 = vmatpush.bf16.msra.mxu1 %v405_v10 }
  0x10   :  { %261 = vmatpush.bf16.msra.mxu2 %v413_v11 }
  0x12   :  { %234 = vmatpush.bf16.msra.mxu0 %v396_v12 }
  0x13   :  { %248 = vmatpush.bf16.msra.mxu1 %v404_v13 }
  0x14   :  { %262 = vmatpush.bf16.msra.mxu2 %v412_v14 }
  0x16   :  { %235 = vmatpush.bf16.msra.mxu0 %v395_v15 }
  0x17   :  { %249 = vmatpush.bf16.msra.mxu1 %v403_v16 }
  0x18   :  { %263 = vmatpush.bf16.msra.mxu2 %v411_v17 }
  0x1a   :  { %236 = vmatpush.bf16.msra.mxu0 %v394_v18 }
  0x1b   :  { %250 = vmatpush.bf16.msra.mxu1 %v402_v19 }
  0x1c   :  { %264 = vmatpush.bf16.msra.mxu2 %v410_v20 }
  0x1e   :  { %237 = vmatpush.bf16.msra.mxu0 %v393_v21 }
  0x1f   :  { %251 = vmatpush.bf16.msra.mxu1 %v401_v22 }
  0x20   :  { %265 = vmatpush.bf16.msra.mxu2 %v409_v27 }
  0x21   :  { %238 = vmatmul.bf16.vlgmr.msra.gmra.mxu0 %v285_v30 }
  0x22   :  { %252 = vmatmul.bf16.vlgmr.msra.gmra.mxu1 %v289_v31 }
  0x23   :  { %266 = vmatmul.bf16.vlgmr.msra.gmra.mxu2 %v293_v32 }
  0x9e   :  { %v239_v33 = vpop.f32.mrf.mxu0 }
  0x9f   :  { %v253_v35 = vpop.f32.mrf.mxu1  ;;  %v240_v36 = vadd.f32 %v422_v34, %v239_v33 }
  0xa1   :  { %v254_v39 = vadd.f32 %v253_v35, %v240_v36 }
  0xa6   :  { %v267_v37 = vpop.f32.mrf.mxu2  ;;  %v241_v38 = vpop.f32.mrf.mxu0 }
  0xa7   :  { %v242_v40 = vadd.f32 %v422_v34, %v241_v38  ;;  %v255_v41 = vpop.f32.mrf.mxu1  ;;  %v268_v42 = vadd.f32 %v267_v37, %v254_v39 }
  0xa9   :  { %v256_v43 = vadd.f32 %v255_v41, %v242_v40  ;;  %v272_v46 = vmax.f32 %v268_v42, 0.0 }
  0xae   :  { %v269_v44 = vpop.f32.mrf.mxu2 }
  0xaf   :  { %v270_v45 = vadd.f32 %v269_v44, %v256_v43 }
  0xb1   :  { %v273_v47 = vmax.f32 %v270_v45, 0.0 }
  0xb3   :  { %v420_v48 = vpack.c.bf16 %v273_v47, %v272_v46 }
  0xb5   :  { %421 = vst [vmem:[%s542_s3] sm:$0xff] %v420_v48  }

// kernel: _forward_impl.102
= control target key start
LH: loop header
LB: loop body
LE: loop exit
PB: predicated region body
PF: predicated region fallthrough
CT: control target
= control target key end

     0   :  { %s373_s1 = inlined_call_operand.vmem [shape: bf16[128,256], index: 1, kind: input, shape index: {}]   ;;  %s374_s0 = inlined_call_operand.vmem [shape: bf16[16,128], index: 0, kind: input, shape index: {}]   ;;  %s375_s2 = inlined_call_operand.vmem [shape: f32[1,256], index: 2, kind: input, shape index: {}]   ;;  %s376_s3 = inlined_call_operand.vmem [shape: bf16[16,256], index: 3, kind: output, shape index: {}]  }
   0x1   :  { %v222_v0 = vld [vmem:[%s373_s1 + $0x70] sm:$0xf]  ;;  %v244_v1 = vld [vmem:[%s373_s1 + $0x74] sm:$0xf0]  ;;  %v243_v2 = vld [vmem:[%s373_s1 + $0x74] sm:$0xf] }
   0x2   :  { %v223_v3 = vor.u32 %v244_v1, %v222_v0  ;;  %v224_v4 = vld [vmem:[%s373_s1 + $0x78] sm:$0xf0]  ;;  %v214_v5 = vld [vmem:[%s373_s1 + $0x60] sm:$0xf]  ;;  %v242_v6 = vld [vmem:[%s373_s1 + $0x64] sm:$0xf0] }
   0x3   :  { %v227_v7 = vor.u32 %v243_v2, %v224_v4  ;;  %v241_v8 = vld [vmem:[%s373_s1 + $0x64] sm:$0xf]  ;;  %v216_v9 = vld [vmem:[%s373_s1 + $0x68] sm:$0xf0]  ;;  %v215_v10 = vor.u32 %v242_v6, %v214_v5  ;;  %v206_v12 = vld [vmem:[%s373_s1 + $0x50] sm:$0xf] }
   0x4   :  { %124 = vmatpush.bf16.msra.mxu0 %v223_v3  ;;  %v219_v11 = vor.u32 %v241_v8, %v216_v9  ;;  %v240_v13 = vld [vmem:[%s373_s1 + $0x54] sm:$0xf0]  ;;  %v239_v14 = vld [vmem:[%s373_s1 + $0x54] sm:$0xf]  ;;  %v208_v15 = vld [vmem:[%s373_s1 + $0x58] sm:$0xf0] }
   0x5   :  { %138 = vmatpush.bf16.msra.mxu1 %v227_v7  ;;  %v207_v16 = vor.u32 %v240_v13, %v206_v12  ;;  %v211_v17 = vor.u32 %v239_v14, %v208_v15  ;;  %v198_v18 = vld [vmem:[%s373_s1 + $0x40] sm:$0xf]  ;;  %v238_v19 = vld [vmem:[%s373_s1 + $0x44] sm:$0xf0]  ;;  %v237_v20 = vld [vmem:[%s373_s1 + $0x44] sm:$0xf] }
   0x6   :  { %v200_v21 = vld [vmem:[%s373_s1 + $0x48] sm:$0xf0]  ;;  %v199_v22 = vor.u32 %v238_v19, %v198_v18  ;;  %v190_v24 = vld [vmem:[%s373_s1 + $0x30] sm:$0xf]  ;;  %v236_v25 = vld [vmem:[%s373_s1 + $0x34] sm:$0xf0] }
   0x7   :  { %v203_v23 = vor.u32 %v237_v20, %v200_v21  ;;  %v235_v26 = vld [vmem:[%s373_s1 + $0x34] sm:$0xf]  ;;  %v192_v27 = vld [vmem:[%s373_s1 + $0x38] sm:$0xf0]  ;;  %v191_v28 = vor.u32 %v236_v25, %v190_v24  ;;  %v182_v30 = vld [vmem:[%s373_s1 + $0x20] sm:$0xf] }
   0x8   :  { %125 = vmatpush.bf16.msra.mxu0 %v215_v10  ;;  %v195_v29 = vor.u32 %v235_v26, %v192_v27  ;;  %v234_v31 = vld [vmem:[%s373_s1 + $0x24] sm:$0xf0]  ;;  %v233_v32 = vld [vmem:[%s373_s1 + $0x24] sm:$0xf]  ;;  %v184_v33 = vld [vmem:[%s373_s1 + $0x28] sm:$0xf0] }
   0x9   :  { %139 = vmatpush.bf16.msra.mxu1 %v219_v11  ;;  %v183_v34 = vor.u32 %v234_v31, %v182_v30  ;;  %v187_v35 = vor.u32 %v233_v32, %v184_v33  ;;  %v174_v36 = vld [vmem:[%s373_s1 + $0x10] sm:$0xf]  ;;  %v232_v37 = vld [vmem:[%s373_s1 + $0x14] sm:$0xf0]  ;;  %v231_v38 = vld [vmem:[%s373_s1 + $0x14] sm:$0xf] }
   0xa   :  { %v176_v39 = vld [vmem:[%s373_s1 + $0x18] sm:$0xf0]  ;;  %v175_v40 = vor.u32 %v232_v37, %v174_v36  ;;  %v166_v42 = vld [vmem:[%s373_s1] sm:$0xf]  ;;  %v230_v43 = vld [vmem:[%s373_s1 + $0x4] sm:$0xf0] }
   0xb   :  { %v179_v41 = vor.u32 %v231_v38, %v176_v39  ;;  %v229_v44 = vld [vmem:[%s373_s1 + $0x4] sm:$0xf]  ;;  %v168_v45 = vld [vmem:[%s373_s1 + $0x8] sm:$0xf0]  ;;  %v167_v46 = vor.u32 %v230_v43, %v166_v42  ;;  %v32_v49 = vld [vmem:[%s375_s2] sm:$0x3] }
   0xc   :  { %126 = vmatpush.bf16.msra.mxu0 %v207_v16  ;;  %v171_v47 = vor.u32 %v229_v44, %v168_v45  ;;  %v228_v48 = vld [vmem:[%s374_s0] sm:$0xff]  ;;  %v34_v50 = vperm.slane %v32_v49, 0  ;;  %v35_v51 = vperm.slane %v32_v49, 1 }
   0xd   :  { %140 = vmatpush.bf16.msra.mxu1 %v211_v17 }
  0x10   :  { %127 = vmatpush.bf16.msra.mxu0 %v199_v22 }
  0x11   :  { %141 = vmatpush.bf16.msra.mxu1 %v203_v23 }
  0x14   :  { %128 = vmatpush.bf16.msra.mxu0 %v191_v28 }
  0x15   :  { %142 = vmatpush.bf16.msra.mxu1 %v195_v29 }
  0x18   :  { %129 = vmatpush.bf16.msra.mxu0 %v183_v34 }
  0x19   :  { %143 = vmatpush.bf16.msra.mxu1 %v187_v35 }
  0x1c   :  { %130 = vmatpush.bf16.msra.mxu0 %v175_v40 }
  0x1d   :  { %144 = vmatpush.bf16.msra.mxu1 %v179_v41 }
  0x20   :  { %131 = vmatpush.bf16.msra.mxu0 %v167_v46 }
  0x21   :  { %145 = vmatpush.bf16.msra.mxu1 %v171_v47 }
  0x23   :  { %132 = vmatmul.bf16.vlgmr.msra.gmra.mxu0 %v228_v48 }
  0x24   :  { %146 = vmatmul.bf16.vlgmr.msra.gmra.mxu1 %v228_v48 }
  0xa0   :  { %v133_v52 = vpop.f32.mrf.mxu0 }
  0xa1   :  { %v134_v53 = vadd.f32 %v133_v52, %v34_v50  ;;  %v147_v54 = vpop.f32.mrf.mxu1 }
  0xa2   :  { %v148_v55 = vadd.f32 %v147_v54, %v35_v51 }
  0xa4   :  { %v152_v56 = vpack.c.bf16 %v148_v55, %v134_v53 }
  0xa6   :  { %154 = vst [vmem:[%s376_s3] sm:$0xff] %v152_v56 }
  0xa8   :  { %v135_v57 = vpop.f32.mrf.mxu0 }
  0xa9   :  { %v136_v58 = vadd.f32 %v135_v57, %v34_v50  ;;  %v149_v59 = vpop.f32.mrf.mxu1 }
  0xaa   :  { %v150_v60 = vadd.f32 %v149_v59, %v35_v51 }
  0xac   :  { %v153_v61 = vpack.c.bf16 %v150_v60, %v136_v58 }
  0xae   :  { %155 = vst [vmem:[%s376_s3 + $0x8] sm:$0xff] %v153_v61 }

// kernel: _forward_impl.101
= control target key start
LH: loop header
LB: loop body
LE: loop exit
PB: predicated region body
PF: predicated region fallthrough
CT: control target
= control target key end

     0   :  { %s1065_s12 = smov 0   ;;  %s1067_s13 = smov 0   ;;  %s1173_s0 = inlined_call_operand.vmem [shape: bf16[16,1024], index: 0, kind: input, shape index: {}]   ;;  %s1174_s1 = inlined_call_operand.vmem [shape: bf16[1024,128], index: 1, kind: input, shape index: {}]   ;;  %s1175_s2 = inlined_call_operand.vmem [shape: f32[1,128], index: 2, kind: input, shape index: {}]   ;;  %s1176_s3 = inlined_call_operand.vmem [shape: bf16[16,128], index: 3, kind: output, shape index: {}]  }
   0x1   :  { %s1069_s14 = smov 0   ;;  %s1071_s15 = smov 0  }
   0x2   :  { %s1073_s16 = smov 0  }
   0x3 LB: > { %s25_s17 = sadd.s32 1, %s1039_s15  ;;  %p48_p1 = scmp.ne.s32.totalorder %s1031_s13, %s1027_s12  ;;  %s1043_s16 = sphi %s1073_s16, %s13_s16   ;;  %s1039_s15 = sphi %s1071_s15, %s1180_s15   ;;  %s1035_s14 = sphi %s1069_s14, %s1179_s14   ;;  %s1031_s13 = sphi %s1067_s13, %s1178_s13   ;;  %s1027_s12 = sphi %s1065_s12, %s1177_s12  }
   0x4   : > { %p26_p0 = scmp.ge.s32.totalorder %s25_s17, 2  ;;  %p49_p2 = scmp.eq.s32.totalorder %s1043_s16, 0 }
   0x5   : > { %s41_s19 = sadd.s32 1, %s1031_s13  ;;  %p763_p5 = scmp.ge.s32.totalorder %s1043_s16, 2 }
   0x6   : > { %s1182_s17 = smov (%p26_p0, %s25_s17), 0  ;;  %p50_p3 = por %p49_p2, %p48_p1 }
   0x7   : > { %s37_s18 = ssub.s32 %s1039_s15, %s1182_s17  ;;  %162 = sbr.rel (%p763_p5) target bundleno = 20 (0x14), region = 20 }
   0x8   : > { %p39_p4 = scmp.eq.s32.totalorder %s37_s18, 0 }
   0xa   : > { %s1100_s20 = scalar_select %p39_p4, %s1031_s13, %s41_s19  }
   0xc   : > { %165 = sbr.rel (!%p50_p3) target bundleno = 20 (0x14), region = 24  ;;  %s167_s21 = sand.u32 (%p50_p3), 1, %s1031_s13  }
   0xd   : > { %s922_s22 = sshll.u32 (%p50_p3), %s1039_s15, 4  ;;  %s764_s23 = sshll.u32 (%p50_p3), %s167_s21, 5 }
   0xe   : > { %s175_s26 = scalar_lea.vmem (%p50_p3), %s1173_s0, %s922_s22  ;;  %s169_s27 = scalar_lea.vmem (%p50_p3), [#allocation3], %s764_s23 }
   0xf   : > { %v188_v0 = vld [vmem:[%s175_s26] sm:$0xff] (%p50_p3)  ;;  %v190_v1 = vld [vmem:[%s175_s26 + $0x8] sm:$0xff] (%p50_p3) }
  0x10   : > { %v192_v2 = vld [vmem:[%s175_s26 + $0x20] sm:$0xff] (%p50_p3)  ;;  %189 = vst [vmem:[%s169_s27] sm:$0xff] (%p50_p3), %v188_v0  ;;  %v194_v3 = vld [vmem:[%s175_s26 + $0x28] sm:$0xff] (%p50_p3) }
  0x11   : > { %191 = vst [vmem:[%s169_s27 + $0x8] sm:$0xff] %v190_v1 }
  0x12   : > { %193 = vst [vmem:[%s169_s27 + $0x10] sm:$0xff] %v192_v2 }
  0x13   : > { %195 = vst [vmem:[%s169_s27 + $0x18] sm:$0xff] %v194_v3 }
  0x14 PF: > { %p767_p6 = scmp.ge.s32.totalorder %s1043_s16, 1  ;;  %p212_p7 = scmp.lt.s32.totalorder %s1043_s16, 3 }
  0x16   : > { %p213_p8 = pnand %p767_p6, %p212_p7 }
  0x17   : > { %s769_s28 = sshll.u32 (!%p213_p8), %s1035_s14, 6  ;;  %s219_s6 = sand.u32 (!%p213_p8), 1, %s1027_s12  }
  0x18   : > { %216 = sbr.rel (%p213_p8) target bundleno = 239 (0xef), region = 51  ;;  %p259_p9 = scmp.lt.s32.totalorder (!%p213_p8), %s769_s28, 127 }
  0x19   : > { %s768_s7 = sshll.u32 (!%p213_p8), %s219_s6, 5  ;;  %p915_p10 = scmp.ne.s32.totalorder (!%p213_p8), %s1035_s14, 0 }
  0x1a   : > { %s221_s8 = scalar_lea.vmem (!%p213_p8), [#allocation3], %s768_s7 }
  0x1d   : > { %s1184_s28 = smov (!%p259_p9, %s769_s28), 127  ;;  %v773_v32 = vld [vmem:[%s221_s8] sm:$0xf]  ;;  %v925_v33 = vld [vmem:[%s221_s8 + $0xc] sm:$0xf0] }
  0x1e   : > { %s770_s29 = sshll.u32 %s1184_s28, 2  ;;  %v923_v34 = vld [vmem:[%s221_s8 + $0x4] sm:$0xf]  ;;  %v775_v39 = vld [vmem:[%s221_s8 + $0x10] sm:$0xf0]  ;;  %v774_v44 = vor.u32 %v925_v33, %v773_v32 }
  0x1f   : > { %s1114_s5 = scalar_lea.vmem %s1174_s1, %s770_s29  ;;  %v781_v40 = vld [vmem:[%s221_s8 + $0x8] sm:$0xf]  ;;  %v926_v41 = vld [vmem:[%s221_s8 + $0x14] sm:$0xf0]  ;;  %v924_v42 = vld [vmem:[%s221_s8 + $0xc] sm:$0xf]  ;;  %v778_v45 = vor.u32 %v923_v34, %v775_v39 }
  0x20   : > { %v934_v4 = vld [vmem:[%s1114_s5 + $0x38] sm:$0xff]  ;;  %v933_v8 = vld [vmem:[%s1114_s5 + $0x30] sm:$0xff]  ;;  %v932_v12 = vld [vmem:[%s1114_s5 + $0x28] sm:$0xff]  ;;  %v782_v46 = vor.u32 %v926_v41, %v781_v40 }
  0x21   : > { %v942_v5 = vld [vmem:[%s1114_s5 + $0x78] sm:$0xff]  ;;  %559 = vmatpush.bf16.msra.mxu0 %v934_v4  ;;  %v941_v9 = vld [vmem:[%s1114_s5 + $0x70] sm:$0xff]  ;;  %v940_v13 = vld [vmem:[%s1114_s5 + $0x68] sm:$0xff] }
  0x22   : > { %v950_v6 = vld [vmem:[%s1114_s5 + $0xb8] sm:$0xff]  ;;  %573 = vmatpush.bf16.msra.mxu1 %v942_v5  ;;  %v949_v10 = vld [vmem:[%s1114_s5 + $0xb0] sm:$0xff]  ;;  %v948_v14 = vld [vmem:[%s1114_s5 + $0xa8] sm:$0xff] }
  0x23   : > { %v958_v7 = vld [vmem:[%s1114_s5 + $0xf8] sm:$0xff]  ;;  %587 = vmatpush.bf16.msra.mxu2 %v950_v6  ;;  %v957_v11 = vld [vmem:[%s1114_s5 + $0xf0] sm:$0xff]  ;;  %v956_v15 = vld [vmem:[%s1114_s5 + $0xe8] sm:$0xff] }
  0x24   : > { %601 = vmatpush.bf16.msra.mxu3 %v958_v7  ;;  %v931_v16 = vld [vmem:[%s1114_s5 + $0x20] sm:$0xff]  ;;  %v930_v20 = vld [vmem:[%s1114_s5 + $0x18] sm:$0xff]  ;;  %v929_v24 = vld [vmem:[%s1114_s5 + $0x10] sm:$0xff] }
  0x25   : > { %560 = vmatpush.bf16.msra.mxu0 %v933_v8  ;;  %v939_v17 = vld [vmem:[%s1114_s5 + $0x60] sm:$0xff]  ;;  %v938_v21 = vld [vmem:[%s1114_s5 + $0x58] sm:$0xff]  ;;  %v937_v25 = vld [vmem:[%s1114_s5 + $0x50] sm:$0xff] }
  0x26   : > { %574 = vmatpush.bf16.msra.mxu1 %v941_v9  ;;  %v947_v18 = vld [vmem:[%s1114_s5 + $0xa0] sm:$0xff]  ;;  %v946_v22 = vld [vmem:[%s1114_s5 + $0x98] sm:$0xff]  ;;  %v945_v26 = vld [vmem:[%s1114_s5 + $0x90] sm:$0xff] }
  0x27   : > { %588 = vmatpush.bf16.msra.mxu2 %v949_v10  ;;  %v955_v19 = vld [vmem:[%s1114_s5 + $0xe0] sm:$0xff]  ;;  %v954_v23 = vld [vmem:[%s1114_s5 + $0xd8] sm:$0xff]  ;;  %v953_v27 = vld [vmem:[%s1114_s5 + $0xd0] sm:$0xff] }
  0x28   : > { %602 = vmatpush.bf16.msra.mxu3 %v957_v11  ;;  %v928_v28 = vld [vmem:[%s1114_s5 + $0x8] sm:$0xff]  ;;  %v927_v35 = vld [vmem:[%s1114_s5] sm:$0xff] }
  0x29   : > { %561 = vmatpush.bf16.msra.mxu0 %v932_v12  ;;  %v936_v29 = vld [vmem:[%s1114_s5 + $0x48] sm:$0xff]  ;;  %v935_v36 = vld [vmem:[%s1114_s5 + $0x40] sm:$0xff] }
  0x2a   : > { %575 = vmatpush.bf16.msra.mxu1 %v940_v13  ;;  %v944_v30 = vld [vmem:[%s1114_s5 + $0x88] sm:$0xff]  ;;  %v943_v37 = vld [vmem:[%s1114_s5 + $0x80] sm:$0xff] }
  0x2b   : > { %589 = vmatpush.bf16.msra.mxu2 %v948_v14  ;;  %v952_v31 = vld [vmem:[%s1114_s5 + $0xc8] sm:$0xff]  ;;  %v951_v38 = vld [vmem:[%s1114_s5 + $0xc0] sm:$0xff] }
  0x2c   : > { %603 = vmatpush.bf16.msra.mxu3 %v956_v15  ;;  %v783_v43 = vld [vmem:[%s221_s8 + $0x18] sm:$0xf0] }
  0x2d   : > { %562 = vmatpush.bf16.msra.mxu0 %v931_v16  ;;  %v786_v47 = vor.u32 %v924_v42, %v783_v43 }
  0x2e   : > { %576 = vmatpush.bf16.msra.mxu1 %v939_v17 }
  0x2f   : > { %590 = vmatpush.bf16.msra.mxu2 %v947_v18 }
  0x30   : > { %604 = vmatpush.bf16.msra.mxu3 %v955_v19 }
  0x31   : > { %563 = vmatpush.bf16.msra.mxu0 %v930_v20 }
  0x32   : > { %577 = vmatpush.bf16.msra.mxu1 %v938_v21 }
  0x33   : > { %591 = vmatpush.bf16.msra.mxu2 %v946_v22 }
  0x34   : > { %605 = vmatpush.bf16.msra.mxu3 %v954_v23 }
  0x35   : > { %564 = vmatpush.bf16.msra.mxu0 %v929_v24 }
  0x36   : > { %578 = vmatpush.bf16.msra.mxu1 %v937_v25 }
  0x37   : > { %592 = vmatpush.bf16.msra.mxu2 %v945_v26 }
  0x38   : > { %606 = vmatpush.bf16.msra.mxu3 %v953_v27 }
  0x39   : > { %565 = vmatpush.bf16.msra.mxu0 %v928_v28 }
  0x3a   : > { %579 = vmatpush.bf16.msra.mxu1 %v936_v29 }
  0x3b   : > { %593 = vmatpush.bf16.msra.mxu2 %v944_v30 }
  0x3c   : > { %607 = vmatpush.bf16.msra.mxu3 %v952_v31 }
  0x3d   : > { %566 = vmatpush.bf16.msra.mxu0 %v927_v35 }
  0x3e   : > { %580 = vmatpush.bf16.msra.mxu1 %v935_v36 }
  0x3f   : > { %594 = vmatpush.bf16.msra.mxu2 %v943_v37 }
  0x40   : > { %608 = vmatpush.bf16.msra.mxu3 %v951_v38  ;;  %567 = vmatmul.bf16.vlgmr.msra.gmra.mxu0 %v774_v44 }
  0x41   : > { %581 = vmatmul.bf16.vlgmr.msra.gmra.mxu1 %v778_v45 }
  0x42   : > { %595 = vmatmul.bf16.vlgmr.msra.gmra.mxu2 %v782_v46 }
  0x43   : > { %609 = vmatmul.bf16.vlgmr.msra.gmra.mxu3 %v786_v47 }
  0xbd   : > { %v568_v48 = vpop.f32.mrf.mxu0 }
  0xbe   : > { %v582_v49 = vpop.f32.mrf.mxu1 }
  0xbf   : > { %v583_v50 = vadd.f32 %v582_v49, %v568_v48 }
  0xc5   : > { %v596_v51 = vpop.f32.mrf.mxu2  ;;  %v570_v55 = vpop.f32.mrf.mxu0 }
  0xc6   : > { %v610_v52 = vpop.f32.mrf.mxu3  ;;  %v597_v53 = vadd.f32 %v596_v51, %v583_v50  ;;  %v584_v56 = vpop.f32.mrf.mxu1 }
  0xc7   : > { %v585_v57 = vadd.f32 %v584_v56, %v570_v55 }
  0xc8   : > { %v611_v54 = vadd.f32 %v610_v52, %v597_v53 }
  0xcc   : > { %618 = sbr.rel (%p915_p10) target bundleno = 211 (0xd3), region = 59 }
  0xcd   : > { %v598_v58 = vpop.f32.mrf.mxu2 }
  0xce   : > { %v599_v59 = vadd.f32 %v598_v58, %v585_v57  ;;  %v612_v60 = vpop.f32.mrf.mxu3 }
  0xd0   : > { %v613_v61 = vadd.f32 %v612_v60, %v599_v59 }
  0xd1   : > { %619 = vst [vmem:[#allocation2] sm:$0xff] %v611_v54 }
  0xd2   : > { %620 = vst [vmem:[#allocation2 + $0x8] sm:$0xff] %v613_v61 }
  0xd3 PF: > { %p916_p11 = scmp.le.s32.totalorder %s1035_s14, 0 }
  0xd5   : > { %624 = sbr.rel (%p916_p11) target bundleno = 223 (0xdf), region = 63 }
  0xda   : > { %v625_v62 = vld [vmem:[#allocation2] sm:$0xff]  ;;  %v626_v63 = vld [vmem:[#allocation2 + $0x8] sm:$0xff] }
  0xdb   : > { %v627_v0 = vadd.f32 %v625_v62, %v611_v54  ;;  %v628_v1 = vadd.f32 %v626_v63, %v613_v61 }
  0xdd   : > { %629 = vst [vmem:[#allocation2] sm:$0xff] %v627_v0 }
  0xde   : > { %630 = vst [vmem:[#allocation2 + $0x8] sm:$0xff] %v628_v1 }
  0xdf PF: > { %p917_p12 = scmp.ne.s32.totalorder %s1035_s14, 1 }
  0xe1   : > { %634 = sbr.rel (%p917_p12) target bundleno = 239 (0xef), region = 67 }
  0xe6   : > { %v635_v2 = vld [vmem:[#allocation2] sm:$0xff]  ;;  %v636_v3 = vld [vmem:[#allocation2 + $0x8] sm:$0xff] }
  0xe7   : > { %v1004_v4 = vld [vmem:[%s1175_s2] ss:$0 sm:$0xff] }
  0xe8   : > { %v641_v5 = vadd.f32 %v1004_v4, %v635_v2  ;;  %v642_v6 = vadd.f32 %v1004_v4, %v636_v3 }
  0xea   : > { %v643_v7 = vmax.f32 %v641_v5, 0.0  ;;  %v644_v8 = vmax.f32 %v642_v6, 0.0 }
  0xec   : > { %v962_v9 = vpack.c.bf16 %v644_v8, %v643_v7 }
  0xee   : > { %963 = vst [vmem:[%s1176_s3] sm:$0xff] %v962_v9  }
  0xef PF: > { %s13_s16 = sadd.s32 1, %s1043_s16   ;;  %s1177_s12 = smov %s1031_s13 }
  0xf0   : > { %p10_p13 = scmp.ge.s32.totalorder %s13_s16, 4   ;;  %s1178_s13 = smov %s1100_s20 }
  0xf1   : > { %s1179_s14 = smov %s1039_s15  ;;  %s1180_s15 = smov %s1182_s17 }
  0xf2   :  { %12 = sbr.rel (!%p10_p13) target bundleno = 3 (0x3), region = 108 }

// kernel: _forward_impl.103
= control target key start
LH: loop header
LB: loop body
LE: loop exit
PB: predicated region body
PF: predicated region fallthrough
CT: control target
= control target key end

     0   :  { %s401_s1 = inlined_call_operand.vmem [shape: bf16[128,256], index: 1, kind: input, shape index: {}]   ;;  %s402_s0 = inlined_call_operand.vmem [shape: bf16[16,128], index: 0, kind: input, shape index: {}]   ;;  %s403_s2 = inlined_call_operand.vmem [shape: f32[1,256], index: 2, kind: input, shape index: {}]   ;;  %s404_s3 = inlined_call_operand.vmem [shape: bf16[16,256], index: 3, kind: input, shape index: {}]   ;;  %s405_s4 = inlined_call_operand.vmem [shape: bf16[16,256], index: 4, kind: output, shape index: {}]  }
   0x1   :  { %v239_v0 = vld [vmem:[%s401_s1 + $0x70] sm:$0xf]  ;;  %v261_v1 = vld [vmem:[%s401_s1 + $0x74] sm:$0xf0]  ;;  %v260_v2 = vld [vmem:[%s401_s1 + $0x74] sm:$0xf] }
   0x2   :  { %v240_v3 = vor.u32 %v261_v1, %v239_v0  ;;  %v241_v4 = vld [vmem:[%s401_s1 + $0x78] sm:$0xf0]  ;;  %v231_v5 = vld [vmem:[%s401_s1 + $0x60] sm:$0xf]  ;;  %v259_v6 = vld [vmem:[%s401_s1 + $0x64] sm:$0xf0] }
   0x3   :  { %v244_v7 = vor.u32 %v260_v2, %v241_v4  ;;  %v258_v8 = vld [vmem:[%s401_s1 + $0x64] sm:$0xf]  ;;  %v233_v9 = vld [vmem:[%s401_s1 + $0x68] sm:$0xf0]  ;;  %v232_v10 = vor.u32 %v259_v6, %v231_v5  ;;  %v223_v12 = vld [vmem:[%s401_s1 + $0x50] sm:$0xf] }
   0x4   :  { %127 = vmatpush.bf16.msra.mxu0 %v240_v3  ;;  %v236_v11 = vor.u32 %v258_v8, %v233_v9  ;;  %v257_v13 = vld [vmem:[%s401_s1 + $0x54] sm:$0xf0]  ;;  %v256_v14 = vld [vmem:[%s401_s1 + $0x54] sm:$0xf]  ;;  %v225_v15 = vld [vmem:[%s401_s1 + $0x58] sm:$0xf0] }
   0x5   :  { %141 = vmatpush.bf16.msra.mxu1 %v244_v7  ;;  %v224_v16 = vor.u32 %v257_v13, %v223_v12  ;;  %v228_v17 = vor.u32 %v256_v14, %v225_v15  ;;  %v215_v18 = vld [vmem:[%s401_s1 + $0x40] sm:$0xf]  ;;  %v255_v19 = vld [vmem:[%s401_s1 + $0x44] sm:$0xf0]  ;;  %v254_v20 = vld [vmem:[%s401_s1 + $0x44] sm:$0xf] }
   0x6   :  { %v217_v21 = vld [vmem:[%s401_s1 + $0x48] sm:$0xf0]  ;;  %v216_v22 = vor.u32 %v255_v19, %v215_v18  ;;  %v207_v24 = vld [vmem:[%s401_s1 + $0x30] sm:$0xf]  ;;  %v253_v25 = vld [vmem:[%s401_s1 + $0x34] sm:$0xf0] }
   0x7   :  { %v220_v23 = vor.u32 %v254_v20, %v217_v21  ;;  %v252_v26 = vld [vmem:[%s401_s1 + $0x34] sm:$0xf]  ;;  %v209_v27 = vld [vmem:[%s401_s1 + $0x38] sm:$0xf0]  ;;  %v208_v28 = vor.u32 %v253_v25, %v207_v24  ;;  %v199_v30 = vld [vmem:[%s401_s1 + $0x20] sm:$0xf] }
   0x8   :  { %128 = vmatpush.bf16.msra.mxu0 %v232_v10  ;;  %v212_v29 = vor.u32 %v252_v26, %v209_v27  ;;  %v251_v31 = vld [vmem:[%s401_s1 + $0x24] sm:$0xf0]  ;;  %v250_v32 = vld [vmem:[%s401_s1 + $0x24] sm:$0xf]  ;;  %v201_v33 = vld [vmem:[%s401_s1 + $0x28] sm:$0xf0] }
   0x9   :  { %142 = vmatpush.bf16.msra.mxu1 %v236_v11  ;;  %v200_v34 = vor.u32 %v251_v31, %v199_v30  ;;  %v204_v35 = vor.u32 %v250_v32, %v201_v33  ;;  %v191_v36 = vld [vmem:[%s401_s1 + $0x10] sm:$0xf]  ;;  %v249_v37 = vld [vmem:[%s401_s1 + $0x14] sm:$0xf0]  ;;  %v248_v38 = vld [vmem:[%s401_s1 + $0x14] sm:$0xf] }
   0xa   :  { %v193_v39 = vld [vmem:[%s401_s1 + $0x18] sm:$0xf0]  ;;  %v192_v40 = vor.u32 %v249_v37, %v191_v36  ;;  %v183_v42 = vld [vmem:[%s401_s1] sm:$0xf]  ;;  %v247_v43 = vld [vmem:[%s401_s1 + $0x4] sm:$0xf0] }
   0xb   :  { %v196_v41 = vor.u32 %v248_v38, %v193_v39  ;;  %v246_v44 = vld [vmem:[%s401_s1 + $0x4] sm:$0xf]  ;;  %v185_v45 = vld [vmem:[%s401_s1 + $0x8] sm:$0xf0]  ;;  %v184_v46 = vor.u32 %v247_v43, %v183_v42  ;;  %v35_v49 = vld [vmem:[%s403_s2] sm:$0x3] }
   0xc   :  { %129 = vmatpush.bf16.msra.mxu0 %v224_v16  ;;  %v188_v47 = vor.u32 %v246_v44, %v185_v45  ;;  %v245_v48 = vld [vmem:[%s402_s0] sm:$0xff]  ;;  %v37_v51 = vperm.slane %v35_v49, 0  ;;  %v38_v52 = vperm.slane %v35_v49, 1  ;;  %v156_v61 = vld [vmem:[%s404_s3 + $0x8] sm:$0xff] }
   0xd   :  { %143 = vmatpush.bf16.msra.mxu1 %v228_v17  ;;  %v155_v50 = vld [vmem:[%s404_s3] sm:$0xff]  ;;  %v159_v0 = vunpack.c.l.bf16 %v156_v61  ;;  %v160_v3 = vunpack.c.h.bf16 %v156_v61 }
   0xe   :  { %v157_v53 = vunpack.c.l.bf16 %v155_v50  ;;  %v158_v55 = vunpack.c.h.bf16 %v155_v50 }
  0x10   :  { %130 = vmatpush.bf16.msra.mxu0 %v216_v22 }
  0x11   :  { %144 = vmatpush.bf16.msra.mxu1 %v220_v23 }
  0x14   :  { %131 = vmatpush.bf16.msra.mxu0 %v208_v28 }
  0x15   :  { %145 = vmatpush.bf16.msra.mxu1 %v212_v29 }
  0x18   :  { %132 = vmatpush.bf16.msra.mxu0 %v200_v34 }
  0x19   :  { %146 = vmatpush.bf16.msra.mxu1 %v204_v35 }
  0x1c   :  { %133 = vmatpush.bf16.msra.mxu0 %v192_v40 }
  0x1d   :  { %147 = vmatpush.bf16.msra.mxu1 %v196_v41 }
  0x20   :  { %134 = vmatpush.bf16.msra.mxu0 %v184_v46 }
  0x21   :  { %148 = vmatpush.bf16.msra.mxu1 %v188_v47 }
  0x23   :  { %135 = vmatmul.bf16.vlgmr.msra.gmra.mxu0 %v245_v48 }
  0x24   :  { %149 = vmatmul.bf16.vlgmr.msra.gmra.mxu1 %v245_v48 }
  0xa0   :  { %v136_v54 = vpop.f32.mrf.mxu0 }
  0xa1   :  { %v137_v56 = vadd.f32 %v136_v54, %v37_v51  ;;  %v150_v57 = vpop.f32.mrf.mxu1 }
  0xa2   :  { %v151_v58 = vadd.f32 %v150_v57, %v38_v52 }
  0xa3   :  { %v161_v59 = vadd.f32 %v157_v53, %v137_v56 }
  0xa4   :  { %v162_v60 = vadd.f32 %v158_v55, %v151_v58 }
  0xa5   :  { %v165_v62 = vmax.f32 %v161_v59, 0.0 }
  0xa6   :  { %v166_v63 = vmax.f32 %v162_v60, 0.0 }
  0xa8   :  { %v169_v1 = vpack.c.bf16 %v166_v63, %v165_v62  ;;  %v138_v2 = vpop.f32.mrf.mxu0 }
  0xa9   :  { %v139_v4 = vadd.f32 %v138_v2, %v37_v51  ;;  %v152_v5 = vpop.f32.mrf.mxu1 }
  0xaa   :  { %171 = vst [vmem:[%s405_s4] sm:$0xff] %v169_v1  ;;  %v153_v6 = vadd.f32 %v152_v5, %v38_v52 }
  0xab   :  { %v163_v7 = vadd.f32 %v159_v0, %v139_v4 }
  0xac   :  { %v164_v8 = vadd.f32 %v160_v3, %v153_v6 }
  0xad   :  { %v167_v9 = vmax.f32 %v163_v7, 0.0 }
  0xae   :  { %v168_v10 = vmax.f32 %v164_v8, 0.0 }
  0xb0   :  { %v170_v11 = vpack.c.bf16 %v168_v10, %v167_v9 }
  0xb2   :  { %172 = vst [vmem:[%s405_s4 + $0x8] sm:$0xff] %v170_v11 }

// kernel: _forward_impl.110
= control target key start
LH: loop header
LB: loop body
LE: loop exit
PB: predicated region body
PF: predicated region fallthrough
CT: control target
= control target key end

     0   :  { %vm30_vm0 = vcmask 1040384   ;;  %vm49_vm1 = vcmask 1041409   ;;  %s86_s0 = inlined_call_operand.vmem [shape: bf16[2,1,256], index: 0, kind: input, shape index: {}]   ;;  %s87_s1 = inlined_call_operand.vmem [shape: bf16[2,256], index: 1, kind: output, shape index: {}]  }
   0x1   :  { %v9_v0 = vld [vmem:[%s86_s0 + $0x2] sm:$0x3]  ;;  %v8_v1 = vld [vmem:[%s86_s0] sm:$0x3] }
   0x2   :  { %v11_v2 = vunpack.c.l.bf16 %v9_v0  ;;  %v10_v3 = vunpack.c.l.bf16 %v8_v1 }
   0x4   :  { %v18_v4 = vperm.slane %v11_v2, 0  ;;  %v19_v5 = vperm.slane %v11_v2, 2  ;;  %v16_v6 = vperm.slane %v10_v3, 0  ;;  %v17_v7 = vperm.slane %v10_v3, 2 }
   0x6   :  { %v25_v8 = vpack.c.bf16 %v19_v5, %v18_v4  ;;  %v24_v9 = vpack.c.bf16 %v17_v7, %v16_v6 }
   0x8   :  { %v29_v10 = vrot.slane %v25_v8, 3  ;;  %v28_v11 = vrot.slane %v24_v9, 3 }
   0xa   :  { %v36_v12 = vsel %vm30_vm0, %v25_v8, %v29_v10  ;;  %v33_v13 = vsel %vm30_vm0, %v24_v9, %v28_v11 }
   0xb   :  { %41 = vst [vmem:[#allocation1 + $0x20] ss:$4 sm:$0xff] %v36_v12 }
   0xc   :  { %37 = vst [vmem:[#allocation1] ss:$4 sm:$0xff] %v33_v13 }
  0x12   :  { %v42_v14 = vld [vmem:[#allocation1 + $0x20] sm:$0xff] }
  0x13   :  { %v38_v15 = vld [vmem:[#allocation1] sm:$0xff]  ;;  %v46_v16 = vunpack.c.l.b16 %v42_v14  ;;  %v47_v17 = vunpack.c.h.b16 %v42_v14 }
  0x14   :  { %v44_v18 = vunpack.c.l.b16 %v38_v15  ;;  %v45_v19 = vunpack.c.h.b16 %v38_v15 }
  0x15   :  { %v48_v20 = vrot.slane %v46_v16, 7  ;;  %v51_v21 = vrot.slane %v47_v17, 7 }
  0x17   :  { %v50_v22 = vsel %vm49_vm1, %v48_v20, %v44_v18  ;;  %v52_v23 = vsel %vm49_vm1, %v51_v21, %v45_v19 }
  0x18   :  { %v53_v24 = vpack.c.b16 %v52_v23, %v50_v22 }
  0x1a   :  { %v54_v25 = vrot.slane %v53_v24, 3 }
  0x1c   :  { %v57_v26 = vsel %vm30_vm0, %v53_v24, %v54_v25 }
  0x1d   :  { %59 = vst [vmem:[%s87_s1] sm:$0x3] %v57_v26 }

// kernel: _forward_impl.111
= control target key start
LH: loop header
LB: loop body
LE: loop exit
PB: predicated region body
PF: predicated region fallthrough
CT: control target
= control target key end

     0   :  { %s1073_s12 = smov 0   ;;  %s1075_s13 = smov 0   ;;  %s1299_s0 = inlined_call_operand.vmem [shape: bf16[16,256], index: 0, kind: input, shape index: {}]   ;;  %s1300_s1 = inlined_call_operand.vmem [shape: bf16[256,1024], index: 1, kind: input, shape index: {}]   ;;  %s1301_s2 = inlined_call_operand.vmem [shape: f32[1,1024], index: 2, kind: input, shape index: {}]   ;;  %s1302_s3 = inlined_call_operand.vmem [shape: f32[16,1024], index: 3, kind: output, shape index: {}]  }
   0x1   :  { %s1077_s14 = smov 0   ;;  %s1079_s15 = smov 0  }
   0x2   :  { %s1081_s16 = smov 0  }
   0x3 LB: > { %s22_s17 = sadd.s32 1, %s1047_s15  ;;  %s784_s18 = sadd.s32 4294967295, %s1051_s16   ;;  %s1051_s16 = sphi %s1081_s16, %s13_s16   ;;  %s1047_s15 = sphi %s1079_s15, %s1307_s15   ;;  %s1043_s14 = sphi %s1077_s14, %s1306_s14   ;;  %s1039_s13 = sphi %s1075_s13, %s1305_s13   ;;  %s1035_s12 = sphi %s1073_s12, %s1304_s12  }
   0x4   : > { %p23_p0 = scmp.ge.s32.totalorder %s22_s17, 4  ;;  %p65_p1 = scmp.ne.s32.totalorder %s1039_s13, %s1035_s12 }
   0x5   : > { %p66_p2 = scmp.eq.s32.totalorder %s1051_s16, 0  ;;  %p123_p4 = scmp.eq.s32.totalorder %s784_s18, 3 }
   0x6   : > { %s1309_s17 = smov (%p23_p0, %s22_s17), 0  ;;  %s58_s20 = sadd.s32 1, %s1039_s13 }
   0x7   : > { %p67_p3 = por %p66_p2, %p65_p1  ;;  %s55_s19 = ssub.s32 %s1047_s15, %s1309_s17 }
   0x8   : > { %p56_p5 = scmp.eq.s32.totalorder %s55_s19, 0  ;;  %p1108_p6 = por %p123_p4, %p65_p1 }
   0x9   : > { %p788_p7 = scmp.ge.s32.totalorder %s1051_s16, 4 }
   0xa   : > { %s1113_s22 = scalar_select %p56_p5, %s1039_s13, %s58_s20  }
   0xb   : > { %155 = sbr.rel (%p788_p7) target bundleno = 52 (0x34), region = 20 }
  0x10   : > { %158 = sbr.rel (!%p67_p3) target bundleno = 52 (0x34), region = 24  ;;  %s160_s23 = sand.u32 (%p67_p3), 1, %s1039_s13  }
  0x11   : > { %s937_s24 = sshll.u32 (%p67_p3), %s1047_s15, 3  ;;  %s789_s25 = sshll.u32 (%p67_p3), %s160_s23, 8 }
  0x12   : > { %s1121_s28 = scalar_lea.vmem (%p67_p3), %s1300_s1, %s937_s24  ;;  %s1126_s29 = scalar_lea.vmem (%p67_p3), [#allocation2], %s789_s25 }
  0x13   : > { %v256_v0 = vld [vmem:[%s1121_s28] sm:$0xff] (%p67_p3) }
  0x14   : > { %v258_v1 = vld [vmem:[%s1121_s28 + $0x20] sm:$0xff] (%p67_p3)  ;;  %257 = vst [vmem:[%s1126_s29] sm:$0xff] (%p67_p3), %v256_v0 }
  0x15   : > { %v260_v2 = vld [vmem:[%s1121_s28 + $0x40] sm:$0xff]  ;;  %259 = vst [vmem:[%s1126_s29 + $0x8] sm:$0xff] %v258_v1 }
  0x16   : > { %v262_v3 = vld [vmem:[%s1121_s28 + $0x60] sm:$0xff]  ;;  %261 = vst [vmem:[%s1126_s29 + $0x10] sm:$0xff] %v260_v2 }
  0x17   : > { %v264_v4 = vld [vmem:[%s1121_s28 + $0x80] sm:$0xff]  ;;  %263 = vst [vmem:[%s1126_s29 + $0x18] sm:$0xff] %v262_v3 }
  0x18   : > { %v266_v5 = vld [vmem:[%s1121_s28 + $0xa0] sm:$0xff]  ;;  %265 = vst [vmem:[%s1126_s29 + $0x20] sm:$0xff] %v264_v4 }
  0x19   : > { %v268_v6 = vld [vmem:[%s1121_s28 + $0xc0] sm:$0xff]  ;;  %267 = vst [vmem:[%s1126_s29 + $0x28] sm:$0xff] %v266_v5 }
  0x1a   : > { %v270_v7 = vld [vmem:[%s1121_s28 + $0xe0] sm:$0xff]  ;;  %269 = vst [vmem:[%s1126_s29 + $0x30] sm:$0xff] %v268_v6 }
  0x1b   : > { %v272_v8 = vld [vmem:[%s1121_s28 + $0x100] sm:$0xff]  ;;  %271 = vst [vmem:[%s1126_s29 + $0x38] sm:$0xff] %v270_v7 }
  0x1c   : > { %v274_v9 = vld [vmem:[%s1121_s28 + $0x120] sm:$0xff]  ;;  %273 = vst [vmem:[%s1126_s29 + $0x40] sm:$0xff] %v272_v8 }
  0x1d   : > { %v276_v10 = vld [vmem:[%s1121_s28 + $0x140] sm:$0xff]  ;;  %275 = vst [vmem:[%s1126_s29 + $0x48] sm:$0xff] %v274_v9 }
  0x1e   : > { %v278_v11 = vld [vmem:[%s1121_s28 + $0x160] sm:$0xff]  ;;  %277 = vst [vmem:[%s1126_s29 + $0x50] sm:$0xff] %v276_v10 }
  0x1f   : > { %v280_v12 = vld [vmem:[%s1121_s28 + $0x180] sm:$0xff]  ;;  %279 = vst [vmem:[%s1126_s29 + $0x58] sm:$0xff] %v278_v11 }
  0x20   : > { %v282_v13 = vld [vmem:[%s1121_s28 + $0x1a0] sm:$0xff]  ;;  %281 = vst [vmem:[%s1126_s29 + $0x60] sm:$0xff] %v280_v12 }
  0x21   : > { %v284_v14 = vld [vmem:[%s1121_s28 + $0x1c0] sm:$0xff]  ;;  %283 = vst [vmem:[%s1126_s29 + $0x68] sm:$0xff] %v282_v13 }
  0x22   : > { %v286_v15 = vld [vmem:[%s1121_s28 + $0x1e0] sm:$0xff]  ;;  %285 = vst [vmem:[%s1126_s29 + $0x70] sm:$0xff] %v284_v14 }
  0x23   : > { %v288_v16 = vld [vmem:[%s1121_s28 + $0x200] sm:$0xff]  ;;  %287 = vst [vmem:[%s1126_s29 + $0x78] sm:$0xff] %v286_v15 }
  0x24   : > { %v290_v17 = vld [vmem:[%s1121_s28 + $0x220] sm:$0xff]  ;;  %289 = vst [vmem:[%s1126_s29 + $0x80] sm:$0xff] %v288_v16 }
  0x25   : > { %v292_v18 = vld [vmem:[%s1121_s28 + $0x240] sm:$0xff]  ;;  %291 = vst [vmem:[%s1126_s29 + $0x88] sm:$0xff] %v290_v17 }
  0x26   : > { %v294_v19 = vld [vmem:[%s1121_s28 + $0x260] sm:$0xff]  ;;  %293 = vst [vmem:[%s1126_s29 + $0x90] sm:$0xff] %v292_v18 }
  0x27   : > { %v296_v20 = vld [vmem:[%s1121_s28 + $0x280] sm:$0xff]  ;;  %295 = vst [vmem:[%s1126_s29 + $0x98] sm:$0xff] %v294_v19 }
  0x28   : > { %v298_v21 = vld [vmem:[%s1121_s28 + $0x2a0] sm:$0xff]  ;;  %297 = vst [vmem:[%s1126_s29 + $0xa0] sm:$0xff] %v296_v20 }
  0x29   : > { %v300_v22 = vld [vmem:[%s1121_s28 + $0x2c0] sm:$0xff]  ;;  %299 = vst [vmem:[%s1126_s29 + $0xa8] sm:$0xff] %v298_v21 }
  0x2a   : > { %v302_v23 = vld [vmem:[%s1121_s28 + $0x2e0] sm:$0xff]  ;;  %301 = vst [vmem:[%s1126_s29 + $0xb0] sm:$0xff] %v300_v22 }
  0x2b   : > { %v304_v24 = vld [vmem:[%s1121_s28 + $0x300] sm:$0xff]  ;;  %303 = vst [vmem:[%s1126_s29 + $0xb8] sm:$0xff] %v302_v23 }
  0x2c   : > { %v306_v25 = vld [vmem:[%s1121_s28 + $0x320] sm:$0xff]  ;;  %305 = vst [vmem:[%s1126_s29 + $0xc0] sm:$0xff] %v304_v24 }
  0x2d   : > { %v308_v26 = vld [vmem:[%s1121_s28 + $0x340] sm:$0xff]  ;;  %307 = vst [vmem:[%s1126_s29 + $0xc8] sm:$0xff] %v306_v25 }
  0x2e   : > { %v310_v27 = vld [vmem:[%s1121_s28 + $0x360] sm:$0xff]  ;;  %309 = vst [vmem:[%s1126_s29 + $0xd0] sm:$0xff] %v308_v26 }
  0x2f   : > { %v312_v28 = vld [vmem:[%s1121_s28 + $0x380] sm:$0xff]  ;;  %311 = vst [vmem:[%s1126_s29 + $0xd8] sm:$0xff] %v310_v27 }
  0x30   : > { %v314_v29 = vld [vmem:[%s1121_s28 + $0x3a0] sm:$0xff]  ;;  %313 = vst [vmem:[%s1126_s29 + $0xe0] sm:$0xff] %v312_v28 }
  0x31   : > { %v316_v30 = vld [vmem:[%s1121_s28 + $0x3c0] sm:$0xff]  ;;  %315 = vst [vmem:[%s1126_s29 + $0xe8] sm:$0xff] %v314_v29 }
  0x32   : > { %v318_v31 = vld [vmem:[%s1121_s28 + $0x3e0] sm:$0xff]  ;;  %317 = vst [vmem:[%s1126_s29 + $0xf0] sm:$0xff] %v316_v30 }
  0x33   : > { %319 = vst [vmem:[%s1126_s29 + $0xf8] sm:$0xff] %v318_v31 }
  0x34 PF: > { %p792_p8 = scmp.ge.s32.totalorder %s1051_s16, 1  ;;  %p332_p9 = scmp.lt.s32.totalorder %s1051_s16, 5 }
  0x36   : > { %p333_p10 = pnand %p792_p8, %p332_p9 }
  0x37   : > { %s339_s30 = sand.u32 (!%p333_p10), 1, %s1035_s12   ;;  %s795_s20 = sshll.u32 (!%p333_p10), %s1043_s14, 1 }
  0x38   : > { %336 = sbr.rel (%p333_p10) target bundleno = 249 (0xf9), region = 66  ;;  %s793_s4 = sshll.u32 (!%p333_p10), %s339_s30, 8 }
  0x39   : > { %s1194_s5 = scalar_lea.vmem (!%p333_p10), [#allocation2], %s793_s4  ;;  %p380_p11 = scmp.lt.s32.totalorder (!%p333_p10), %s795_s20, 7 }
  0x3a   : > { %s794_s26 = sshll.u32 (!%p333_p10), %s339_s30, 5 }
  0x3b   : > { %s370_s27 = scalar_lea.vmem (!%p333_p10), [#allocation3], %s794_s26 }
  0x3d   : > { %v862_v32 = vld [vmem:[%s1194_s5 + $0x70] sm:$0xf]  ;;  %v955_v33 = vld [vmem:[%s1194_s5 + $0x74] sm:$0xf0]  ;;  %v954_v37 = vld [vmem:[%s1194_s5 + $0x74] sm:$0xf] }
  0x3e   : > { %v926_v34 = vld [vmem:[%s1194_s5 + $0xf0] sm:$0xf]  ;;  %v863_v35 = vor.u32 %v955_v33, %v862_v32  ;;  %v971_v36 = vld [vmem:[%s1194_s5 + $0xf4] sm:$0xf0]  ;;  %v864_v38 = vld [vmem:[%s1194_s5 + $0x78] sm:$0xf0] }
  0x3f   : > { %v927_v39 = vor.u32 %v971_v36, %v926_v34  ;;  %v867_v40 = vor.u32 %v954_v37, %v864_v38  ;;  %v970_v41 = vld [vmem:[%s1194_s5 + $0xf4] sm:$0xf]  ;;  %v928_v42 = vld [vmem:[%s1194_s5 + $0xf8] sm:$0xf0]  ;;  %v854_v43 = vld [vmem:[%s1194_s5 + $0x60] sm:$0xf] }
  0x40   : > { %596 = vmatpush.bf16.msra.mxu0 %v863_v35  ;;  %v931_v44 = vor.u32 %v970_v41, %v928_v42  ;;  %v953_v45 = vld [vmem:[%s1194_s5 + $0x64] sm:$0xf0]  ;;  %v918_v46 = vld [vmem:[%s1194_s5 + $0xe0] sm:$0xf]  ;;  %v952_v50 = vld [vmem:[%s1194_s5 + $0x64] sm:$0xf] }
  0x41   : > { %v969_v47 = vld [vmem:[%s1194_s5 + $0xe4] sm:$0xf0]  ;;  %610 = vmatpush.bf16.msra.mxu1 %v927_v39  ;;  %624 = vmatpush.bf16.msra.mxu2 %v867_v40  ;;  %v855_v48 = vor.u32 %v953_v45, %v854_v43  ;;  %v856_v51 = vld [vmem:[%s1194_s5 + $0x68] sm:$0xf0]  ;;  %v968_v52 = vld [vmem:[%s1194_s5 + $0xe4] sm:$0xf] }
  0x42   : > { %v919_v49 = vor.u32 %v969_v47, %v918_v46  ;;  %638 = vmatpush.bf16.msra.mxu3 %v931_v44  ;;  %v859_v53 = vor.u32 %v952_v50, %v856_v51  ;;  %v920_v54 = vld [vmem:[%s1194_s5 + $0xe8] sm:$0xf0]  ;;  %v846_v55 = vld [vmem:[%s1194_s5 + $0x50] sm:$0xf]  ;;  %v951_v56 = vld [vmem:[%s1194_s5 + $0x54] sm:$0xf0] }
  0x43   : > { %v923_v57 = vor.u32 %v968_v52, %v920_v54  ;;  %v910_v58 = vld [vmem:[%s1194_s5 + $0xd0] sm:$0xf]  ;;  %v967_v59 = vld [vmem:[%s1194_s5 + $0xd4] sm:$0xf0]  ;;  %v950_v60 = vld [vmem:[%s1194_s5 + $0x54] sm:$0xf]  ;;  %v847_v61 = vor.u32 %v951_v56, %v846_v55 }
  0x44   : > { %597 = vmatpush.bf16.msra.mxu0 %v855_v48  ;;  %v848_v62 = vld [vmem:[%s1194_s5 + $0x58] sm:$0xf0]  ;;  %v966_v63 = vld [vmem:[%s1194_s5 + $0xd4] sm:$0xf]  ;;  %v911_v1 = vor.u32 %v967_v59, %v910_v58  ;;  %v838_v3 = vld [vmem:[%s1194_s5 + $0x40] sm:$0xf] }
  0x45   : > { %v912_v0 = vld [vmem:[%s1194_s5 + $0xd8] sm:$0xf0]  ;;  %611 = vmatpush.bf16.msra.mxu1 %v919_v49  ;;  %625 = vmatpush.bf16.msra.mxu2 %v859_v53  ;;  %v851_v2 = vor.u32 %v950_v60, %v848_v62  ;;  %v949_v4 = vld [vmem:[%s1194_s5 + $0x44] sm:$0xf0]  ;;  %v902_v5 = vld [vmem:[%s1194_s5 + $0xc0] sm:$0xf] }
  0x46   : > { %639 = vmatpush.bf16.msra.mxu3 %v923_v57  ;;  %v915_v6 = vor.u32 %v966_v63, %v912_v0  ;;  %v965_v7 = vld [vmem:[%s1194_s5 + $0xc4] sm:$0xf0]  ;;  %v948_v8 = vld [vmem:[%s1194_s5 + $0x44] sm:$0xf]  ;;  %v840_v9 = vld [vmem:[%s1194_s5 + $0x48] sm:$0xf0]  ;;  %v839_v12 = vor.u32 %v949_v4, %v838_v3 }
  0x47   : > { %v964_v10 = vld [vmem:[%s1194_s5 + $0xc4] sm:$0xf]  ;;  %v904_v11 = vld [vmem:[%s1194_s5 + $0xc8] sm:$0xf0]  ;;  %v903_v13 = vor.u32 %v965_v7, %v902_v5  ;;  %v843_v14 = vor.u32 %v948_v8, %v840_v9  ;;  %v830_v15 = vld [vmem:[%s1194_s5 + $0x30] sm:$0xf] }
  0x48   : > { %598 = vmatpush.bf16.msra.mxu0 %v847_v61  ;;  %v947_v16 = vld [vmem:[%s1194_s5 + $0x34] sm:$0xf0]  ;;  %v894_v17 = vld [vmem:[%s1194_s5 + $0xb0] sm:$0xf]  ;;  %v907_v18 = vor.u32 %v964_v10, %v904_v11  ;;  %v946_v20 = vld [vmem:[%s1194_s5 + $0x34] sm:$0xf] }
  0x49   : > { %612 = vmatpush.bf16.msra.mxu1 %v911_v1  ;;  %626 = vmatpush.bf16.msra.mxu2 %v851_v2  ;;  %v963_v19 = vld [vmem:[%s1194_s5 + $0xb4] sm:$0xf0]  ;;  %v832_v21 = vld [vmem:[%s1194_s5 + $0x38] sm:$0xf0]  ;;  %v962_v22 = vld [vmem:[%s1194_s5 + $0xb4] sm:$0xf]  ;;  %v831_v24 = vor.u32 %v947_v16, %v830_v15 }
  0x4a   : > { %640 = vmatpush.bf16.msra.mxu3 %v915_v6  ;;  %v896_v23 = vld [vmem:[%s1194_s5 + $0xb8] sm:$0xf0]  ;;  %v895_v25 = vor.u32 %v963_v19, %v894_v17  ;;  %v835_v26 = vor.u32 %v946_v20, %v832_v21  ;;  %v822_v27 = vld [vmem:[%s1194_s5 + $0x20] sm:$0xf]  ;;  %v945_v28 = vld [vmem:[%s1194_s5 + $0x24] sm:$0xf0] }
  0x4b   : > { %v886_v29 = vld [vmem:[%s1194_s5 + $0xa0] sm:$0xf]  ;;  %v899_v30 = vor.u32 %v962_v22, %v896_v23  ;;  %v961_v31 = vld [vmem:[%s1194_s5 + $0xa4] sm:$0xf0]  ;;  %v944_v32 = vld [vmem:[%s1194_s5 + $0x24] sm:$0xf]  ;;  %v823_v36 = vor.u32 %v945_v28, %v822_v27 }
  0x4c   : > { %599 = vmatpush.bf16.msra.mxu0 %v839_v12  ;;  %v824_v33 = vld [vmem:[%s1194_s5 + $0x28] sm:$0xf0]  ;;  %v960_v34 = vld [vmem:[%s1194_s5 + $0xa4] sm:$0xf]  ;;  %v887_v37 = vor.u32 %v961_v31, %v886_v29  ;;  %v814_v39 = vld [vmem:[%s1194_s5 + $0x10] sm:$0xf] }
  0x4d   : > { %613 = vmatpush.bf16.msra.mxu1 %v903_v13  ;;  %627 = vmatpush.bf16.msra.mxu2 %v843_v14  ;;  %v888_v35 = vld [vmem:[%s1194_s5 + $0xa8] sm:$0xf0]  ;;  %v827_v38 = vor.u32 %v944_v32, %v824_v33  ;;  %v943_v40 = vld [vmem:[%s1194_s5 + $0x14] sm:$0xf0]  ;;  %v878_v41 = vld [vmem:[%s1194_s5 + $0x90] sm:$0xf] }
  0x4e   : > { %641 = vmatpush.bf16.msra.mxu3 %v907_v18  ;;  %v891_v42 = vor.u32 %v960_v34, %v888_v35  ;;  %v959_v43 = vld [vmem:[%s1194_s5 + $0x94] sm:$0xf0]  ;;  %v942_v44 = vld [vmem:[%s1194_s5 + $0x14] sm:$0xf]  ;;  %v816_v45 = vld [vmem:[%s1194_s5 + $0x18] sm:$0xf0]  ;;  %v815_v48 = vor.u32 %v943_v40, %v814_v39 }
  0x4f   : > { %v958_v46 = vld [vmem:[%s1194_s5 + $0x94] sm:$0xf]  ;;  %v880_v47 = vld [vmem:[%s1194_s5 + $0x98] sm:$0xf0]  ;;  %v879_v49 = vor.u32 %v959_v43, %v878_v41  ;;  %v819_v50 = vor.u32 %v942_v44, %v816_v45  ;;  %v806_v51 = vld [vmem:[%s1194_s5] sm:$0xf] }
  0x50   : > { %600 = vmatpush.bf16.msra.mxu0 %v831_v24  ;;  %v941_v52 = vld [vmem:[%s1194_s5 + $0x4] sm:$0xf0]  ;;  %v870_v53 = vld [vmem:[%s1194_s5 + $0x80] sm:$0xf]  ;;  %v883_v54 = vor.u32 %v958_v46, %v880_v47  ;;  %v940_v56 = vld [vmem:[%s1194_s5 + $0x4] sm:$0xf] }
  0x51   : > { %614 = vmatpush.bf16.msra.mxu1 %v895_v25  ;;  %628 = vmatpush.bf16.msra.mxu2 %v835_v26  ;;  %v957_v55 = vld [vmem:[%s1194_s5 + $0x84] sm:$0xf0]  ;;  %v808_v57 = vld [vmem:[%s1194_s5 + $0x8] sm:$0xf0]  ;;  %v956_v58 = vld [vmem:[%s1194_s5 + $0x84] sm:$0xf]  ;;  %v807_v60 = vor.u32 %v941_v52, %v806_v51 }
  0x52   : > { %642 = vmatpush.bf16.msra.mxu3 %v899_v30  ;;  %v872_v59 = vld [vmem:[%s1194_s5 + $0x88] sm:$0xf0]  ;;  %v798_v61 = vld [vmem:[%s1299_s0] sm:$0xf]  ;;  %v939_v62 = vld [vmem:[%s1299_s0 + $0x4] sm:$0xf0]  ;;  %v871_v63 = vor.u32 %v957_v55, %v870_v53  ;;  %v811_v0 = vor.u32 %v940_v56, %v808_v57 }
  0x53   : > { %v938_v1 = vld [vmem:[%s1299_s0 + $0x4] sm:$0xf]  ;;  %v800_v2 = vld [vmem:[%s1299_s0 + $0x8] sm:$0xf0]  ;;  %v875_v3 = vor.u32 %v956_v58, %v872_v59  ;;  %v799_v4 = vor.u32 %v939_v62, %v798_v61  ;;  %s1311_s20 = smov (!%p380_p11, %s795_s20), 7  ;;  %s972_s12 = sshll.u32 (%p1108_p6), %s1043_s14, 4 }
  0x54   : > { %601 = vmatpush.bf16.msra.mxu0 %v823_v36  ;;  %v803_v5 = vor.u32 %v938_v1, %v800_v2  ;;  %s382_s25 = scalar_lea.vmem %s1301_s2, %s1311_s20  ;;  %s668_s30 = scalar_lea.vmem (%p1108_p6), %s1302_s3, %s972_s12 }
  0x55   : > { %615 = vmatpush.bf16.msra.mxu1 %v887_v37  ;;  %629 = vmatpush.bf16.msra.mxu2 %v827_v38  ;;  %v420_v6 = vld [vmem:[%s382_s25] sm:$0x3] }
  0x56   : > { %643 = vmatpush.bf16.msra.mxu3 %v891_v42  ;;  %v422_v7 = vperm.slane %v420_v6, 0  ;;  %v423_v12 = vperm.slane %v420_v6, 1 }
  0x58   : > { %602 = vmatpush.bf16.msra.mxu0 %v815_v48 }
  0x59   : > { %616 = vmatpush.bf16.msra.mxu1 %v879_v49  ;;  %630 = vmatpush.bf16.msra.mxu2 %v819_v50 }
  0x5a   : > { %644 = vmatpush.bf16.msra.mxu3 %v883_v54 }
  0x5c   : > { %603 = vmatpush.bf16.msra.mxu0 %v807_v60 }
  0x5d   : > { %617 = vmatpush.bf16.msra.mxu1 %v871_v63  ;;  %631 = vmatpush.bf16.msra.mxu2 %v811_v0 }
  0x5e   : > { %645 = vmatpush.bf16.msra.mxu3 %v875_v3 }
  0x5f   : > { %604 = vmatmul.bf16.vlgmr.msra.gmra.mxu0 %v799_v4 }
  0x60   : > { %618 = vmatmul.bf16.vlgmr.msra.gmra.mxu1 %v803_v5  ;;  %632 = vmatmul.bf16.vlgmr.msra.gmra.mxu2 %v799_v4 }
  0x61   : > { %646 = vmatmul.bf16.vlgmr.msra.gmra.mxu3 %v803_v5 }
  0xdc   : > { %v605_v8 = vpop.f32.mrf.mxu0 }
  0xdd   : > { %v606_v9 = vadd.f32 %v605_v8, %v422_v7  ;;  %v619_v10 = vpop.f32.mrf.mxu1 }
  0xdf   : > { %v620_v11 = vadd.f32 %v619_v10, %v606_v9 }
  0xe1   : > { %652 = vst [vmem:[%s370_s27] sm:$0xff] %v620_v11 }
  0xe3   : > { %v633_v13 = vpop.f32.mrf.mxu2 }
  0xe4   : > { %v634_v14 = vadd.f32 %v633_v13, %v423_v12  ;;  %v647_v15 = vpop.f32.mrf.mxu3  ;;  %v607_v16 = vpop.f32.mrf.mxu0 }
  0xe5   : > { %v608_v17 = vadd.f32 %v607_v16, %v422_v7  ;;  %v621_v19 = vpop.f32.mrf.mxu1 }
  0xe6   : > { %v648_v18 = vadd.f32 %v647_v15, %v634_v14 }
  0xe7   : > { %v622_v20 = vadd.f32 %v621_v19, %v608_v17 }
  0xe8   : > { %653 = vst [vmem:[%s370_s27 + $0x8] sm:$0xff] %v648_v18  ;;  %v681_v25 = vld [vmem:[%s370_s27] sm:$0xff] (%p1108_p6) }
  0xe9   : > { %654 = vst [vmem:[%s370_s27 + $0x10] sm:$0xff] %v622_v20 }
  0xea   : > { %682 = vst [vmem:[%s668_s30] sm:$0xff] (%p1108_p6), %v681_v25 }
  0xeb   : > { %v635_v21 = vpop.f32.mrf.mxu2 }
  0xec   : > { %v636_v22 = vadd.f32 %v635_v21, %v423_v12  ;;  %v649_v23 = vpop.f32.mrf.mxu3  ;;  %662 = sbr.rel (!%p1108_p6) target bundleno = 249 (0xf9), region = 74 }
  0xee   : > { %v650_v24 = vadd.f32 %v649_v23, %v636_v22 }
  0xef   : > { %v683_v26 = vld [vmem:[%s370_s27 + $0x8] sm:$0xff] (%p1108_p6) }
  0xf0   : > { %655 = vst [vmem:[%s370_s27 + $0x18] sm:$0xff] %v650_v24  ;;  %v685_v27 = vld [vmem:[%s370_s27 + $0x10] sm:$0xff] (%p1108_p6) }
  0xf1   : > { %684 = vst [vmem:[%s668_s30 + $0x8] sm:$0xff] %v683_v26 }
  0xf2   : > { %686 = vst [vmem:[%s668_s30 + $0x40] sm:$0xff] %v685_v27 }
  0xf7   : > { %v687_v28 = vld [vmem:[%s370_s27 + $0x18] sm:$0xff] }
  0xf8   : > { %688 = vst [vmem:[%s668_s30 + $0x48] sm:$0xff] %v687_v28 }
  0xf9 PF: > { %s13_s16 = sadd.s32 1, %s1051_s16   ;;  %s1304_s12 = smov %s1039_s13 }
  0xfa   : > { %p10_p12 = scmp.ge.s32.totalorder %s13_s16, 6   ;;  %s1305_s13 = smov %s1113_s22 }
  0xfb   : > { %s1306_s14 = smov %s1047_s15  ;;  %s1307_s15 = smov %s1309_s17 }
  0xfc   :  { %12 = sbr.rel (!%p10_p12) target bundleno = 3 (0x3), region = 134 }

</bundles_post_ra>
